<compile_context>
chip_gen: v7x
topology: tpu7x:2x2x1
jax: 0.10.0
libtpu: 0.0.40
codegen_flags: <defaults>
</compile_context>

<pallas_src>
import functools

import jax
import jax.numpy as jnp
from jax.experimental import pallas as pl
from jax.experimental.pallas import tpu as pltpu


def _round_up(x, m):
    return (x + m - 1) // m * m


def _default_m_blocks():
    """2 parallel M blocks on v7x (2 TensorCores/chip), 1 everywhere else."""
    try:
        kind = jax.devices()[0].device_kind.lower()
    except Exception:
        return 1
    return 2 if ("v7" in kind or "7x" in kind) else 1


_M_BLOCKS = _default_m_blocks()


# --------------------------------------------------------------------------
# Pallas kernel: fused GEMM + bias + activation, lane-dense output
# --------------------------------------------------------------------------

def _gemm_bias_act_kernel(w_ref, x_ref, b_ref, o_ref, *, act):
    """out = act(W @ X + b). W:(Cout,K) bf16, X:(K,tm) bf16, b:(Cout,1) f32."""
    acc = jnp.dot(w_ref[...], x_ref[...], preferred_element_type=jnp.float32)
    acc = acc + b_ref[...]
    if act == "relu":
        acc = jnp.maximum(acc, 0.0)
    elif act == "sigmoid":
        # Numerically-stable sigmoid; exp + reciprocal run on the (otherwise idle) EUP slot.
        z = jnp.exp(-jnp.abs(acc))
        num = jnp.where(acc >= 0.0, 1.0, z)
        acc = num * pl.reciprocal(1.0 + z, approx=True)
        acc = jnp.clip(acc, 0.0, 1.0)  # guard against approx-reciprocal overshoot
    o_ref[...] = acc.astype(o_ref.dtype)


def gemm_bias_act(w_mat, x_mat, b, act, out_dtype, m_blocks=_M_BLOCKS):
    """Fused GEMM+bias+act. w:(Cout,K) bf16, x:(K,M) bf16, b:(Cout,) -> (Cout,M)."""
    Cout, K = w_mat.shape
    _, M = x_mat.shape
    b2 = b.reshape(Cout, 1).astype(jnp.float32)

    if m_blocks > 1 and M >= 1024:
        nb = m_blocks
        tm = _round_up(-(-M // nb), 128)      # lane-aligned M tiles for 2-core split
        Mp = nb * tm
        if Mp != M:
            x_mat = jnp.pad(x_mat, ((0, 0), (0, Mp - M)))
    else:
        nb, tm, Mp = 1, M, M                  # single full-extent block, zero padding

    out = pl.pallas_call(
        functools.partial(_gemm_bias_act_kernel, act=act),
        out_shape=jax.ShapeDtypeStruct((Cout, Mp), out_dtype),
        grid_spec=pltpu.PrefetchScalarGridSpec(
            num_scalar_prefetch=0,
            grid=(nb,),
            in_specs=[
                pl.BlockSpec((Cout, K), lambda i: (0, 0)),   # weights (VMEM-resident)
                pl.BlockSpec((K, tm), lambda i: (0, i)),     # patches, tiled along M
                pl.BlockSpec((Cout, 1), lambda i: (0, 0)),   # bias
            ],
            out_specs=pl.BlockSpec((Cout, tm), lambda i: (0, i)),
        ),
        compiler_params=pltpu.CompilerParams(
            dimension_semantics=("parallel",),
            vmem_limit_bytes=32 << 20,
        ),
    )(w_mat, x_mat, b2)
    return out[:, :M] if Mp != M else out


# --------------------------------------------------------------------------
# Conv / ConvTranspose / MaxPool in channel-major layout [C, N, H, W]
# --------------------------------------------------------------------------

def conv2d_cmajor(x, w_mat, b, k, stride, act, out_dtype):
    """x: [Cin, N, H, W] bf16, w_mat: (Cout, k*k*Cin). Returns [Cout, N, Ho, Wo]."""
    Cin, N, H, W = x.shape
    Cout = w_mat.shape[0]
    Ho = (H - k) // stride + 1
    Wo = (W - k) // stride + 1
    patches = []
    for di in range(k):
        for dj in range(k):
            patches.append(
                jax.lax.slice(
                    x,
                    (0, 0, di, dj),
                    (Cin, N, di + stride * (Ho - 1) + 1, dj + stride * (Wo - 1) + 1),
                    (1, 1, stride, stride),
                )
            )
    p = jnp.stack(patches, axis=0).reshape(k * k * Cin, N * Ho * Wo)  # K order = (di, dj, ci)
    y = gemm_bias_act(w_mat, p, b, act, out_dtype)                    # (Cout, M), lane-dense
    return y.reshape(Cout, N, Ho, Wo)


def conv_transpose2d_cmajor(x, w_mat, b, k, stride, act, out_dtype):
    """ConvTranspose2d(stride=s, padding=0) as zero-insertion + pad + ordinary conv."""
    Cin, N, H, W = x.shape
    if stride > 1:
        Hd = (H - 1) * stride + 1
        Wd = (W - 1) * stride + 1
        x = jnp.zeros((Cin, N, Hd, Wd), x.dtype).at[:, :, ::stride, ::stride].set(x)
    pad = k - 1
    x = jnp.pad(x, ((0, 0), (0, 0), (pad, pad), (pad, pad)))
    return conv2d_cmajor(x, w_mat, b, k, 1, act, out_dtype)


def maxpool_2x2_cmajor(x):
    """MaxPool2d(2, 2) with floor semantics: 3 elementwise maxima of strided slices."""
    C, N, H, W = x.shape
    Ho, Wo = H // 2, W // 2
    xc = x[:, :, : 2 * Ho, : 2 * Wo]
    return jnp.maximum(
        jnp.maximum(xc[:, :, 0::2, 0::2], xc[:, :, 0::2, 1::2]),
        jnp.maximum(xc[:, :, 1::2, 0::2], xc[:, :, 1::2, 1::2]),
    )


# --------------------------------------------------------------------------
# AE module: parameters + forward
# --------------------------------------------------------------------------

def init_params(key):
    def u(k, shape, fan_in):
        bound = 1.0 / float(fan_in) ** 0.5
        return jax.random.uniform(k, shape, jnp.float32, -bound, bound)

    ks = jax.random.split(key, 12)
    return {
        # Conv2d weights: [Cout, Cin, k, k]
        "enc1_w": u(ks[0], (8, 1, 3, 3), 1 * 3 * 3),
        "enc1_b": u(ks[1], (8,), 1 * 3 * 3),
        "enc2_w": u(ks[2], (16, 8, 5, 5), 8 * 5 * 5),
        "enc2_b": u(ks[3], (16,), 8 * 5 * 5),
        "enc3_w": u(ks[4], (32, 16, 5, 5), 16 * 5 * 5),
        "enc3_b": u(ks[5], (32,), 16 * 5 * 5),
        # ConvTranspose2d weights: [Cin, Cout, k, k]
        "dec1_w": u(ks[6], (32, 16, 3, 3), 16 * 3 * 3),
        "dec1_b": u(ks[7], (16,), 16 * 3 * 3),
        "dec2_w": u(ks[8], (16, 8, 5, 5), 8 * 5 * 5),
        "dec2_b": u(ks[9], (8,), 8 * 5 * 5),
        "dec3_w": u(ks[10], (8, 1, 8, 8), 1 * 8 * 8),
        "dec3_b": u(ks[11], (1,), 1 * 8 * 8),
    }


def _conv_mat(w):
    """PyTorch Conv2d weight [Cout, Cin, k, k] -> (Cout, k*k*Cin), (di,dj,ci) K order, bf16."""
    cout, cin, k, _ = w.shape
    return jnp.transpose(w, (0, 2, 3, 1)).reshape(cout, k * k * cin).astype(jnp.bfloat16)


def _deconv_mat(w):
    """PyTorch ConvTranspose2d weight [Cin, Cout, k, k] -> conv-equivalent GEMM matrix."""
    w_conv = jnp.transpose(jnp.flip(w, axis=(2, 3)), (1, 0, 2, 3))  # [Cout, Cin, k, k]
    return _conv_mat(w_conv)


def prepare_params(params):
    """One-time conversion of PyTorch-layout weights into bf16 GEMM matrices + f32 biases."""
    prep = {}
    for name in ("enc1", "enc2", "enc3"):
        prep[name + "_w"] = _conv_mat(params[name + "_w"])
        prep[name + "_b"] = params[name + "_b"].astype(jnp.float32)
    for name in ("dec1", "dec2", "dec3"):
        prep[name + "_w"] = _deconv_mat(params[name + "_w"])
        prep[name + "_b"] = params[name + "_b"].astype(jnp.float32)
    return prep


@jax.jit
def ae_forward(prep, x_nchw):
    # NCHW in/out (PyTorch convention); channel-major [C, N, H, W] bf16 internally.
    x = jnp.transpose(x_nchw.astype(jnp.float32), (1, 0, 2, 3)).astype(jnp.bfloat16)
    x = conv2d_cmajor(x, prep["enc1_w"], prep["enc1_b"], 3, 1, "relu", jnp.bfloat16)
    x = conv2d_cmajor(x, prep["enc2_w"], prep["enc2_b"], 5, 1, "relu", jnp.bfloat16)
    x = conv2d_cmajor(x, prep["enc3_w"], prep["enc3_b"], 5, 2, "relu", jnp.bfloat16)
    x = maxpool_2x2_cmajor(x)
    x = conv_transpose2d_cmajor(x, prep["dec1_w"], prep["dec1_b"], 3, 2, "relu", jnp.bfloat16)
    x = conv_transpose2d_cmajor(x, prep["dec2_w"], prep["dec2_b"], 5, 2, "relu", jnp.bfloat16)
    x = conv_transpose2d_cmajor(x, prep["dec3_w"], prep["dec3_b"], 8, 1, "sigmoid", jnp.float32)
    return jnp.transpose(x, (1, 0, 2, 3))  # [1, N, 28, 28] -> [N, 1, 28, 28]


if __name__ == "__main__":
    key = jax.random.PRNGKey(0)
    pkey, xkey = jax.random.split(key)
    params = init_params(pkey)
    prep = prepare_params(params)

    # MNIST-like input implied by the architecture: 28x28 -> 28x28.
    x = jax.random.uniform(xkey, (2, 1, 28, 28), jnp.float32)

    out = ae_forward(prep, x)
    out = jax.block_until_ready(out)

    assert out.shape == (2, 1, 28, 28), out.shape
    assert out.dtype == jnp.float32
    assert bool(jnp.all(jnp.isfinite(out)))
    assert bool(jnp.all((out >= 0.0) & (out <= 1.0)))  # sigmoid output range
    print("KERNEL_OK")
</pallas_src>

<mosaic_0001>
module attributes {stable_mosaic.version = 11 : i64} {
  func.func @_gemm_bias_act_kernel(%arg0: i32, %arg1: memref<8x9xbf16, #tpu.memory_space<vmem>>, %arg2: memref<9x1352xbf16, #tpu.memory_space<vmem>>, %arg3: memref<8x1xf32, #tpu.memory_space<vmem>>, %arg4: memref<8x1352xbf16, #tpu.memory_space<vmem>>) attributes {dimension_semantics = [#tpu.dimension_semantics<parallel>], iteration_bounds = array<i64: 1>, scalar_prefetch = 0 : i64, scratch_operands = 0 : i64, tpu.core_type = #tpu.core_type<tc>, window_params = [{pipeline_mode = #tpu.pipeline_mode<synchronous>, transform_indices = @transform_0, window_bounds = array<i64: 8, 9>}, {transform_indices = @transform_1, window_bounds = array<i64: 9, 1352>}, {pipeline_mode = #tpu.pipeline_mode<synchronous>, transform_indices = @transform_2, window_bounds = array<i64: 8, 1>}, {transform_indices = @transform_3, window_bounds = array<i64: 8, 1352>}]} {
    %c0 = arith.constant 0 : index
    %c0_0 = arith.constant 0 : index
    %0 = vector.load %arg1[%c0, %c0_0] : memref<8x9xbf16, #tpu.memory_space<vmem>>, vector<8x9xbf16>
    %c0_1 = arith.constant 0 : index
    %c0_2 = arith.constant 0 : index
    %1 = vector.load %arg2[%c0_1, %c0_2] : memref<9x1352xbf16, #tpu.memory_space<vmem>>, vector<9x1352xbf16>
    %cst = arith.constant dense<0.000000e+00> : vector<8x1352xf32>
    %2 = tpu.matmul %0, %1, %cst {dimension_numbers = #tpu.dot_dimension_numbers<[1], [0], [0], [1], [0, 0, 1, 1], [], []>} : vector<8x9xbf16>, vector<9x1352xbf16>, vector<8x1352xf32> -> vector<8x1352xf32>
    %c0_3 = arith.constant 0 : index
    %c0_4 = arith.constant 0 : index
    %3 = vector.load %arg3[%c0_3, %c0_4] : memref<8x1xf32, #tpu.memory_space<vmem>>, vector<8x1xf32>
    %4 = vector.broadcast %3 : vector<8x1xf32> to vector<8x1352xf32>
    %5 = arith.addf %2, %4 : vector<8x1352xf32>
    %cst_5 = arith.constant 0.000000e+00 : f32
    %6 = vector.broadcast %cst_5 : f32 to vector<8x1352xf32>
    %7 = arith.maximumf %5, %6 : vector<8x1352xf32>
    %8 = arith.truncf %7 : vector<8x1352xf32> to vector<8x1352xbf16>
    %c0_6 = arith.constant 0 : index
    %c0_7 = arith.constant 0 : index
    %9 = vector.load %arg4[%c0_6, %c0_7] : memref<8x1352xbf16, #tpu.memory_space<vmem>>, vector<8x1352xbf16>
    tpu.vector_store %arg4[%c0_6, %c0_7], %8 {strides = array<i32>} : memref<8x1352xbf16, #tpu.memory_space<vmem>>, vector<8x1352xbf16>,
    return
  }
  func.func @transform_0(%arg0: i32) -> (i32, i32) {
    %c0_i32 = arith.constant 0 : i32
    %c0_i32_0 = arith.constant 0 : i32
    %c0_i32_1 = arith.constant 0 : i32
    return %c0_i32, %c0_i32_0 : i32, i32
  }
  func.func @transform_1(%arg0: i32) -> (i32, i32) {
    %c0_i32 = arith.constant 0 : i32
    %c0_i32_0 = arith.constant 0 : i32
    return %c0_i32, %arg0 : i32, i32
  }
  func.func @transform_2(%arg0: i32) -> (i32, i32) {
    %c0_i32 = arith.constant 0 : i32
    %c0_i32_0 = arith.constant 0 : i32
    %c0_i32_1 = arith.constant 0 : i32
    return %c0_i32, %c0_i32_0 : i32, i32
  }
  func.func @transform_3(%arg0: i32) -> (i32, i32) {
    %c0_i32 = arith.constant 0 : i32
    %c0_i32_0 = arith.constant 0 : i32
    return %c0_i32, %arg0 : i32, i32
  }
}

module attributes {stable_mosaic.version = 11 : i64} {
  func.func @_gemm_bias_act_kernel(%arg0: i32, %arg1: memref<16x200xbf16, #tpu.memory_space<vmem>>, %arg2: memref<200x968xbf16, #tpu.memory_space<vmem>>, %arg3: memref<16x1xf32, #tpu.memory_space<vmem>>, %arg4: memref<16x968xbf16, #tpu.memory_space<vmem>>) attributes {dimension_semantics = [#tpu.dimension_semantics<parallel>], iteration_bounds = array<i64: 1>, scalar_prefetch = 0 : i64, scratch_operands = 0 : i64, tpu.core_type = #tpu.core_type<tc>, window_params = [{pipeline_mode = #tpu.pipeline_mode<synchronous>, transform_indices = @transform_0, window_bounds = array<i64: 16, 200>}, {transform_indices = @transform_1, window_bounds = array<i64: 200, 968>}, {pipeline_mode = #tpu.pipeline_mode<synchronous>, transform_indices = @transform_2, window_bounds = array<i64: 16, 1>}, {transform_indices = @transform_3, window_bounds = array<i64: 16, 968>}]} {
    %c0 = arith.constant 0 : index
    %c0_0 = arith.constant 0 : index
    %0 = vector.load %arg1[%c0, %c0_0] : memref<16x200xbf16, #tpu.memory_space<vmem>>, vector<16x200xbf16>
    %c0_1 = arith.constant 0 : index
    %c0_2 = arith.constant 0 : index
    %1 = vector.load %arg2[%c0_1, %c0_2] : memref<200x968xbf16, #tpu.memory_space<vmem>>, vector<200x968xbf16>
    %cst = arith.constant dense<0.000000e+00> : vector<16x968xf32>
    %2 = tpu.matmul %0, %1, %cst {dimension_numbers = #tpu.dot_dimension_numbers<[1], [0], [0], [1], [0, 0, 1, 1], [], []>} : vector<16x200xbf16>, vector<200x968xbf16>, vector<16x968xf32> -> vector<16x968xf32>
    %c0_3 = arith.constant 0 : index
    %c0_4 = arith.constant 0 : index
    %3 = vector.load %arg3[%c0_3, %c0_4] : memref<16x1xf32, #tpu.memory_space<vmem>>, vector<16x1xf32>
    %4 = vector.broadcast %3 : vector<16x1xf32> to vector<16x968xf32>
    %5 = arith.addf %2, %4 : vector<16x968xf32>
    %cst_5 = arith.constant 0.000000e+00 : f32
    %6 = vector.broadcast %cst_5 : f32 to vector<16x968xf32>
    %7 = arith.maximumf %5, %6 : vector<16x968xf32>
    %8 = arith.truncf %7 : vector<16x968xf32> to vector<16x968xbf16>
    %c0_6 = arith.constant 0 : index
    %c0_7 = arith.constant 0 : index
    %9 = vector.load %arg4[%c0_6, %c0_7] : memref<16x968xbf16, #tpu.memory_space<vmem>>, vector<16x968xbf16>
    tpu.vector_store %arg4[%c0_6, %c0_7], %8 {strides = array<i32>} : memref<16x968xbf16, #tpu.memory_space<vmem>>, vector<16x968xbf16>,
    return
  }
  func.func @transform_0(%arg0: i32) -> (i32, i32) {
    %c0_i32 = arith.constant 0 : i32
    %c0_i32_0 = arith.constant 0 : i32
    %c0_i32_1 = arith.constant 0 : i32
    return %c0_i32, %c0_i32_0 : i32, i32
  }
  func.func @transform_1(%arg0: i32) -> (i32, i32) {
    %c0_i32 = arith.constant 0 : i32
    %c0_i32_0 = arith.constant 0 : i32
    return %c0_i32, %arg0 : i32, i32
  }
  func.func @transform_2(%arg0: i32) -> (i32, i32) {
    %c0_i32 = arith.constant 0 : i32
    %c0_i32_0 = arith.constant 0 : i32
    %c0_i32_1 = arith.constant 0 : i32
    return %c0_i32, %c0_i32_0 : i32, i32
  }
  func.func @transform_3(%arg0: i32) -> (i32, i32) {
    %c0_i32 = arith.constant 0 : i32
    %c0_i32_0 = arith.constant 0 : i32
    return %c0_i32, %arg0 : i32, i32
  }
}

module attributes {stable_mosaic.version = 11 : i64} {
  func.func @_gemm_bias_act_kernel(%arg0: i32, %arg1: memref<32x400xbf16, #tpu.memory_space<vmem>>, %arg2: memref<400x162xbf16, #tpu.memory_space<vmem>>, %arg3: memref<32x1xf32, #tpu.memory_space<vmem>>, %arg4: memref<32x162xbf16, #tpu.memory_space<vmem>>) attributes {dimension_semantics = [#tpu.dimension_semantics<parallel>], iteration_bounds = array<i64: 1>, scalar_prefetch = 0 : i64, scratch_operands = 0 : i64, tpu.core_type = #tpu.core_type<tc>, window_params = [{pipeline_mode = #tpu.pipeline_mode<synchronous>, transform_indices = @transform_0, window_bounds = array<i64: 32, 400>}, {transform_indices = @transform_1, window_bounds = array<i64: 400, 162>}, {pipeline_mode = #tpu.pipeline_mode<synchronous>, transform_indices = @transform_2, window_bounds = array<i64: 32, 1>}, {transform_indices = @transform_3, window_bounds = array<i64: 32, 162>}]} {
    %c0 = arith.constant 0 : index
    %c0_0 = arith.constant 0 : index
    %0 = vector.load %arg1[%c0, %c0_0] : memref<32x400xbf16, #tpu.memory_space<vmem>>, vector<32x400xbf16>
    %c0_1 = arith.constant 0 : index
    %c0_2 = arith.constant 0 : index
    %1 = vector.load %arg2[%c0_1, %c0_2] : memref<400x162xbf16, #tpu.memory_space<vmem>>, vector<400x162xbf16>
    %cst = arith.constant dense<0.000000e+00> : vector<32x162xf32>
    %2 = tpu.matmul %0, %1, %cst {dimension_numbers = #tpu.dot_dimension_numbers<[1], [0], [0], [1], [0, 0, 1, 1], [], []>} : vector<32x400xbf16>, vector<400x162xbf16>, vector<32x162xf32> -> vector<32x162xf32>
    %c0_3 = arith.constant 0 : index
    %c0_4 = arith.constant 0 : index
    %3 = vector.load %arg3[%c0_3, %c0_4] : memref<32x1xf32, #tpu.memory_space<vmem>>, vector<32x1xf32>
    %4 = vector.broadcast %3 : vector<32x1xf32> to vector<32x162xf32>
    %5 = arith.addf %2, %4 : vector<32x162xf32>
    %cst_5 = arith.constant 0.000000e+00 : f32
    %6 = vector.broadcast %cst_5 : f32 to vector<32x162xf32>
    %7 = arith.maximumf %5, %6 : vector<32x162xf32>
    %8 = arith.truncf %7 : vector<32x162xf32> to vector<32x162xbf16>
    %c0_6 = arith.constant 0 : index
    %c0_7 = arith.constant 0 : index
    %9 = vector.load %arg4[%c0_6, %c0_7] : memref<32x162xbf16, #tpu.memory_space<vmem>>, vector<32x162xbf16>
    tpu.vector_store %arg4[%c0_6, %c0_7], %8 {strides = array<i32>} : memref<32x162xbf16, #tpu.memory_space<vmem>>, vector<32x162xbf16>,
    return
  }
  func.func @transform_0(%arg0: i32) -> (i32, i32) {
    %c0_i32 = arith.constant 0 : i32
    %c0_i32_0 = arith.constant 0 : i32
    %c0_i32_1 = arith.constant 0 : i32
    return %c0_i32, %c0_i32_0 : i32, i32
  }
  func.func @transform_1(%arg0: i32) -> (i32, i32) {
    %c0_i32 = arith.constant 0 : i32
    %c0_i32_0 = arith.constant 0 : i32
    return %c0_i32, %arg0 : i32, i32
  }
  func.func @transform_2(%arg0: i32) -> (i32, i32) {
    %c0_i32 = arith.constant 0 : i32
    %c0_i32_0 = arith.constant 0 : i32
    %c0_i32_1 = arith.constant 0 : i32
    return %c0_i32, %c0_i32_0 : i32, i32
  }
  func.func @transform_3(%arg0: i32) -> (i32, i32) {
    %c0_i32 = arith.constant 0 : i32
    %c0_i32_0 = arith.constant 0 : i32
    return %c0_i32, %arg0 : i32, i32
  }
}

module attributes {stable_mosaic.version = 11 : i64} {
  func.func @_gemm_bias_act_kernel(%arg0: i32, %arg1: memref<16x288xbf16, #tpu.memory_space<vmem>>, %arg2: memref<288x162xbf16, #tpu.memory_space<vmem>>, %arg3: memref<16x1xf32, #tpu.memory_space<vmem>>, %arg4: memref<16x162xbf16, #tpu.memory_space<vmem>>) attributes {dimension_semantics = [#tpu.dimension_semantics<parallel>], iteration_bounds = array<i64: 1>, scalar_prefetch = 0 : i64, scratch_operands = 0 : i64, tpu.core_type = #tpu.core_type<tc>, window_params = [{pipeline_mode = #tpu.pipeline_mode<synchronous>, transform_indices = @transform_0, window_bounds = array<i64: 16, 288>}, {transform_indices = @transform_1, window_bounds = array<i64: 288, 162>}, {pipeline_mode = #tpu.pipeline_mode<synchronous>, transform_indices = @transform_2, window_bounds = array<i64: 16, 1>}, {transform_indices = @transform_3, window_bounds = array<i64: 16, 162>}]} {
    %c0 = arith.constant 0 : index
    %c0_0 = arith.constant 0 : index
    %0 = vector.load %arg1[%c0, %c0_0] : memref<16x288xbf16, #tpu.memory_space<vmem>>, vector<16x288xbf16>
    %c0_1 = arith.constant 0 : index
    %c0_2 = arith.constant 0 : index
    %1 = vector.load %arg2[%c0_1, %c0_2] : memref<288x162xbf16, #tpu.memory_space<vmem>>, vector<288x162xbf16>
    %cst = arith.constant dense<0.000000e+00> : vector<16x162xf32>
    %2 = tpu.matmul %0, %1, %cst {dimension_numbers = #tpu.dot_dimension_numbers<[1], [0], [0], [1], [0, 0, 1, 1], [], []>} : vector<16x288xbf16>, vector<288x162xbf16>, vector<16x162xf32> -> vector<16x162xf32>
    %c0_3 = arith.constant 0 : index
    %c0_4 = arith.constant 0 : index
    %3 = vector.load %arg3[%c0_3, %c0_4] : memref<16x1xf32, #tpu.memory_space<vmem>>, vector<16x1xf32>
    %4 = vector.broadcast %3 : vector<16x1xf32> to vector<16x162xf32>
    %5 = arith.addf %2, %4 : vector<16x162xf32>
    %cst_5 = arith.constant 0.000000e+00 : f32
    %6 = vector.broadcast %cst_5 : f32 to vector<16x162xf32>
    %7 = arith.maximumf %5, %6 : vector<16x162xf32>
    %8 = arith.truncf %7 : vector<16x162xf32> to vector<16x162xbf16>
    %c0_6 = arith.constant 0 : index
    %c0_7 = arith.constant 0 : index
    %9 = vector.load %arg4[%c0_6, %c0_7] : memref<16x162xbf16, #tpu.memory_space<vmem>>, vector<16x162xbf16>
    tpu.vector_store %arg4[%c0_6, %c0_7], %8 {strides = array<i32>} : memref<16x162xbf16, #tpu.memory_space<vmem>>, vector<16x162xbf16>,
    return
  }
  func.func @transform_0(%arg0: i32) -> (i32, i32) {
    %c0_i32 = arith.constant 0 : i32
    %c0_i32_0 = arith.constant 0 : i32
    %c0_i32_1 = arith.constant 0 : i32
    return %c0_i32, %c0_i32_0 : i32, i32
  }
  func.func @transform_1(%arg0: i32) -> (i32, i32) {
    %c0_i32 = arith.constant 0 : i32
    %c0_i32_0 = arith.constant 0 : i32
    return %c0_i32, %arg0 : i32, i32
  }
  func.func @transform_2(%arg0: i32) -> (i32, i32) {
    %c0_i32 = arith.constant 0 : i32
    %c0_i32_0 = arith.constant 0 : i32
    %c0_i32_1 = arith.constant 0 : i32
    return %c0_i32, %c0_i32_0 : i32, i32
  }
  func.func @transform_3(%arg0: i32) -> (i32, i32) {
    %c0_i32 = arith.constant 0 : i32
    %c0_i32_0 = arith.constant 0 : i32
    return %c0_i32, %arg0 : i32, i32
  }
}

module attributes {stable_mosaic.version = 11 : i64} {
  func.func @_gemm_bias_act_kernel(%arg0: i32, %arg1: memref<8x400xbf16, #tpu.memory_space<vmem>>, %arg2: memref<400x882xbf16, #tpu.memory_space<vmem>>, %arg3: memref<8x1xf32, #tpu.memory_space<vmem>>, %arg4: memref<8x882xbf16, #tpu.memory_space<vmem>>) attributes {dimension_semantics = [#tpu.dimension_semantics<parallel>], iteration_bounds = array<i64: 1>, scalar_prefetch = 0 : i64, scratch_operands = 0 : i64, tpu.core_type = #tpu.core_type<tc>, window_params = [{pipeline_mode = #tpu.pipeline_mode<synchronous>, transform_indices = @transform_0, window_bounds = array<i64: 8, 400>}, {transform_indices = @transform_1, window_bounds = array<i64: 400, 882>}, {pipeline_mode = #tpu.pipeline_mode<synchronous>, transform_indices = @transform_2, window_bounds = array<i64: 8, 1>}, {transform_indices = @transform_3, window_bounds = array<i64: 8, 882>}]} {
    %c0 = arith.constant 0 : index
    %c0_0 = arith.constant 0 : index
    %0 = vector.load %arg1[%c0, %c0_0] : memref<8x400xbf16, #tpu.memory_space<vmem>>, vector<8x400xbf16>
    %c0_1 = arith.constant 0 : index
    %c0_2 = arith.constant 0 : index
    %1 = vector.load %arg2[%c0_1, %c0_2] : memref<400x882xbf16, #tpu.memory_space<vmem>>, vector<400x882xbf16>
    %cst = arith.constant dense<0.000000e+00> : vector<8x882xf32>
    %2 = tpu.matmul %0, %1, %cst {dimension_numbers = #tpu.dot_dimension_numbers<[1], [0], [0], [1], [0, 0, 1, 1], [], []>} : vector<8x400xbf16>, vector<400x882xbf16>, vector<8x882xf32> -> vector<8x882xf32>
    %c0_3 = arith.constant 0 : index
    %c0_4 = arith.constant 0 : index
    %3 = vector.load %arg3[%c0_3, %c0_4] : memref<8x1xf32, #tpu.memory_space<vmem>>, vector<8x1xf32>
    %4 = vector.broadcast %3 : vector<8x1xf32> to vector<8x882xf32>
    %5 = arith.addf %2, %4 : vector<8x882xf32>
    %cst_5 = arith.constant 0.000000e+00 : f32
    %6 = vector.broadcast %cst_5 : f32 to vector<8x882xf32>
    %7 = arith.maximumf %5, %6 : vector<8x882xf32>
    %8 = arith.truncf %7 : vector<8x882xf32> to vector<8x882xbf16>
    %c0_6 = arith.constant 0 : index
    %c0_7 = arith.constant 0 : index
    %9 = vector.load %arg4[%c0_6, %c0_7] : memref<8x882xbf16, #tpu.memory_space<vmem>>, vector<8x882xbf16>
    tpu.vector_store %arg4[%c0_6, %c0_7], %8 {strides = array<i32>} : memref<8x882xbf16, #tpu.memory_space<vmem>>, vector<8x882xbf16>,
    return
  }
  func.func @transform_0(%arg0: i32) -> (i32, i32) {
    %c0_i32 = arith.constant 0 : i32
    %c0_i32_0 = arith.constant 0 : i32
    %c0_i32_1 = arith.constant 0 : i32
    return %c0_i32, %c0_i32_0 : i32, i32
  }
  func.func @transform_1(%arg0: i32) -> (i32, i32) {
    %c0_i32 = arith.constant 0 : i32
    %c0_i32_0 = arith.constant 0 : i32
    return %c0_i32, %arg0 : i32, i32
  }
  func.func @transform_2(%arg0: i32) -> (i32, i32) {
    %c0_i32 = arith.constant 0 : i32
    %c0_i32_0 = arith.constant 0 : i32
    %c0_i32_1 = arith.constant 0 : i32
    return %c0_i32, %c0_i32_0 : i32, i32
  }
  func.func @transform_3(%arg0: i32) -> (i32, i32) {
    %c0_i32 = arith.constant 0 : i32
    %c0_i32_0 = arith.constant 0 : i32
    return %c0_i32, %arg0 : i32, i32
  }
}

module attributes {stable_mosaic.version = 11 : i64} {
  func.func @_gemm_bias_act_kernel(%arg0: i32, %arg1: memref<1x512xbf16, #tpu.memory_space<vmem>>, %arg2: memref<512x1568xbf16, #tpu.memory_space<vmem>>, %arg3: memref<1x1xf32, #tpu.memory_space<vmem>>, %arg4: memref<1x1568xf32, #tpu.memory_space<vmem>>) attributes {dimension_semantics = [#tpu.dimension_semantics<parallel>], iteration_bounds = array<i64: 1>, scalar_prefetch = 0 : i64, scratch_operands = 0 : i64, tpu.core_type = #tpu.core_type<tc>, window_params = [{pipeline_mode = #tpu.pipeline_mode<synchronous>, transform_indices = @transform_0, window_bounds = array<i64: 1, 512>}, {transform_indices = @transform_1, window_bounds = array<i64: 512, 1568>}, {pipeline_mode = #tpu.pipeline_mode<synchronous>, transform_indices = @transform_2, window_bounds = array<i64: 1, 1>}, {transform_indices = @transform_3, window_bounds = array<i64: 1, 1568>}]} {
    %c0 = arith.constant 0 : index
    %c0_0 = arith.constant 0 : index
    %0 = vector.load %arg1[%c0, %c0_0] : memref<1x512xbf16, #tpu.memory_space<vmem>>, vector<1x512xbf16>
    %c0_1 = arith.constant 0 : index
    %c0_2 = arith.constant 0 : index
    %1 = vector.load %arg2[%c0_1, %c0_2] : memref<512x1568xbf16, #tpu.memory_space<vmem>>, vector<512x1568xbf16>
    %cst = arith.constant dense<0.000000e+00> : vector<1x1568xf32>
    %2 = tpu.matmul %0, %1, %cst {dimension_numbers = #tpu.dot_dimension_numbers<[1], [0], [0], [1], [0, 0, 1, 1], [], []>} : vector<1x512xbf16>, vector<512x1568xbf16>, vector<1x1568xf32> -> vector<1x1568xf32>
    %c0_3 = arith.constant 0 : index
    %c0_4 = arith.constant 0 : index
    %3 = vector.load %arg3[%c0_3, %c0_4] : memref<1x1xf32, #tpu.memory_space<vmem>>, vector<1x1xf32>
    %4 = vector.broadcast %3 : vector<1x1xf32> to vector<1x1568xf32>
    %5 = arith.addf %2, %4 : vector<1x1568xf32>
    %6 = math.absf %5 : vector<1x1568xf32>
    %cst_5 = arith.constant 0.000000e+00 : f32
    %7 = vector.broadcast %cst_5 : f32 to vector<1x1568xf32>
    %8 = arith.subf %7, %6 : vector<1x1568xf32>
    %9 = math.exp %8 : vector<1x1568xf32>
    %cst_6 = arith.constant 0.000000e+00 : f32
    %10 = vector.broadcast %cst_6 : f32 to vector<1x1568xf32>
    %11 = arith.cmpf oge, %5, %10 : vector<1x1568xf32>
    %cst_7 = arith.constant 1.000000e+00 : f32
    %12 = vector.broadcast %cst_7 : f32 to vector<1x1568xf32>
    %13 = arith.select %11, %12, %9 : vector<1x1568xi1>, vector<1x1568xf32>
    %cst_8 = arith.constant 1.000000e+00 : f32
    %14 = vector.broadcast %cst_8 : f32 to vector<1x1568xf32>
    %15 = arith.addf %14, %9 : vector<1x1568xf32>
    %16 = tpu.reciprocal %15 {approx = true} : vector<1x1568xf32> -> vector<1x1568xf32>
    %17 = arith.mulf %13, %16 : vector<1x1568xf32>
    %cst_9 = arith.constant 0.000000e+00 : f32
    %cst_10 = arith.constant 1.000000e+00 : f32
    %18 = vector.broadcast %cst_9 : f32 to vector<1x1568xf32>
    %19 = arith.maximumf %18, %17 : vector<1x1568xf32>
    %20 = vector.broadcast %cst_10 : f32 to vector<1x1568xf32>
    %21 = arith.minimumf %20, %19 : vector<1x1568xf32>
    %c0_11 = arith.constant 0 : index
    %c0_12 = arith.constant 0 : index
    %22 = vector.load %arg4[%c0_11, %c0_12] : memref<1x1568xf32, #tpu.memory_space<vmem>>, vector<1x1568xf32>
    tpu.vector_store %arg4[%c0_11, %c0_12], %21 {strides = array<i32>} : memref<1x1568xf32, #tpu.memory_space<vmem>>, vector<1x1568xf32>,
    return
  }
  func.func @transform_0(%arg0: i32) -> (i32, i32) {
    %c0_i32 = arith.constant 0 : i32
    %c0_i32_0 = arith.constant 0 : i32
    %c0_i32_1 = arith.constant 0 : i32
    return %c0_i32, %c0_i32_0 : i32, i32
  }
  func.func @transform_1(%arg0: i32) -> (i32, i32) {
    %c0_i32 = arith.constant 0 : i32
    %c0_i32_0 = arith.constant 0 : i32
    return %c0_i32, %arg0 : i32, i32
  }
  func.func @transform_2(%arg0: i32) -> (i32, i32) {
    %c0_i32 = arith.constant 0 : i32
    %c0_i32_0 = arith.constant 0 : i32
    %c0_i32_1 = arith.constant 0 : i32
    return %c0_i32, %c0_i32_0 : i32, i32
  }
  func.func @transform_3(%arg0: i32) -> (i32, i32) {
    %c0_i32 = arith.constant 0 : i32
    %c0_i32_0 = arith.constant 0 : i32
    return %c0_i32, %arg0 : i32, i32
  }
}

</mosaic_0001>

<bundles_post_ra>
// kernel: ae_forward.6
= control target key start
LH: loop header
LB: loop body
LE: loop exit
PB: predicated region body
PF: predicated region fallthrough
CT: control target
= control target key end

     0   :  { %8 = vsyncpa [#allocation3], 0  ;;  %s528_s12 = smov [#allocation2]   ;;  %s625_s0 = inlined_call_operand.hbm [shape: bf16[8,9], index: 0, kind: input, shape index: {}]   ;;  %s626_s1 = inlined_call_operand.vmem [shape: bf16[9,1352], index: 1, kind: input, shape index: {}]   ;;  %s627_s2 = inlined_call_operand.vmem [shape: f32[8,1], index: 2, kind: input, shape index: {}]   ;;  %s628_s3 = inlined_call_operand.vmem [shape: bf16[8,1352], index: 3, kind: output, shape index: {}]  }
   0x1   :  { %s15_s13 = sshll.u32 %s528_s12, 4  ;;  %s504_s16 = scalar_lea.hbm %s625_s0, 64  ;;  %s16_s13 = int_to_ptr.vmem [resolvable:$true] %s15_s13 }
   0x2   :  { %p505_p0 = scmp.ne.s32.totalorder %s625_s0, %s504_s16  ;;  %p508_p1 = scmp.lt.u32.totalorder %s504_s16, %s625_s0 }
   0x4   :  { %p510_p2 = pnand %p508_p1, %p505_p0 }
   0x6   :  { %513 = shalt.err (!%p510_p2)
}
   0x7   :  { %s514_s21 = scalar_lea.vmem %s16_s13, 64  ;;  %p519_p4 = scmp.lt.s32.totalorder %s16_s13, %s16_s13 }
   0x8   :  { %p515_p3 = scmp.ne.s32.totalorder %s16_s13, %s514_s21  ;;  %p520_p5 = scmp.lt.s32.totalorder %s514_s21, %s514_s21 }
   0xa   :  { %p521_p6 = por %p520_p5, %p519_p4 }
   0xc   :  { %p522_p7 = pnand %p521_p6, %p515_p3 }
   0xe   :  { %525 = shalt.err (!%p522_p7)
}
   0xf   :  { %18 = dma.hbm_to_vmem [thread:$0]  %s625_s0, 64, %s16_s13, [#allocation3]  }
  0x10   :  { %526 = dma.done.wait [#allocation3], 64  }
  0x11   :  { %527 = vsyncadd [#allocation3], 4294967232  ;;  %vm95_vm0 = vcmask 1043456   ;;  %v529_v0 = vmov 0   ;;  %vm96_vm1 = vcmask 1044480   ;;  %v530_v1 = vmov 65535  }
  0x12   :  { %164 = vmatprep.mubr.bf16.mxu0 %v529_v0  ;;  %205 = vmatprep.mubr.bf16.mxu1 %v529_v0  ;;  %v97_v2 = vsel %vm95_vm0, 4294967295, %v530_v1  ;;  %v488_v4 = vld [vmem:[%s626_s1 + $0x4] ss:$44 sps:$4 sm:$0x1f]   ;;  %vm91_vm2 = vcmask 72704   ;;  %v531_v26 = vmov 0.0  }
  0x13   :  { %487 = vset.pattern.permute.xlu0 %v529_v0  ;;  %v98_v3 = vsel %vm96_vm1, %v97_v2, 0  ;;  %v490_v5 = vld [vmem:[%s626_s1 + $0xc] ss:$44 sps:$4 sm:$0x1f]   ;;  %v27_v12 = vld [vmem:[#allocation2] sm:$0xf] }
  0x14   :  { %v103_v6 = vand.u32 %v488_v4, %v98_v3  ;;  %v492_v7 = vld [vmem:[%s626_s1] ss:$44 sps:$4 sm:$0x1f]   ;;  %v493_v8 = vld [vmem:[%s626_s1 + $0x8] ss:$44 sps:$4 sm:$0x1f]   ;;  %v109_v9 = vand.u32 %v490_v5, %v98_v3 }
  0x15   :  { %v100_v10 = vand.u32 %v492_v7, %v98_v3  ;;  %v106_v11 = vand.u32 %v493_v8, %v98_v3  ;;  %v494_v13 = vld [vmem:[%s626_s1 + $0x10] ss:$44 sps:$4 sm:$0x1f]   ;;  %v496_v14 = vld [vmem:[%s626_s1 + $0x14] ss:$44 sps:$4 sm:$0x1f]  }
  0x16   :  { %132 = vmatprep.subr.bf16.mxu0 %v103_v6  ;;  %173 = vmatprep.subr.bf16.mxu1 %v109_v9  ;;  %v497_v15 = vld [vmem:[%s626_s1 + $0x18] ss:$44 sps:$4 sm:$0x1f]   ;;  %v115_v16 = vand.u32 %v496_v14, %v98_v3  ;;  %v112_v17 = vand.u32 %v494_v13, %v98_v3  ;;  %v499_v18 = vld [vmem:[%s626_s1 + $0x1c] ss:$44 sps:$4 sm:$0x1f]  }
  0x17   :  { %133 = vmatpush1.bf16.msra.mxu0 %v100_v10  ;;  %174 = vmatpush1.bf16.msra.mxu1 %v106_v11  ;;  %v118_v19 = vand.u32 %v497_v15, %v98_v3  ;;  %v502_v20 = vld [vmem:[%s626_s1 + $0x24] ss:$44 sps:$4 sm:$0x1f]   ;;  %v121_v21 = vand.u32 %v499_v18, %v98_v3  ;;  %v500_v22 = vld [vmem:[%s626_s1 + $0x20] ss:$44 sps:$4 sm:$0x1f]  }
  0x18   :  { %214 = vmatprep.subr.bf16.mxu0 %v115_v16  ;;  %v127_v23 = vand.u32 %v502_v20, %v98_v3  ;;  %v503_v24 = vld [vmem:[%s626_s1 + $0x28] ss:$44 sps:$4 sm:$0x1f]   ;;  %v40_v25 = vld [vmem:[%s627_s2] sm:$0xff]  ;;  %v124_v27 = vand.u32 %v500_v22, %v98_v3  ;;  %vm532_vm3 = vmmov 0   ;;  %vm438_vm4 = vcmask 584704  }
  0x19   :  { %255 = vmatprep.subr.bf16.mxu1 %v121_v21  ;;  %43 = vperm.xlu0 %487, %v40_v25   ;;  %v130_v28 = vand.u32 %v503_v24, %v98_v3 }
  0x1a   :  { %456 = vmatmul.mubr.msk.bf16.vlgmr.msra.gmra.mrb[0].mxu0 %vm91_vm2, %v27_v12  ;;  %457 = vmatmul.mubr.msk.bf16.vlgmr.msra.gmra.mrb[0].mxu1 %vm91_vm2, %v27_v12 }
  0x1b   :  { %215 = vmatpush1.bf16.msra.mxu0 %v112_v17  ;;  %256 = vmatpush1.bf16.msra.mxu1 %v118_v19 }
  0x1c   :  { %246 = vmatprep.mubr.bf16.mxu0 %v529_v0  ;;  %287 = vmatprep.mubr.bf16.mxu1 %v529_v0 }
  0x1d   :  { %296 = vmatprep.subr.bf16.mxu0 %v127_v23  ;;  %476 = vmatprep.subr.bf16.mxu1 %v531_v26 }
  0x22   :  { %458 = vmatmul.mubr.msk.bf16.vlgmr.msra.gmra.mrb[4].mxu0 %vm91_vm2, %v27_v12  ;;  %459 = vmatmul.mubr.msk.bf16.vlgmr.msra.gmra.mrb[4].mxu1 %vm91_vm2, %v27_v12 }
  0x23   :  { %297 = vmatpush1.bf16.msra.mxu0 %v124_v27  ;;  %477 = vmatpush3.bf16.msra.mxu1 %v130_v28 }
  0x24   :  { %328 = vmatprep.mubr.bf16.mxu0 %v529_v0  ;;  %478 = vmatprep.mubr.msk.bf16.mxu1 %vm532_vm3, %v531_v26 }
  0x2a   :  { %460 = vmatmul.mubr.msk.bf16.vlgmr.msra.gmra.mrb[8].mxu0 %vm91_vm2, %v27_v12  ;;  %479 = vmatmul.mubr.msk.bf16.vlgmr.msra.gmra.mrb[8].mxu1 %vm91_vm2, %v27_v12 }
  0x98   :  { %v44_v29 = vpop.permute.xlu0 %43 }
  0xed   :  { %v166_v30 = vpop.f32.mrb[0].mxu0  ;;  %v207_v31 = vpop.f32.mrb[0].mxu1 }
  0xee   :  { %v167_v32 = vadd.f32 %v166_v30, %v44_v29  ;;  %v168_v33 = vpop.f32.mrb[1].mxu0  ;;  %v208_v34 = vadd.f32 %v207_v31, %v44_v29  ;;  %v209_v35 = vpop.f32.mrb[1].mxu1 }
  0xef   :  { %v169_v36 = vadd.f32 %v168_v33, %v44_v29  ;;  %v210_v37 = vadd.f32 %v209_v35, %v44_v29  ;;  %v170_v38 = vpop.f32.mrb[2].mxu0  ;;  %v211_v39 = vpop.f32.mrb[2].mxu1 }
  0xf0   :  { %v377_v40 = vmax.f32 %v167_v32, 0.0  ;;  %v379_v41 = vmax.f32 %v208_v34, 0.0  ;;  %v171_v42 = vpop.f32.mrb[3].mxu0  ;;  %v212_v43 = vpop.f32.mrb[3].mxu1 }
  0xf1   :  { %v378_v44 = vmax.f32 %v169_v36, 0.0  ;;  %v380_v45 = vmax.f32 %v210_v37, 0.0 }
  0xf3   :  { %v468_v46 = vpack.c.bf16 %v378_v44, %v377_v40  ;;  %v469_v47 = vpack.c.bf16 %v380_v45, %v379_v41 }
  0xf5   :  { %433 = vst [vmem:[%s628_s3] sm:$0xff] %v468_v46  ;;  %434 = vst [vmem:[%s628_s3 + $0x8] sm:$0xff] %v469_v47  ;;  %v248_v48 = vpop.f32.mrb[4].mxu0  ;;  %v289_v49 = vpop.f32.mrb[4].mxu1 }
  0xf6   :  { %v249_v50 = vadd.f32 %v248_v48, %v44_v29  ;;  %v290_v51 = vadd.f32 %v289_v49, %v44_v29  ;;  %v250_v52 = vpop.f32.mrb[5].mxu0  ;;  %v291_v53 = vpop.f32.mrb[5].mxu1 }
  0xf7   :  { %v251_v54 = vadd.f32 %v250_v52, %v44_v29  ;;  %v292_v55 = vadd.f32 %v291_v53, %v44_v29  ;;  %v252_v56 = vpop.f32.mrb[6].mxu0  ;;  %v293_v57 = vpop.f32.mrb[6].mxu1 }
  0xf8   :  { %v381_v58 = vmax.f32 %v249_v50, 0.0  ;;  %v383_v59 = vmax.f32 %v290_v51, 0.0  ;;  %v253_v60 = vpop.f32.mrb[7].mxu0  ;;  %v294_v61 = vpop.f32.mrb[7].mxu1 }
  0xf9   :  { %v382_v62 = vmax.f32 %v251_v54, 0.0  ;;  %v384_v63 = vmax.f32 %v292_v55, 0.0 }
  0xfb   :  { %v470_v0 = vpack.c.bf16 %v382_v62, %v381_v58  ;;  %v471_v1 = vpack.c.bf16 %v384_v63, %v383_v59 }
  0xfd   :  { %435 = vst [vmem:[%s628_s3 + $0x10] sm:$0xff] %v470_v0  ;;  %436 = vst [vmem:[%s628_s3 + $0x18] sm:$0xff] %v471_v1  ;;  %v330_v2 = vpop.f32.mrb[8].mxu0  ;;  %v371_v3 = vpop.f32.mrb[8].mxu1 }
  0xfe   :  { %v331_v4 = vadd.f32 %v330_v2, %v44_v29  ;;  %v372_v5 = vadd.f32 %v371_v3, %v44_v29  ;;  %v332_v6 = vpop.f32.mrb[9].mxu0  ;;  %v480_v7 = vpop.f32.mrb[9].mxu1 }
  0xff   :  { %v333_v8 = vadd.f32 %v332_v6, %v44_v29  ;;  %v334_v9 = vpop.f32.mrb[10].mxu0  ;;  %v374_v10 = vpop.f32.mrb[10].mxu1 }
 0x100   :  { %v385_v11 = vmax.f32 %v331_v4, 0.0  ;;  %v387_v12 = vmax.f32 %v372_v5, 0.0  ;;  %v335_v13 = vpop.f32.mrb[11].mxu0  ;;  %v481_v14 = vpop.f32.mrb[11].mxu1 }
 0x101   :  { %v386_v15 = vmax.f32 %v333_v8, 0.0 }
 0x102   :  { %v473_v16 = vpack.c.bf16 %v387_v12, %v387_v12 }
 0x103   :  { %v472_v17 = vpack.c.bf16 %v386_v15, %v385_v11 }
 0x104   :  { %439 = vst.msk [vmem:[%s628_s3 + $0x28] sm:$0xf] %vm438_vm4, %v473_v16 }
 0x105   :  { %437 = vst [vmem:[%s628_s3 + $0x20] sm:$0xff] %v472_v17 }
 0x106   :  { %444 = vsyncpa [#allocation3], 1 }

// kernel: ae_forward.7
= control target key start
LH: loop header
LB: loop body
LE: loop exit
PB: predicated region body
PF: predicated region fallthrough
CT: control target
= control target key end

     0   :  { %v1060_v3 = vmov 0   ;;  %vm638_vm0 = vcmask 588800   ;;  %vm642_vm1 = vcmask 1043456   ;;  %vm906_vm2 = vcmask 588804   ;;  %s1442_s1 = inlined_call_operand.vmem [shape: bf16[200,968], index: 1, kind: input, shape index: {}]   ;;  %s1443_s0 = inlined_call_operand.vmem [shape: bf16[16,200], index: 0, kind: input, shape index: {}]   ;;  %s1444_s2 = inlined_call_operand.vmem [shape: f32[16,1], index: 2, kind: input, shape index: {}]   ;;  %s1445_s3 = inlined_call_operand.vmem [shape: bf16[16,968], index: 3, kind: output, shape index: {}]  }
   0x1   :  { %v17_v0 = vld [vmem:[%s1442_s1] sm:$0xff]  ;;  %v18_v2 = vld [vmem:[%s1442_s1 + $0x8] sm:$0xff]  ;;  %1048 = vset.pattern.permute.xlu0 %v1060_v3  ;;  %vm907_vm3 = vmor %vm906_vm2, %vm642_vm1 }
   0x2   :  { %v21_v1 = vld [vmem:[%s1442_s1 + $0x20] sm:$0xff]  ;;  %v22_v5 = vld [vmem:[%s1442_s1 + $0x28] sm:$0xff] }
   0x3   :  { %v920_v4 = vcombine.high %v17_v0, %v21_v1  ;;  %v919_v6 = vcombine.low %v17_v0, %v21_v1  ;;  %v25_v7 = vld [vmem:[%s1442_s1 + $0x40] sm:$0xff]  ;;  %v922_v9 = vcombine.high %v18_v2, %v22_v5  ;;  %v921_v10 = vcombine.low %v18_v2, %v22_v5  ;;  %v26_v12 = vld [vmem:[%s1442_s1 + $0x48] sm:$0xff] }
   0x4   :  { %v29_v8 = vld [vmem:[%s1442_s1 + $0x60] sm:$0xff]  ;;  %v30_v13 = vld [vmem:[%s1442_s1 + $0x68] sm:$0xff] }
   0x5   :  { %v928_v11 = vcombine.high %v25_v7, %v29_v8  ;;  %v33_v14 = vld [vmem:[%s1442_s1 + $0x80] sm:$0xff]  ;;  %667 = vmatprep.subr.bf16.mxu0 %v920_v4  ;;  %v930_v15 = vcombine.high %v26_v12, %v30_v13  ;;  %v34_v17 = vld [vmem:[%s1442_s1 + $0x88] sm:$0xff]  ;;  %710 = vmatprep.subr.bf16.mxu1 %v922_v9  ;;  %v927_v19 = vcombine.low %v25_v7, %v29_v8 }
   0x6   :  { %v37_v16 = vld [vmem:[%s1442_s1 + $0xa0] sm:$0xff]  ;;  %v38_v18 = vld [vmem:[%s1442_s1 + $0xa8] sm:$0xff]  ;;  %668 = vmatpush1.bf16.msra.mxu0 %v919_v6  ;;  %711 = vmatpush1.bf16.msra.mxu1 %v921_v10  ;;  %v929_v20 = vcombine.low %v26_v12, %v30_v13 }
   0x7   :  { %669 = vmatprep.subr.bf16.mxu0 %v928_v11  ;;  %v936_v21 = vcombine.high %v33_v14, %v37_v16  ;;  %712 = vmatprep.subr.bf16.mxu1 %v930_v15  ;;  %v938_v22 = vcombine.high %v34_v17, %v38_v18  ;;  %v41_v23 = vld [vmem:[%s1442_s1 + $0xc0] sm:$0xff]  ;;  %v42_v25 = vld [vmem:[%s1442_s1 + $0xc8] sm:$0xff]  ;;  %v935_v27 = vcombine.low %v33_v14, %v37_v16 }
   0x8   :  { %v45_v24 = vld [vmem:[%s1442_s1 + $0xe0] sm:$0xff]  ;;  %v46_v26 = vld [vmem:[%s1442_s1 + $0xe8] sm:$0xff]  ;;  %v937_v28 = vcombine.low %v34_v17, %v38_v18 }
   0x9   :  { %v944_v29 = vcombine.high %v41_v23, %v45_v24  ;;  %v946_v30 = vcombine.high %v42_v25, %v46_v26  ;;  %v49_v31 = vld [vmem:[%s1442_s1 + $0x100] sm:$0xff]  ;;  %v50_v33 = vld [vmem:[%s1442_s1 + $0x108] sm:$0xff]  ;;  %v943_v35 = vcombine.low %v41_v23, %v45_v24  ;;  %v945_v36 = vcombine.low %v42_v25, %v46_v26 }
   0xa   :  { %670 = vmatpush1.bf16.msra.mxu0 %v927_v19  ;;  %713 = vmatpush1.bf16.msra.mxu1 %v929_v20  ;;  %v53_v32 = vld [vmem:[%s1442_s1 + $0x120] sm:$0xff]  ;;  %v54_v34 = vld [vmem:[%s1442_s1 + $0x128] sm:$0xff] }
   0xb   :  { %671 = vmatprep.subr.bf16.mxu0 %v936_v21  ;;  %714 = vmatprep.subr.bf16.mxu1 %v938_v22  ;;  %v952_v37 = vcombine.high %v49_v31, %v53_v32  ;;  %v954_v38 = vcombine.high %v50_v33, %v54_v34  ;;  %v57_v39 = vld [vmem:[%s1442_s1 + $0x140] sm:$0xff]  ;;  %v58_v41 = vld [vmem:[%s1442_s1 + $0x148] sm:$0xff]  ;;  %v951_v43 = vcombine.low %v49_v31, %v53_v32 }
   0xc   :  { %v61_v40 = vld [vmem:[%s1442_s1 + $0x160] sm:$0xff]  ;;  %v62_v42 = vld [vmem:[%s1442_s1 + $0x168] sm:$0xff]  ;;  %v953_v44 = vcombine.low %v50_v33, %v54_v34 }
   0xd   :  { %v960_v45 = vcombine.high %v57_v39, %v61_v40  ;;  %v1156_v46 = vld [vmem:[%s1443_s0 + $0x4] ss:$8 sps:$4 sm:$0xff]   ;;  %v962_v47 = vcombine.high %v58_v41, %v62_v42  ;;  %v959_v52 = vcombine.low %v57_v39, %v61_v40  ;;  %v961_v53 = vcombine.low %v58_v41, %v62_v42  ;;  %v19_v42 = vld [vmem:[%s1442_s1 + $0x10] sm:$0xff] }
   0xe   :  { %672 = vmatpush1.bf16.msra.mxu0 %v935_v27  ;;  %715 = vmatpush1.bf16.msra.mxu1 %v937_v28  ;;  %v65_v48 = vld [vmem:[%s1442_s1 + $0x180] sm:$0xff]  ;;  %v66_v50 = vld [vmem:[%s1442_s1 + $0x188] sm:$0xff] }
   0xf   :  { %673 = vmatprep.subr.bf16.mxu0 %v944_v29  ;;  %716 = vmatprep.subr.bf16.mxu1 %v946_v30  ;;  %v69_v49 = vld [vmem:[%s1442_s1 + $0x1a0] sm:$0xff]  ;;  %v70_v51 = vld [vmem:[%s1442_s1 + $0x1a8] sm:$0xff] }
  0x10   :  { %1024 = vmatprep.mubr.msk.bf16.mxu0 %vm638_vm0, %v1156_v46  ;;  %1026 = vmatprep.mubr.msk.bf16.mxu1 %vm638_vm0, %v1156_v46  ;;  %v968_v54 = vcombine.high %v65_v48, %v69_v49  ;;  %v970_v55 = vcombine.high %v66_v50, %v70_v51  ;;  %v73_v56 = vld [vmem:[%s1442_s1 + $0x1c0] sm:$0xff]  ;;  %v74_v58 = vld [vmem:[%s1442_s1 + $0x1c8] sm:$0xff]  ;;  %v967_v60 = vcombine.low %v65_v48, %v69_v49 }
  0x11   :  { %v77_v57 = vld [vmem:[%s1442_s1 + $0x1e0] sm:$0xff]  ;;  %v78_v59 = vld [vmem:[%s1442_s1 + $0x1e8] sm:$0xff]  ;;  %v969_v61 = vcombine.low %v66_v50, %v70_v51  ;;  %v27_v51 = vld [vmem:[%s1442_s1 + $0x50] sm:$0xff] }
  0x12   :  { %674 = vmatpush1.bf16.msra.mxu0 %v943_v35  ;;  %717 = vmatpush1.bf16.msra.mxu1 %v945_v36  ;;  %v976_v62 = vcombine.high %v73_v56, %v77_v57  ;;  %v978_v63 = vcombine.high %v74_v58, %v78_v59  ;;  %v81_v0 = vld [vmem:[%s1442_s1 + $0x200] sm:$0xff]  ;;  %v82_v2 = vld [vmem:[%s1442_s1 + $0x208] sm:$0xff]  ;;  %v975_v4 = vcombine.low %v73_v56, %v77_v57 }
  0x13   :  { %675 = vmatprep.subr.bf16.mxu0 %v952_v37  ;;  %718 = vmatprep.subr.bf16.mxu1 %v954_v38  ;;  %v85_v1 = vld [vmem:[%s1442_s1 + $0x220] sm:$0xff]  ;;  %v86_v3 = vld [vmem:[%s1442_s1 + $0x228] sm:$0xff]  ;;  %v977_v5 = vcombine.low %v74_v58, %v78_v59 }
  0x14   :  { %v984_v6 = vcombine.high %v81_v0, %v85_v1  ;;  %v986_v7 = vcombine.high %v82_v2, %v86_v3  ;;  %v89_v8 = vld [vmem:[%s1442_s1 + $0x240] sm:$0xff]  ;;  %v90_v10 = vld [vmem:[%s1442_s1 + $0x248] sm:$0xff]  ;;  %v983_v12 = vcombine.low %v81_v0, %v85_v1  ;;  %v985_v13 = vcombine.low %v82_v2, %v86_v3 }
  0x15   :  { %v93_v9 = vld [vmem:[%s1442_s1 + $0x260] sm:$0xff]  ;;  %v94_v11 = vld [vmem:[%s1442_s1 + $0x268] sm:$0xff] }
  0x16   :  { %676 = vmatpush1.bf16.msra.mxu0 %v951_v43  ;;  %719 = vmatpush1.bf16.msra.mxu1 %v953_v44  ;;  %v992_v14 = vcombine.high %v89_v8, %v93_v9  ;;  %v994_v15 = vcombine.high %v90_v10, %v94_v11  ;;  %v97_v16 = vld [vmem:[%s1442_s1 + $0x280] sm:$0xff]  ;;  %v98_v19 = vld [vmem:[%s1442_s1 + $0x288] sm:$0xff]  ;;  %v991_v21 = vcombine.low %v89_v8, %v93_v9  ;;  %v23_v43 = vld [vmem:[%s1442_s1 + $0x30] sm:$0xff] }
  0x17   :  { %677 = vmatprep.subr.bf16.mxu0 %v960_v45  ;;  %720 = vmatprep.subr.bf16.mxu1 %v962_v47  ;;  %v101_v17 = vld [vmem:[%s1442_s1 + $0x2a0] sm:$0xff]  ;;  %v102_v20 = vld [vmem:[%s1442_s1 + $0x2a8] sm:$0xff]  ;;  %v993_v23 = vcombine.low %v90_v10, %v94_v11  ;;  %v20_v44 = vld [vmem:[%s1442_s1 + $0x18] sm:$0xff]  ;;  %v924_v48 = vcombine.high %v19_v42, %v23_v43  ;;  %v923_v56 = vcombine.low %v19_v42, %v23_v43 }
  0x18   :  { %v117_v18 = vld [vmem:[%s1444_s2] sm:$0xff]  ;;  %v118_v22 = vld [vmem:[%s1444_s2 + $0x8] sm:$0xff]  ;;  %v1000_v24 = vcombine.high %v97_v16, %v101_v17  ;;  %v1002_v25 = vcombine.high %v98_v19, %v102_v20  ;;  %v999_v30 = vcombine.low %v97_v16, %v101_v17  ;;  %v1001_v31 = vcombine.low %v98_v19, %v102_v20  ;;  %v24_v45 = vld [vmem:[%s1442_s1 + $0x38] sm:$0xff] }
  0x19   :  { %121 = vperm.xlu0 %1048, %v117_v18   ;;  %v105_v26 = vld [vmem:[%s1442_s1 + $0x2c0] sm:$0xff]  ;;  %v106_v28 = vld [vmem:[%s1442_s1 + $0x2c8] sm:$0xff]  ;;  %v926_v50 = vcombine.high %v20_v44, %v24_v45  ;;  %v925_v57 = vcombine.low %v20_v44, %v24_v45  ;;  %v59_v19 = vld [vmem:[%s1442_s1 + $0x150] sm:$0xff] }
  0x1a   :  { %678 = vmatpush1.bf16.msra.mxu0 %v959_v52  ;;  %721 = vmatpush1.bf16.msra.mxu1 %v961_v53  ;;  %v109_v27 = vld [vmem:[%s1442_s1 + $0x2e0] sm:$0xff]  ;;  %v110_v29 = vld [vmem:[%s1442_s1 + $0x2e8] sm:$0xff]  ;;  %v31_v52 = vld [vmem:[%s1442_s1 + $0x70] sm:$0xff] }
  0x1b   :  { %679 = vmatprep.subr.bf16.mxu0 %v968_v54  ;;  %722 = vmatprep.subr.bf16.mxu1 %v970_v55  ;;  %v1008_v32 = vcombine.high %v105_v26, %v109_v27  ;;  %v1010_v33 = vcombine.high %v106_v28, %v110_v29  ;;  %v113_v34 = vld [vmem:[%s1442_s1 + $0x300] sm:$0xff]  ;;  %v114_v35 = vld [vmem:[%s1442_s1 + $0x308] sm:$0xff]  ;;  %v1007_v36 = vcombine.low %v105_v26, %v109_v27  ;;  %v28_v54 = vld [vmem:[%s1442_s1 + $0x58] sm:$0xff] }
  0x1c   :  { %v1009_v37 = vcombine.low %v106_v28, %v110_v29  ;;  %v1016_v38 = vcombine.high %v113_v34, %v113_v34  ;;  %v1015_v39 = vcombine.low %v113_v34, %v113_v34  ;;  %v1018_v40 = vcombine.high %v114_v35, %v114_v35  ;;  %v1271_v53 = vld [vmem:[%s1443_s0] ss:$8 sps:$4 sm:$0xff]   ;;  %v32_v55 = vld [vmem:[%s1442_s1 + $0x78] sm:$0xff]  ;;  %v63_v20 = vld [vmem:[%s1442_s1 + $0x170] sm:$0xff] }
  0x1d   :  { %126 = vperm.xlu0 %1048, %v118_v22   ;;  %v1017_v41 = vcombine.low %v114_v35, %v114_v35  ;;  %v932_v58 = vcombine.high %v27_v51, %v31_v52  ;;  %v934_v59 = vcombine.high %v28_v54, %v32_v55  ;;  %v931_v0 = vcombine.low %v27_v51, %v31_v52  ;;  %v64_v22 = vld [vmem:[%s1442_s1 + $0x178] sm:$0xff]  ;;  %v67_v27 = vld [vmem:[%s1442_s1 + $0x190] sm:$0xff] }
  0x1e   :  { %680 = vmatpush1.bf16.msra.mxu0 %v967_v60  ;;  %723 = vmatpush1.bf16.msra.mxu1 %v969_v61  ;;  %v644_v47 = vsel %vm642_vm1, %v1015_v39, 0  ;;  %v35_v60 = vld [vmem:[%s1442_s1 + $0x90] sm:$0xff]  ;;  %v933_v1 = vcombine.low %v28_v54, %v32_v55  ;;  %v68_v29 = vld [vmem:[%s1442_s1 + $0x198] sm:$0xff] }
  0x1f   :  { %681 = vmatprep.subr.bf16.mxu0 %v976_v62  ;;  %724 = vmatprep.subr.bf16.mxu1 %v978_v63  ;;  %v650_v49 = vsel %vm642_vm1, %v1017_v41, 0  ;;  %v39_v61 = vld [vmem:[%s1442_s1 + $0xb0] sm:$0xff]  ;;  %v36_v62 = vld [vmem:[%s1442_s1 + $0x98] sm:$0xff] }
  0x20   :  { %v40_v63 = vld [vmem:[%s1442_s1 + $0xb8] sm:$0xff]  ;;  %v940_v2 = vcombine.high %v35_v60, %v39_v61  ;;  %v939_v8 = vcombine.low %v35_v60, %v39_v61  ;;  %v71_v28 = vld [vmem:[%s1442_s1 + $0x1b0] sm:$0xff] }
  0x21   :  { %v942_v3 = vcombine.high %v36_v62, %v40_v63  ;;  %v941_v9 = vcombine.low %v36_v62, %v40_v63  ;;  %v75_v35 = vld [vmem:[%s1442_s1 + $0x1d0] sm:$0xff]  ;;  %v971_v39 = vcombine.low %v67_v27, %v71_v28  ;;  %v84_v45 = vld [vmem:[%s1442_s1 + $0x218] sm:$0xff] }
  0x22   :  { %682 = vmatpush1.bf16.msra.mxu0 %v975_v4  ;;  %725 = vmatpush1.bf16.msra.mxu1 %v977_v5  ;;  %v43_v4 = vld [vmem:[%s1442_s1 + $0xd0] sm:$0xff]  ;;  %v92_v55 = vld [vmem:[%s1442_s1 + $0x258] sm:$0xff] }
  0x23   :  { %683 = vmatprep.subr.bf16.mxu0 %v984_v6  ;;  %726 = vmatprep.subr.bf16.mxu1 %v986_v7  ;;  %v47_v5 = vld [vmem:[%s1442_s1 + $0xf0] sm:$0xff]  ;;  %v44_v6 = vld [vmem:[%s1442_s1 + $0xd8] sm:$0xff] }
  0x24   :  { %v48_v7 = vld [vmem:[%s1442_s1 + $0xf8] sm:$0xff]  ;;  %v948_v10 = vcombine.high %v43_v4, %v47_v5  ;;  %v83_v43 = vld [vmem:[%s1442_s1 + $0x210] sm:$0xff] }
  0x25   :  { %v950_v11 = vcombine.high %v44_v6, %v48_v7  ;;  %v949_v16 = vcombine.low %v44_v6, %v48_v7  ;;  %v87_v44 = vld [vmem:[%s1442_s1 + $0x230] sm:$0xff]  ;;  %v100_v63 = vld [vmem:[%s1442_s1 + $0x298] sm:$0xff] }
  0x26   :  { %684 = vmatpush1.bf16.msra.mxu0 %v983_v12  ;;  %727 = vmatpush1.bf16.msra.mxu1 %v985_v13  ;;  %v51_v12 = vld [vmem:[%s1442_s1 + $0x110] sm:$0xff]  ;;  %v108_v7 = vld [vmem:[%s1442_s1 + $0x2d8] sm:$0xff] }
  0x27   :  { %685 = vmatprep.subr.bf16.mxu0 %v992_v14  ;;  %728 = vmatprep.subr.bf16.mxu1 %v994_v15  ;;  %v55_v13 = vld [vmem:[%s1442_s1 + $0x130] sm:$0xff]  ;;  %v56_v14 = vld [vmem:[%s1442_s1 + $0x138] sm:$0xff]  ;;  %v947_v15 = vcombine.low %v43_v4, %v47_v5 }
  0x28   :  { %v956_v17 = vcombine.high %v51_v12, %v55_v13  ;;  %v91_v52 = vld [vmem:[%s1442_s1 + $0x250] sm:$0xff] }
  0x29   :  { %v95_v54 = vld [vmem:[%s1442_s1 + $0x270] sm:$0xff] }
  0x2a   :  { %686 = vmatpush1.bf16.msra.mxu0 %v991_v21  ;;  %729 = vmatpush1.bf16.msra.mxu1 %v993_v23  ;;  %v60_v21 = vld [vmem:[%s1442_s1 + $0x158] sm:$0xff]  ;;  %v955_v23 = vcombine.low %v51_v12, %v55_v13  ;;  %v99_v61 = vld [vmem:[%s1442_s1 + $0x290] sm:$0xff] }
  0x2b   :  { %687 = vmatprep.subr.bf16.mxu0 %v1000_v24  ;;  %730 = vmatprep.subr.bf16.mxu1 %v1002_v25  ;;  %v964_v25 = vcombine.high %v59_v19, %v63_v20  ;;  %v966_v26 = vcombine.high %v60_v21, %v64_v22  ;;  %v103_v62 = vld [vmem:[%s1442_s1 + $0x2b0] sm:$0xff] }
  0x2c   :  { %v107_v5 = vld [vmem:[%s1442_s1 + $0x2d0] sm:$0xff] }
  0x2d   :  { %v111_v6 = vld [vmem:[%s1442_s1 + $0x2f0] sm:$0xff] }
  0x2e   :  { %688 = vmatpush1.bf16.msra.mxu0 %v999_v30  ;;  %731 = vmatpush1.bf16.msra.mxu1 %v1001_v31  ;;  %v72_v30 = vld [vmem:[%s1442_s1 + $0x1b8] sm:$0xff]  ;;  %v963_v31 = vcombine.low %v59_v19, %v63_v20  ;;  %v115_v13 = vld [vmem:[%s1442_s1 + $0x310] sm:$0xff] }
  0x2f   :  { %689 = vmatprep.subr.bf16.mxu0 %v1008_v32  ;;  %732 = vmatprep.subr.bf16.mxu1 %v1010_v33  ;;  %v965_v32 = vcombine.low %v60_v21, %v64_v22  ;;  %v972_v33 = vcombine.high %v67_v27, %v71_v28  ;;  %v974_v34 = vcombine.high %v68_v29, %v72_v30 }
  0x32   :  { %690 = vmatpush1.bf16.msra.mxu0 %v1007_v36  ;;  %733 = vmatpush1.bf16.msra.mxu1 %v1009_v37  ;;  %v79_v36 = vld [vmem:[%s1442_s1 + $0x1f0] sm:$0xff]  ;;  %v76_v37 = vld [vmem:[%s1442_s1 + $0x1d8] sm:$0xff] }
  0x33   :  { %1023 = vmatprep.subr.msk.bf16.mxu0 %vm642_vm1, %v1016_v38  ;;  %1025 = vmatprep.subr.msk.bf16.mxu1 %vm642_vm1, %v1018_v40  ;;  %v80_v38 = vld [vmem:[%s1442_s1 + $0x1f8] sm:$0xff]  ;;  %v973_v40 = vcombine.low %v68_v29, %v72_v30  ;;  %v980_v41 = vcombine.high %v75_v35, %v79_v36 }
  0x34   :  { %v982_v42 = vcombine.high %v76_v37, %v80_v38 }
  0x36   :  { %692 = vmatpush1.bf16.msra.mxu0 %v644_v47  ;;  %735 = vmatpush1.bf16.msra.mxu1 %v650_v49  ;;  %v88_v47 = vld [vmem:[%s1442_s1 + $0x238] sm:$0xff]  ;;  %v981_v49 = vcombine.low %v76_v37, %v80_v38 }
  0x37   :  { %753 = vmatprep.subr.bf16.mxu0 %v924_v48  ;;  %796 = vmatprep.subr.bf16.mxu1 %v926_v50  ;;  %v979_v48 = vcombine.low %v75_v35, %v79_v36  ;;  %v988_v50 = vcombine.high %v83_v43, %v87_v44  ;;  %v990_v51 = vcombine.high %v84_v45, %v88_v47 }
  0x39   :  { %700 = vmatmul.mubr.bf16.vlgmr.msra.gmra.mrb[0].mxu0 %v1271_v53  ;;  %743 = vmatmul.mubr.bf16.vlgmr.msra.gmra.mrb[0].mxu1 %v1271_v53 }
  0x3a   :  { %754 = vmatpush1.bf16.msra.mxu0 %v923_v56  ;;  %797 = vmatpush1.bf16.msra.mxu1 %v925_v57  ;;  %v96_v56 = vld [vmem:[%s1442_s1 + $0x278] sm:$0xff]  ;;  %v987_v57 = vcombine.low %v83_v43, %v87_v44 }
  0x3b   :  { %755 = vmatprep.subr.bf16.mxu0 %v932_v58  ;;  %798 = vmatprep.subr.bf16.mxu1 %v934_v59  ;;  %v989_v58 = vcombine.low %v84_v45, %v88_v47  ;;  %v996_v59 = vcombine.high %v91_v52, %v95_v54  ;;  %v998_v60 = vcombine.high %v92_v55, %v96_v56 }
  0x3c   :  { %1028 = vmatprep.mubr.msk.bf16.mxu0 %vm638_vm0, %v1156_v46  ;;  %1030 = vmatprep.mubr.msk.bf16.mxu1 %vm638_vm0, %v1156_v46  ;;  %v52_v46 = vld [vmem:[%s1442_s1 + $0x118] sm:$0xff] }
  0x3d   :  { %v958_v18 = vcombine.high %v52_v46, %v56_v14  ;;  %v957_v24 = vcombine.low %v52_v46, %v56_v14  ;;  %v116_v46 = vld [vmem:[%s1442_s1 + $0x318] sm:$0xff]  ;;  %v1011_v14 = vcombine.low %v107_v5, %v111_v6 }
  0x3e   :  { %756 = vmatpush1.bf16.msra.mxu0 %v931_v0  ;;  %799 = vmatpush1.bf16.msra.mxu1 %v933_v1  ;;  %v104_v0 = vld [vmem:[%s1442_s1 + $0x2b8] sm:$0xff]  ;;  %v995_v1 = vcombine.low %v91_v52, %v95_v54  ;;  %v1021_v19 = vcombine.low %v116_v46, %v116_v46 }
  0x3f   :  { %757 = vmatprep.subr.bf16.mxu0 %v940_v2  ;;  %800 = vmatprep.subr.bf16.mxu1 %v942_v3  ;;  %v997_v2 = vcombine.low %v92_v55, %v96_v56  ;;  %v1004_v3 = vcombine.high %v99_v61, %v103_v62  ;;  %v1006_v4 = vcombine.high %v100_v63, %v104_v0 }
  0x40   :  { %v662_v21 = vsel %vm642_vm1, %v1021_v19, 0 }
  0x42   :  { %758 = vmatpush1.bf16.msra.mxu0 %v939_v8  ;;  %801 = vmatpush1.bf16.msra.mxu1 %v941_v9  ;;  %v112_v8 = vld [vmem:[%s1442_s1 + $0x2f8] sm:$0xff]  ;;  %v1003_v9 = vcombine.low %v99_v61, %v103_v62 }
  0x43   :  { %759 = vmatprep.subr.bf16.mxu0 %v948_v10  ;;  %802 = vmatprep.subr.bf16.mxu1 %v950_v11  ;;  %v1005_v10 = vcombine.low %v100_v63, %v104_v0  ;;  %v1012_v11 = vcombine.high %v107_v5, %v111_v6  ;;  %v1014_v12 = vcombine.high %v108_v7, %v112_v8 }
  0x46   :  { %760 = vmatpush1.bf16.msra.mxu0 %v947_v15  ;;  %803 = vmatpush1.bf16.msra.mxu1 %v949_v16  ;;  %v1013_v15 = vcombine.low %v108_v7, %v112_v8  ;;  %v1020_v16 = vcombine.high %v115_v13, %v115_v13 }
  0x47   :  { %761 = vmatprep.subr.bf16.mxu0 %v956_v17  ;;  %804 = vmatprep.subr.bf16.mxu1 %v958_v18  ;;  %v1019_v17 = vcombine.low %v115_v13, %v115_v13  ;;  %v1022_v18 = vcombine.high %v116_v46, %v116_v46 }
  0x49   :  { %v656_v20 = vsel %vm642_vm1, %v1019_v17, 0 }
  0x4a   :  { %762 = vmatpush1.bf16.msra.mxu0 %v955_v23  ;;  %805 = vmatpush1.bf16.msra.mxu1 %v957_v24 }
  0x4b   :  { %763 = vmatprep.subr.bf16.mxu0 %v964_v25  ;;  %806 = vmatprep.subr.bf16.mxu1 %v966_v26 }
  0x4e   :  { %764 = vmatpush1.bf16.msra.mxu0 %v963_v31  ;;  %807 = vmatpush1.bf16.msra.mxu1 %v965_v32 }
  0x4f   :  { %765 = vmatprep.subr.bf16.mxu0 %v972_v33  ;;  %808 = vmatprep.subr.bf16.mxu1 %v974_v34 }
  0x52   :  { %766 = vmatpush1.bf16.msra.mxu0 %v971_v39  ;;  %809 = vmatpush1.bf16.msra.mxu1 %v973_v40 }
  0x53   :  { %767 = vmatprep.subr.bf16.mxu0 %v980_v41  ;;  %810 = vmatprep.subr.bf16.mxu1 %v982_v42 }
  0x56   :  { %768 = vmatpush1.bf16.msra.mxu0 %v979_v48  ;;  %811 = vmatpush1.bf16.msra.mxu1 %v981_v49 }
  0x57   :  { %769 = vmatprep.subr.bf16.mxu0 %v988_v50  ;;  %812 = vmatprep.subr.bf16.mxu1 %v990_v51 }
  0x5a   :  { %770 = vmatpush1.bf16.msra.mxu0 %v987_v57  ;;  %813 = vmatpush1.bf16.msra.mxu1 %v989_v58 }
  0x5b   :  { %771 = vmatprep.subr.bf16.mxu0 %v996_v59  ;;  %814 = vmatprep.subr.bf16.mxu1 %v998_v60 }
  0x5e   :  { %772 = vmatpush1.bf16.msra.mxu0 %v995_v1  ;;  %815 = vmatpush1.bf16.msra.mxu1 %v997_v2 }
  0x5f   :  { %773 = vmatprep.subr.bf16.mxu0 %v1004_v3  ;;  %816 = vmatprep.subr.bf16.mxu1 %v1006_v4 }
  0x62   :  { %774 = vmatpush1.bf16.msra.mxu0 %v1003_v9  ;;  %817 = vmatpush1.bf16.msra.mxu1 %v1005_v10 }
  0x63   :  { %775 = vmatprep.subr.bf16.mxu0 %v1012_v11  ;;  %818 = vmatprep.subr.bf16.mxu1 %v1014_v12 }
  0x66   :  { %776 = vmatpush1.bf16.msra.mxu0 %v1011_v14  ;;  %819 = vmatpush1.bf16.msra.mxu1 %v1013_v15 }
  0x67   :  { %1027 = vmatprep.subr.msk.bf16.mxu0 %vm642_vm1, %v1020_v16  ;;  %1029 = vmatprep.subr.msk.bf16.mxu1 %vm642_vm1, %v1022_v18 }
  0x6a   :  { %778 = vmatpush1.bf16.msra.mxu0 %v656_v20  ;;  %821 = vmatpush1.bf16.msra.mxu1 %v662_v21 }
  0x6d   :  { %786 = vmatmul.mubr.bf16.vlgmr.msra.gmra.mrb[4].mxu0 %v1271_v53  ;;  %829 = vmatmul.mubr.bf16.vlgmr.msra.gmra.mrb[4].mxu1 %v1271_v53 }
  0x98   :  { %v122_v22 = vpop.permute.xlu0 %121 }
  0x9c   :  { %v127_v24 = vpop.permute.xlu0 %126 }
 0x10c   :  { %v701_v23 = vpop.f32.mrb[0].mxu0  ;;  %v744_v26 = vpop.f32.mrb[0].mxu1 }
 0x10d   :  { %v702_v25 = vadd.f32 %v701_v23, %v122_v22  ;;  %v703_v27 = vpop.f32.mrb[1].mxu0  ;;  %v745_v28 = vadd.f32 %v744_v26, %v122_v22  ;;  %v746_v30 = vpop.f32.mrb[1].mxu1 }
 0x10e   :  { %v704_v29 = vadd.f32 %v703_v27, %v122_v22  ;;  %v705_v31 = vpop.f32.mrb[2].mxu0  ;;  %v747_v33 = vadd.f32 %v746_v30, %v122_v22  ;;  %v748_v35 = vpop.f32.mrb[2].mxu1 }
 0x10f   :  { %v839_v32 = vmax.f32 %v702_v25, 0.0  ;;  %v706_v34 = vadd.f32 %v705_v31, %v127_v24  ;;  %v707_v36 = vpop.f32.mrb[3].mxu0  ;;  %v841_v37 = vmax.f32 %v745_v28, 0.0  ;;  %v749_v39 = vadd.f32 %v748_v35, %v127_v24  ;;  %v750_v53 = vpop.f32.mrb[3].mxu1 }
 0x110   :  { %v840_v38 = vmax.f32 %v704_v29, 0.0  ;;  %v708_v40 = vadd.f32 %v707_v36, %v127_v24  ;;  %v842_v41 = vmax.f32 %v747_v33, 0.0  ;;  %v751_v43 = vadd.f32 %v750_v53, %v127_v24 }
 0x111   :  { %v847_v42 = vmax.f32 %v706_v34, 0.0  ;;  %v849_v45 = vmax.f32 %v749_v39, 0.0 }
 0x112   :  { %v1039_v44 = vpack.c.bf16 %v840_v38, %v839_v32  ;;  %v848_v47 = vmax.f32 %v708_v40, 0.0  ;;  %v1040_v48 = vpack.c.bf16 %v842_v41, %v841_v37  ;;  %v850_v49 = vmax.f32 %v751_v43, 0.0 }
 0x114   :  { %903 = vst [vmem:[%s1445_s3] sm:$0xff] %v1039_v44  ;;  %v1043_v50 = vpack.c.bf16 %v848_v47, %v847_v42  ;;  %904 = vst [vmem:[%s1445_s3 + $0x8] sm:$0xff] %v1040_v48  ;;  %v1044_v51 = vpack.c.bf16 %v850_v49, %v849_v45 }
 0x116   :  { %909 = vst [vmem:[%s1445_s3 + $0x20] sm:$0xff] %v1043_v50  ;;  %910 = vst [vmem:[%s1445_s3 + $0x28] sm:$0xff] %v1044_v51 }
 0x140   :  { %v787_v52 = vpop.f32.mrb[4].mxu0  ;;  %v830_v55 = vpop.f32.mrb[4].mxu1 }
 0x141   :  { %v788_v54 = vadd.f32 %v787_v52, %v122_v22  ;;  %v789_v56 = vpop.f32.mrb[5].mxu0  ;;  %v831_v57 = vadd.f32 %v830_v55, %v122_v22  ;;  %v832_v59 = vpop.f32.mrb[5].mxu1 }
 0x142   :  { %v790_v58 = vadd.f32 %v789_v56, %v122_v22  ;;  %v791_v60 = vpop.f32.mrb[6].mxu0  ;;  %v833_v62 = vadd.f32 %v832_v59, %v122_v22  ;;  %v834_v0 = vpop.f32.mrb[6].mxu1 }
 0x143   :  { %v843_v61 = vmax.f32 %v788_v54, 0.0  ;;  %v792_v63 = vadd.f32 %v791_v60, %v127_v24  ;;  %v793_v1 = vpop.f32.mrb[7].mxu0  ;;  %v845_v2 = vmax.f32 %v831_v57, 0.0  ;;  %v835_v4 = vadd.f32 %v834_v0, %v127_v24  ;;  %v836_v6 = vpop.f32.mrb[7].mxu1 }
 0x144   :  { %v844_v3 = vmax.f32 %v790_v58, 0.0  ;;  %v794_v5 = vadd.f32 %v793_v1, %v127_v24  ;;  %v846_v7 = vmax.f32 %v833_v62, 0.0  ;;  %v837_v9 = vadd.f32 %v836_v6, %v127_v24 }
 0x145   :  { %v851_v8 = vmax.f32 %v792_v63, 0.0  ;;  %v853_v11 = vmax.f32 %v835_v4, 0.0 }
 0x146   :  { %v1041_v10 = vpack.c.bf16 %v844_v3, %v843_v61  ;;  %v852_v12 = vmax.f32 %v794_v5, 0.0  ;;  %v1042_v13 = vpack.c.bf16 %v846_v7, %v845_v2  ;;  %v854_v46 = vmax.f32 %v837_v9, 0.0 }
 0x148   :  { %905 = vst [vmem:[%s1445_s3 + $0x10] sm:$0xff] %v1041_v10  ;;  %v1045_v14 = vpack.c.bf16 %v852_v12, %v851_v8  ;;  %908 = vst.msk [vmem:[%s1445_s3 + $0x18] sm:$0xff] %vm907_vm3, %v1042_v13  ;;  %v1046_v15 = vpack.c.bf16 %v854_v46, %v853_v11 }
 0x14a   :  { %911 = vst [vmem:[%s1445_s3 + $0x30] sm:$0xff] %v1045_v14  ;;  %912 = vst.msk [vmem:[%s1445_s3 + $0x38] sm:$0xff] %vm907_vm3, %v1046_v15 }

// kernel: ae_forward.8
= control target key start
LH: loop header
LB: loop body
LE: loop exit
PB: predicated region body
PF: predicated region fallthrough
CT: control target
= control target key end

     0   :  { %v715_v1 = vmov 0   ;;  %vm385_vm0 = vcmask 130048   ;;  %vm530_vm1 = vcmask 1043456   ;;  %vm531_vm2 = vcmask 277508   ;;  %s948_s1 = inlined_call_operand.vmem [shape: bf16[400,162], index: 1, kind: input, shape index: {}]   ;;  %s949_s0 = inlined_call_operand.vmem [shape: bf16[32,400], index: 0, kind: input, shape index: {}]   ;;  %s950_s2 = inlined_call_operand.vmem [shape: f32[32,1], index: 2, kind: input, shape index: {}]   ;;  %s951_s3 = inlined_call_operand.vmem [shape: bf16[32,162], index: 3, kind: output, shape index: {}]  }
   0x1   :  { %v628_v0 = vld [vmem:[%s948_s1 + $0x4] ss:$8 sps:$4 sm:$0xff]   ;;  %626 = vset.pattern.permute.xlu0 %v715_v1  ;;  %627 = vset.pattern.permute.xlu1 %v715_v1  ;;  %v630_v2 = vld [vmem:[%s948_s1] ss:$8 sps:$4 sm:$0xff]   ;;  %v631_v3 = vld [vmem:[%s948_s1 + $0x14] ss:$8 sps:$4 sm:$0xff]  }
   0x2   :  { %392 = vmatprep.subr.bf16.mxu1 %v628_v0  ;;  %v633_v4 = vld [vmem:[%s948_s1 + $0x10] ss:$8 sps:$4 sm:$0xff]   ;;  %v634_v5 = vld [vmem:[%s948_s1 + $0x24] ss:$8 sps:$4 sm:$0xff]   ;;  %v636_v6 = vld [vmem:[%s948_s1 + $0x20] ss:$8 sps:$4 sm:$0xff]  }
   0x3   :  { %393 = vmatpush1.bf16.msra.mxu1 %v630_v2  ;;  %v637_v7 = vld [vmem:[%s948_s1 + $0x34] ss:$8 sps:$4 sm:$0xff]   ;;  %v649_v8 = vld [vmem:[%s948_s1 + $0x104] ss:$8 sps:$4 sm:$0xff]   ;;  %v639_v9 = vld [vmem:[%s948_s1 + $0x30] ss:$8 sps:$4 sm:$0xff]  }
   0x4   :  { %394 = vmatprep.subr.bf16.mxu1 %v631_v3  ;;  %v640_v10 = vld [vmem:[%s948_s1 + $0x44] ss:$8 sps:$4 sm:$0xff]   ;;  %v653_v11 = vld [vmem:[%s948_s1 + $0x100] ss:$8 sps:$4 sm:$0xff]   ;;  %445 = vmatprep.subr.bf16.mxu0 %v649_v8  ;;  %v655_v12 = vld [vmem:[%s948_s1 + $0x114] ss:$8 sps:$4 sm:$0xff]  }
   0x5   :  { %446 = vmatpush1.bf16.msra.mxu0 %v653_v11  ;;  %v642_v13 = vld [vmem:[%s948_s1 + $0x40] ss:$8 sps:$4 sm:$0xff]   ;;  %v659_v14 = vld [vmem:[%s948_s1 + $0x110] ss:$8 sps:$4 sm:$0xff]   ;;  %v661_v15 = vld [vmem:[%s948_s1 + $0x124] ss:$8 sps:$4 sm:$0xff]  }
   0x6   :  { %447 = vmatprep.subr.bf16.mxu0 %v655_v12  ;;  %v643_v16 = vld [vmem:[%s948_s1 + $0x54] ss:$8 sps:$4 sm:$0xff]   ;;  %v665_v17 = vld [vmem:[%s948_s1 + $0x120] ss:$8 sps:$4 sm:$0xff]   ;;  %v645_v19 = vld [vmem:[%s948_s1 + $0x50] ss:$8 sps:$4 sm:$0xff]  }
   0x7   :  { %395 = vmatpush1.bf16.msra.mxu1 %v633_v4  ;;  %v667_v18 = vld [vmem:[%s948_s1 + $0x134] ss:$8 sps:$4 sm:$0xff]   ;;  %v646_v20 = vld [vmem:[%s948_s1 + $0x64] ss:$8 sps:$4 sm:$0xff]   ;;  %v671_v21 = vld [vmem:[%s948_s1 + $0x130] ss:$8 sps:$4 sm:$0xff]  }
   0x8   :  { %396 = vmatprep.subr.bf16.mxu1 %v634_v5  ;;  %v673_v22 = vld [vmem:[%s948_s1 + $0x144] ss:$8 sps:$4 sm:$0xff]   ;;  %v648_v23 = vld [vmem:[%s948_s1 + $0x60] ss:$8 sps:$4 sm:$0xff]   ;;  %v651_v24 = vld [vmem:[%s948_s1 + $0x74] ss:$8 sps:$4 sm:$0xff]  }
   0x9   :  { %448 = vmatpush1.bf16.msra.mxu0 %v659_v14  ;;  %v677_v25 = vld [vmem:[%s948_s1 + $0x140] ss:$8 sps:$4 sm:$0xff]   ;;  %v679_v26 = vld [vmem:[%s948_s1 + $0x154] ss:$8 sps:$4 sm:$0xff]   ;;  %v654_v27 = vld [vmem:[%s948_s1 + $0x70] ss:$8 sps:$4 sm:$0xff]  }
   0xa   :  { %449 = vmatprep.subr.bf16.mxu0 %v661_v15  ;;  %v657_v28 = vld [vmem:[%s948_s1 + $0x84] ss:$8 sps:$4 sm:$0xff]   ;;  %v683_v29 = vld [vmem:[%s948_s1 + $0x150] ss:$8 sps:$4 sm:$0xff]   ;;  %v660_v31 = vld [vmem:[%s948_s1 + $0x80] ss:$8 sps:$4 sm:$0xff]  }
   0xb   :  { %397 = vmatpush1.bf16.msra.mxu1 %v636_v6  ;;  %v685_v30 = vld [vmem:[%s948_s1 + $0x164] ss:$8 sps:$4 sm:$0xff]   ;;  %v663_v32 = vld [vmem:[%s948_s1 + $0x94] ss:$8 sps:$4 sm:$0xff]   ;;  %v689_v33 = vld [vmem:[%s948_s1 + $0x160] ss:$8 sps:$4 sm:$0xff]  }
   0xc   :  { %398 = vmatprep.subr.bf16.mxu1 %v637_v7  ;;  %v691_v34 = vld [vmem:[%s948_s1 + $0x174] ss:$8 sps:$4 sm:$0xff]   ;;  %v666_v36 = vld [vmem:[%s948_s1 + $0x90] ss:$8 sps:$4 sm:$0xff]   ;;  %v669_v38 = vld [vmem:[%s948_s1 + $0xa4] ss:$8 sps:$4 sm:$0xff]  }
   0xd   :  { %450 = vmatpush1.bf16.msra.mxu0 %v665_v17  ;;  %v705_v35 = vld [vmem:[%s949_s0 + $0xc] ss:$16 sps:$4 sm:$0xff]   ;;  %v708_v37 = vld [vmem:[%s949_s0 + $0x4] ss:$16 sps:$4 sm:$0xff]   ;;  %v695_v39 = vld [vmem:[%s948_s1 + $0x170] ss:$8 sps:$4 sm:$0xff]  }
   0xe   :  { %451 = vmatprep.subr.bf16.mxu0 %v667_v18  ;;  %599 = vmatprep.mubr.msk.bf16.mxu0 %vm385_vm0, %v705_v35  ;;  %v697_v40 = vld [vmem:[%s948_s1 + $0x184] ss:$8 sps:$4 sm:$0xff]   ;;  %v672_v42 = vld [vmem:[%s948_s1 + $0xa0] ss:$8 sps:$4 sm:$0xff]   ;;  %v75_v43 = vld [vmem:[%s950_s2 + $0x10] sm:$0xff] }
   0xf   :  { %399 = vmatpush1.bf16.msra.mxu1 %v639_v9  ;;  %424 = vmatprep.mubr.bf16.mxu1 %v708_v37  ;;  %v73_v41 = vld [vmem:[%s950_s2] sm:$0xff]  ;;  %v675_v44 = vld [vmem:[%s948_s1 + $0xb4] ss:$8 sps:$4 sm:$0xff]   ;;  %v74_v45 = vld [vmem:[%s950_s2 + $0x8] sm:$0xff] }
  0x10   :  { %400 = vmatprep.subr.bf16.mxu1 %v640_v10  ;;  %79 = vperm.xlu0 %626, %v73_v41   ;;  %v701_v46 = vld [vmem:[%s948_s1 + $0x180] ss:$8 sps:$4 sm:$0xff]   ;;  %v76_v47 = vld [vmem:[%s950_s2 + $0x18] sm:$0xff]  ;;  %v681_v49 = vld [vmem:[%s948_s1 + $0xc4] ss:$8 sps:$4 sm:$0xff]  }
  0x11   :  { %452 = vmatpush1.bf16.msra.mxu0 %v671_v21  ;;  %89 = vperm.xlu1 %627, %v75_v43   ;;  %v678_v48 = vld [vmem:[%s948_s1 + $0xb0] ss:$8 sps:$4 sm:$0xff]   ;;  %v709_v51 = vld [vmem:[%s949_s0 + $0x2c] ss:$16 sps:$4 sm:$0xff]   ;;  %v684_v52 = vld [vmem:[%s948_s1 + $0xc0] ss:$8 sps:$4 sm:$0xff]  }
  0x12   :  { %453 = vmatprep.subr.bf16.mxu0 %v673_v22  ;;  %v703_v50 = vld [vmem:[%s949_s0 + $0x8] ss:$16 sps:$4 sm:$0xff]   ;;  %v687_v53 = vld [vmem:[%s948_s1 + $0xd4] ss:$8 sps:$4 sm:$0xff]   ;;  %v693_v55 = vld [vmem:[%s948_s1 + $0xe4] ss:$8 sps:$4 sm:$0xff]  }
  0x13   :  { %401 = vmatpush1.bf16.msra.mxu1 %v642_v13  ;;  %v690_v54 = vld [vmem:[%s948_s1 + $0xd0] ss:$8 sps:$4 sm:$0xff]   ;;  %v696_v57 = vld [vmem:[%s948_s1 + $0xe0] ss:$8 sps:$4 sm:$0xff]   ;;  %v699_v58 = vld [vmem:[%s948_s1 + $0xf4] ss:$8 sps:$4 sm:$0xff]  }
  0x14   :  { %402 = vmatprep.subr.bf16.mxu1 %v643_v16  ;;  %84 = vperm.xlu0 %626, %v74_v45   ;;  %v713_v56 = vld [vmem:[%s949_s0 + $0x28] ss:$16 sps:$4 sm:$0xff]   ;;  %v706_v60 = vld [vmem:[%s949_s0] ss:$16 sps:$4 sm:$0xff]   ;;  %v711_v61 = vld [vmem:[%s949_s0 + $0x24] ss:$16 sps:$4 sm:$0xff]  }
  0x15   :  { %454 = vmatpush1.bf16.msra.mxu0 %v677_v25  ;;  %94 = vperm.xlu1 %627, %v76_v47   ;;  %v702_v59 = vld [vmem:[%s948_s1 + $0xf0] ss:$8 sps:$4 sm:$0xff]   ;;  %vm924_vm3 = vmor %vm531_vm2, %vm530_vm1 }
  0x16   :  { %455 = vmatprep.subr.bf16.mxu0 %v679_v26  ;;  %v714_v62 = vld [vmem:[%s949_s0 + $0x20] ss:$16 sps:$4 sm:$0xff]  }
  0x17   :  { %403 = vmatpush1.bf16.msra.mxu1 %v645_v19 }
  0x18   :  { %404 = vmatprep.subr.bf16.mxu1 %v646_v20 }
  0x19   :  { %456 = vmatpush1.bf16.msra.mxu0 %v683_v29 }
  0x1a   :  { %457 = vmatprep.subr.bf16.mxu0 %v685_v30 }
  0x1b   :  { %405 = vmatpush1.bf16.msra.mxu1 %v648_v23 }
  0x1c   :  { %406 = vmatprep.subr.bf16.mxu1 %v651_v24 }
  0x1d   :  { %458 = vmatpush1.bf16.msra.mxu0 %v689_v33 }
  0x1e   :  { %459 = vmatprep.subr.bf16.mxu0 %v691_v34 }
  0x1f   :  { %407 = vmatpush1.bf16.msra.mxu1 %v654_v27 }
  0x20   :  { %408 = vmatprep.subr.bf16.mxu1 %v657_v28 }
  0x21   :  { %460 = vmatpush1.bf16.msra.mxu0 %v695_v39 }
  0x22   :  { %461 = vmatprep.subr.bf16.mxu0 %v697_v40 }
  0x23   :  { %409 = vmatpush1.bf16.msra.mxu1 %v660_v31 }
  0x24   :  { %410 = vmatprep.subr.bf16.mxu1 %v663_v32 }
  0x25   :  { %462 = vmatpush1.bf16.msra.mxu0 %v701_v46 }
  0x27   :  { %411 = vmatpush1.bf16.msra.mxu1 %v666_v36 }
  0x28   :  { %412 = vmatprep.subr.bf16.mxu1 %v669_v38  ;;  %478 = vmatmul.mubr.bf16.vlgmr.msra.gmra.mrb[0].mxu0 %v703_v50 }
  0x29   :  { %600 = vmatprep.mubr.msk.bf16.mxu0 %vm385_vm0, %v709_v51 }
  0x2b   :  { %413 = vmatpush1.bf16.msra.mxu1 %v672_v42 }
  0x2c   :  { %414 = vmatprep.subr.bf16.mxu1 %v675_v44 }
  0x2f   :  { %415 = vmatpush1.bf16.msra.mxu1 %v678_v48 }
  0x30   :  { %416 = vmatprep.subr.bf16.mxu1 %v681_v49  ;;  %488 = vmatmul.mubr.bf16.gmra.mrb[4].mxu0 %v713_v56 }
  0x33   :  { %417 = vmatpush1.bf16.msra.mxu1 %v684_v52 }
  0x34   :  { %418 = vmatprep.subr.bf16.mxu1 %v687_v53 }
  0x37   :  { %419 = vmatpush1.bf16.msra.mxu1 %v690_v54 }
  0x38   :  { %420 = vmatprep.subr.bf16.mxu1 %v693_v55 }
  0x3b   :  { %421 = vmatpush1.bf16.msra.mxu1 %v696_v57 }
  0x3c   :  { %422 = vmatprep.subr.bf16.mxu1 %v699_v58 }
  0x3f   :  { %423 = vmatpush1.bf16.msra.mxu1 %v702_v59 }
  0x42   :  { %425 = vmatmul.mubr.bf16.vlgmr.msra.gmra.mrb[0].mxu1 %v706_v60 }
  0x43   :  { %434 = vmatprep.mubr.bf16.mxu1 %v711_v61 }
  0x4a   :  { %435 = vmatmul.mubr.bf16.gmra.mrb[4].mxu1 %v714_v62 }
  0x8f   :  { %v80_v7 = vpop.permute.xlu0 %79 }
  0x90   :  { %v90_v18 = vpop.permute.xlu1 %89 }
  0x93   :  { %v85_v9 = vpop.permute.xlu0 %84 }
  0x94   :  { %v95_v32 = vpop.permute.xlu1 %94 }
  0xfb   :  { %v479_v63 = vpop.f32.mrb[0].mxu0 }
  0xfc   :  { %v481_v0 = vpop.f32.mrb[1].mxu0 }
  0xfd   :  { %v483_v1 = vpop.f32.mrb[2].mxu0 }
  0xfe   :  { %v485_v2 = vpop.f32.mrb[3].mxu0 }
 0x103   :  { %v489_v3 = vpop.f32.mrb[4].mxu0 }
 0x104   :  { %v491_v4 = vpop.f32.mrb[5].mxu0 }
 0x105   :  { %v493_v5 = vpop.f32.mrb[6].mxu0 }
 0x106   :  { %v495_v6 = vpop.f32.mrb[7].mxu0 }
 0x115   :  { %v426_v8 = vpop.f32.mrb[0].mxu1 }
 0x116   :  { %v427_v10 = vadd.f32 %v426_v8, %v80_v7  ;;  %v428_v11 = vpop.f32.mrb[1].mxu1 }
 0x117   :  { %v429_v12 = vadd.f32 %v428_v11, %v80_v7  ;;  %v430_v13 = vpop.f32.mrb[2].mxu1 }
 0x118   :  { %v480_v14 = vadd.f32 %v479_v63, %v427_v10  ;;  %v431_v15 = vadd.f32 %v430_v13, %v85_v9  ;;  %v432_v16 = vpop.f32.mrb[3].mxu1 }
 0x119   :  { %v482_v17 = vadd.f32 %v481_v0, %v429_v12  ;;  %v433_v19 = vadd.f32 %v432_v16, %v85_v9 }
 0x11a   :  { %v498_v20 = vmax.f32 %v480_v14, 0.0  ;;  %v484_v21 = vadd.f32 %v483_v1, %v431_v15 }
 0x11b   :  { %v499_v22 = vmax.f32 %v482_v17, 0.0  ;;  %v486_v23 = vadd.f32 %v485_v2, %v433_v19 }
 0x11c   :  { %v500_v25 = vmax.f32 %v484_v21, 0.0 }
 0x11d   :  { %v605_v26 = vpack.c.bf16 %v499_v22, %v498_v20  ;;  %v501_v27 = vmax.f32 %v486_v23, 0.0  ;;  %v436_v28 = vpop.f32.mrb[4].mxu1 }
 0x11e   :  { %v437_v29 = vadd.f32 %v436_v28, %v90_v18  ;;  %v438_v30 = vpop.f32.mrb[5].mxu1 }
 0x11f   :  { %533 = vst.msk [vmem:[%s951_s3] sm:$0xff] %vm924_vm3, %v605_v26  ;;  %v606_v31 = vpack.c.bf16 %v501_v27, %v500_v25  ;;  %v439_v33 = vadd.f32 %v438_v30, %v90_v18  ;;  %v440_v34 = vpop.f32.mrb[6].mxu1 }
 0x120   :  { %v490_v35 = vadd.f32 %v489_v3, %v437_v29  ;;  %v441_v36 = vadd.f32 %v440_v34, %v95_v32  ;;  %v442_v37 = vpop.f32.mrb[7].mxu1 }
 0x121   :  { %534 = vst.msk [vmem:[%s951_s3 + $0x8] sm:$0xff] %vm924_vm3, %v606_v31  ;;  %v492_v38 = vadd.f32 %v491_v4, %v439_v33  ;;  %v443_v39 = vadd.f32 %v442_v37, %v95_v32 }
 0x122   :  { %v502_v40 = vmax.f32 %v490_v35, 0.0  ;;  %v494_v41 = vadd.f32 %v493_v5, %v441_v36 }
 0x123   :  { %v503_v42 = vmax.f32 %v492_v38, 0.0  ;;  %v496_v43 = vadd.f32 %v495_v6, %v443_v39 }
 0x124   :  { %v504_v44 = vmax.f32 %v494_v41, 0.0 }
 0x125   :  { %v607_v45 = vpack.c.bf16 %v503_v42, %v502_v40  ;;  %v505_v46 = vmax.f32 %v496_v43, 0.0 }
 0x127   :  { %535 = vst.msk [vmem:[%s951_s3 + $0x10] sm:$0xff] %vm924_vm3, %v607_v45  ;;  %v608_v47 = vpack.c.bf16 %v505_v46, %v504_v44 }
 0x129   :  { %536 = vst.msk [vmem:[%s951_s3 + $0x18] sm:$0xff] %vm924_vm3, %v608_v47 }

// kernel: ae_forward.9
= control target key start
LH: loop header
LB: loop body
LE: loop exit
PB: predicated region body
PF: predicated region fallthrough
CT: control target
= control target key end

     0   :  { %v489_v1 = vmov 0   ;;  %vm262_vm0 = vcmask 261120   ;;  %vm368_vm1 = vcmask 1043456   ;;  %vm369_vm2 = vcmask 277508   ;;  %s639_s1 = inlined_call_operand.vmem [shape: bf16[288,162], index: 1, kind: input, shape index: {}]   ;;  %s640_s0 = inlined_call_operand.vmem [shape: bf16[16,288], index: 0, kind: input, shape index: {}]   ;;  %s641_s2 = inlined_call_operand.vmem [shape: f32[16,1], index: 2, kind: input, shape index: {}]   ;;  %s642_s3 = inlined_call_operand.vmem [shape: bf16[16,162], index: 3, kind: output, shape index: {}]  }
   0x1   :  { %v431_v0 = vld [vmem:[%s639_s1 + $0x4] ss:$8 sps:$4 sm:$0xff]   ;;  %341 = vmatprep.mubr.bf16.mxu0 %v489_v1  ;;  %430 = vset.pattern.permute.xlu0 %v489_v1  ;;  %v433_v2 = vld [vmem:[%s639_s1] ss:$8 sps:$4 sm:$0xff]   ;;  %v434_v3 = vld [vmem:[%s639_s1 + $0x14] ss:$8 sps:$4 sm:$0xff]  }
   0x2   :  { %266 = vmatprep.subr.bf16.mxu1 %v431_v0  ;;  %v436_v4 = vld [vmem:[%s639_s1 + $0x10] ss:$8 sps:$4 sm:$0xff]   ;;  %v437_v5 = vld [vmem:[%s639_s1 + $0x24] ss:$8 sps:$4 sm:$0xff]   ;;  %v439_v6 = vld [vmem:[%s639_s1 + $0x20] ss:$8 sps:$4 sm:$0xff]  }
   0x3   :  { %267 = vmatpush1.bf16.msra.mxu1 %v433_v2  ;;  %v440_v7 = vld [vmem:[%s639_s1 + $0x34] ss:$8 sps:$4 sm:$0xff]   ;;  %v442_v8 = vld [vmem:[%s639_s1 + $0x30] ss:$8 sps:$4 sm:$0xff]   ;;  %v443_v9 = vld [vmem:[%s639_s1 + $0x44] ss:$8 sps:$4 sm:$0xff]  }
   0x4   :  { %268 = vmatprep.subr.bf16.mxu1 %v434_v3  ;;  %v445_v10 = vld [vmem:[%s639_s1 + $0x40] ss:$8 sps:$4 sm:$0xff]   ;;  %v446_v11 = vld [vmem:[%s639_s1 + $0x54] ss:$8 sps:$4 sm:$0xff]   ;;  %v448_v12 = vld [vmem:[%s639_s1 + $0x50] ss:$8 sps:$4 sm:$0xff]  }
   0x5   :  { %v473_v13 = vld [vmem:[%s639_s1 + $0x104] ss:$8 sps:$4 sm:$0xff]   ;;  %v477_v15 = vld [vmem:[%s639_s1 + $0x100] ss:$8 sps:$4 sm:$0xff]   ;;  %v479_v16 = vld [vmem:[%s639_s1 + $0x114] ss:$8 sps:$4 sm:$0xff]  }
   0x6   :  { %v449_v14 = vld [vmem:[%s639_s1 + $0x64] ss:$8 sps:$4 sm:$0xff]   ;;  %309 = vmatprep.subr.bf16.mxu0 %v473_v13  ;;  %v451_v17 = vld [vmem:[%s639_s1 + $0x60] ss:$8 sps:$4 sm:$0xff]   ;;  %v483_v18 = vld [vmem:[%s639_s1 + $0x110] ss:$8 sps:$4 sm:$0xff]  }
   0x7   :  { %269 = vmatpush1.bf16.msra.mxu1 %v436_v4  ;;  %310 = vmatpush1.bf16.msra.mxu0 %v477_v15  ;;  %v452_v19 = vld [vmem:[%s639_s1 + $0x74] ss:$8 sps:$4 sm:$0xff]   ;;  %v487_v20 = vld [vmem:[%s640_s0 + $0x4] ss:$12 sps:$4 sm:$0xff]   ;;  %v56_v25 = vld [vmem:[%s641_s2 + $0x8] sm:$0xff] }
   0x8   :  { %270 = vmatprep.subr.bf16.mxu1 %v437_v5  ;;  %311 = vmatprep.subr.bf16.mxu0 %v479_v16  ;;  %v488_v21 = vld [vmem:[%s640_s0 + $0x8] ss:$12 sps:$4 sm:$0xff]   ;;  %v55_v22 = vld [vmem:[%s641_s2] sm:$0xff]  ;;  %v454_v23 = vld [vmem:[%s639_s1 + $0x70] ss:$8 sps:$4 sm:$0xff]  }
   0x9   :  { %298 = vmatprep.mubr.bf16.mxu1 %v487_v20  ;;  %v455_v24 = vld [vmem:[%s639_s1 + $0x84] ss:$8 sps:$4 sm:$0xff]   ;;  %59 = vperm.xlu0 %430, %v55_v22   ;;  %v457_v26 = vld [vmem:[%s639_s1 + $0x80] ss:$8 sps:$4 sm:$0xff]   ;;  %v458_v27 = vld [vmem:[%s639_s1 + $0x94] ss:$8 sps:$4 sm:$0xff]  }
   0xa   :  { %v460_v28 = vld [vmem:[%s639_s1 + $0x90] ss:$8 sps:$4 sm:$0xff]   ;;  %v461_v29 = vld [vmem:[%s639_s1 + $0xa4] ss:$8 sps:$4 sm:$0xff]   ;;  %v463_v30 = vld [vmem:[%s639_s1 + $0xa0] ss:$8 sps:$4 sm:$0xff]  }
   0xb   :  { %271 = vmatpush1.bf16.msra.mxu1 %v439_v6  ;;  %312 = vmatpush1.bf16.msra.mxu0 %v483_v18  ;;  %v464_v31 = vld [vmem:[%s639_s1 + $0xb4] ss:$8 sps:$4 sm:$0xff]   ;;  %v466_v32 = vld [vmem:[%s639_s1 + $0xb0] ss:$8 sps:$4 sm:$0xff]   ;;  %v467_v33 = vld [vmem:[%s639_s1 + $0xc4] ss:$8 sps:$4 sm:$0xff]  }
   0xc   :  { %272 = vmatprep.subr.bf16.mxu1 %v440_v7  ;;  %v469_v34 = vld [vmem:[%s639_s1 + $0xc0] ss:$8 sps:$4 sm:$0xff]   ;;  %v470_v35 = vld [vmem:[%s639_s1 + $0xd4] ss:$8 sps:$4 sm:$0xff]   ;;  %v472_v36 = vld [vmem:[%s639_s1 + $0xd0] ss:$8 sps:$4 sm:$0xff]  }
   0xd   :  { %64 = vperm.xlu0 %430, %v56_v25   ;;  %v475_v37 = vld [vmem:[%s639_s1 + $0xe4] ss:$8 sps:$4 sm:$0xff]   ;;  %v478_v38 = vld [vmem:[%s639_s1 + $0xe0] ss:$8 sps:$4 sm:$0xff]   ;;  %v481_v39 = vld [vmem:[%s639_s1 + $0xf4] ss:$8 sps:$4 sm:$0xff]  }
   0xe   :  { %416 = vmatmul.mubr.msk.bf16.vlgmr.msra.gmra.mrb[0].mxu0 %vm262_vm0, %v488_v21  ;;  %v484_v40 = vld [vmem:[%s639_s1 + $0xf0] ss:$8 sps:$4 sm:$0xff]   ;;  %v485_v41 = vld [vmem:[%s640_s0] ss:$12 sps:$4 sm:$0xff]   ;;  %vm370_vm3 = vmor %vm369_vm2, %vm368_vm1 }
   0xf   :  { %273 = vmatpush1.bf16.msra.mxu1 %v442_v8 }
  0x10   :  { %274 = vmatprep.subr.bf16.mxu1 %v443_v9 }
  0x13   :  { %275 = vmatpush1.bf16.msra.mxu1 %v445_v10 }
  0x14   :  { %276 = vmatprep.subr.bf16.mxu1 %v446_v11 }
  0x17   :  { %277 = vmatpush1.bf16.msra.mxu1 %v448_v12 }
  0x18   :  { %278 = vmatprep.subr.bf16.mxu1 %v449_v14 }
  0x1b   :  { %279 = vmatpush1.bf16.msra.mxu1 %v451_v17 }
  0x1c   :  { %280 = vmatprep.subr.bf16.mxu1 %v452_v19 }
  0x1f   :  { %281 = vmatpush1.bf16.msra.mxu1 %v454_v23 }
  0x20   :  { %282 = vmatprep.subr.bf16.mxu1 %v455_v24 }
  0x23   :  { %283 = vmatpush1.bf16.msra.mxu1 %v457_v26 }
  0x24   :  { %284 = vmatprep.subr.bf16.mxu1 %v458_v27 }
  0x27   :  { %285 = vmatpush1.bf16.msra.mxu1 %v460_v28 }
  0x28   :  { %286 = vmatprep.subr.bf16.mxu1 %v461_v29 }
  0x2b   :  { %287 = vmatpush1.bf16.msra.mxu1 %v463_v30 }
  0x2c   :  { %288 = vmatprep.subr.bf16.mxu1 %v464_v31 }
  0x2f   :  { %289 = vmatpush1.bf16.msra.mxu1 %v466_v32 }
  0x30   :  { %290 = vmatprep.subr.bf16.mxu1 %v467_v33 }
  0x33   :  { %291 = vmatpush1.bf16.msra.mxu1 %v469_v34 }
  0x34   :  { %292 = vmatprep.subr.bf16.mxu1 %v470_v35 }
  0x37   :  { %293 = vmatpush1.bf16.msra.mxu1 %v472_v36 }
  0x38   :  { %294 = vmatprep.subr.bf16.mxu1 %v475_v37 }
  0x3b   :  { %295 = vmatpush1.bf16.msra.mxu1 %v478_v38 }
  0x3c   :  { %296 = vmatprep.subr.bf16.mxu1 %v481_v39 }
  0x3f   :  { %297 = vmatpush1.bf16.msra.mxu1 %v484_v40 }
  0x42   :  { %299 = vmatmul.mubr.bf16.vlgmr.msra.gmra.mrb[0].mxu1 %v485_v41 }
  0x88   :  { %v60_v46 = vpop.permute.xlu0 %59 }
  0x8c   :  { %v65_v50 = vpop.permute.xlu0 %64 }
  0xe1   :  { %v343_v42 = vpop.f32.mrb[0].mxu0 }
  0xe2   :  { %v345_v43 = vpop.f32.mrb[1].mxu0 }
  0xe3   :  { %v347_v44 = vpop.f32.mrb[2].mxu0 }
  0xe4   :  { %v349_v45 = vpop.f32.mrb[3].mxu0 }
 0x115   :  { %v300_v47 = vpop.f32.mrb[0].mxu1 }
 0x116   :  { %v301_v48 = vadd.f32 %v300_v47, %v60_v46  ;;  %v302_v49 = vpop.f32.mrb[1].mxu1 }
 0x117   :  { %v303_v51 = vadd.f32 %v302_v49, %v60_v46  ;;  %v304_v52 = vpop.f32.mrb[2].mxu1 }
 0x118   :  { %v344_v53 = vadd.f32 %v343_v42, %v301_v48  ;;  %v305_v54 = vadd.f32 %v304_v52, %v65_v50  ;;  %v306_v55 = vpop.f32.mrb[3].mxu1 }
 0x119   :  { %v346_v56 = vadd.f32 %v345_v43, %v303_v51  ;;  %v307_v57 = vadd.f32 %v306_v55, %v65_v50 }
 0x11a   :  { %v352_v58 = vmax.f32 %v344_v53, 0.0  ;;  %v348_v59 = vadd.f32 %v347_v44, %v305_v54 }
 0x11b   :  { %v353_v60 = vmax.f32 %v346_v56, 0.0  ;;  %v350_v61 = vadd.f32 %v349_v45, %v307_v57 }
 0x11c   :  { %v354_v62 = vmax.f32 %v348_v59, 0.0 }
 0x11d   :  { %v419_v63 = vpack.c.bf16 %v353_v60, %v352_v58  ;;  %v355_v0 = vmax.f32 %v350_v61, 0.0 }
 0x11f   :  { %371 = vst.msk [vmem:[%s642_s3] sm:$0xff] %vm370_vm3, %v419_v63  ;;  %v420_v1 = vpack.c.bf16 %v355_v0, %v354_v62 }
 0x121   :  { %372 = vst.msk [vmem:[%s642_s3 + $0x8] sm:$0xff] %vm370_vm3, %v420_v1 }

// kernel: ae_forward.10
= control target key start
LH: loop header
LB: loop body
LE: loop exit
PB: predicated region body
PF: predicated region fallthrough
CT: control target
= control target key end

     0   :  { %v1998_v14 = vmov 0   ;;  %vm1136_vm0 = vcmask 130048   ;;  %vm1505_vm1 = vcmask 928768   ;;  %s2609_s1 = inlined_call_operand.vmem [shape: bf16[400,882], index: 1, kind: input, shape index: {}]   ;;  %s2610_s0 = inlined_call_operand.vmem [shape: bf16[8,400], index: 0, kind: input, shape index: {}]   ;;  %s2611_s2 = inlined_call_operand.vmem [shape: f32[8,1], index: 2, kind: input, shape index: {}]   ;;  %s2612_s3 = inlined_call_operand.vmem [shape: bf16[8,882], index: 3, kind: output, shape index: {}]  }
   0x1   :  { %v1744_v0 = vld [vmem:[%s2609_s1 + $0x4] ss:$28 sps:$4 sm:$0xff]   ;;  %v1746_v1 = vld [vmem:[%s2609_s1 + $0xc] ss:$28 sps:$4 sm:$0xff]   ;;  %v1750_v4 = vld [vmem:[%s2609_s1 + $0x3c] ss:$28 sps:$4 sm:$0xff]   ;;  %1743 = vset.pattern.permute.xlu0 %v1998_v14 }
   0x2   :  { %1140 = vmatprep.subr.bf16.mxu0 %v1744_v0  ;;  %v1748_v2 = vld [vmem:[%s2609_s1] ss:$28 sps:$4 sm:$0xff]   ;;  %v1749_v3 = vld [vmem:[%s2609_s1 + $0x8] ss:$28 sps:$4 sm:$0xff]   ;;  %1222 = vmatprep.subr.bf16.mxu1 %v1746_v1  ;;  %v1754_v6 = vld [vmem:[%s2609_s1 + $0x38] ss:$28 sps:$4 sm:$0xff]  }
   0x3   :  { %1141 = vmatpush1.bf16.msra.mxu0 %v1748_v2  ;;  %1223 = vmatpush1.bf16.msra.mxu1 %v1749_v3  ;;  %v1752_v5 = vld [vmem:[%s2609_s1 + $0x44] ss:$28 sps:$4 sm:$0xff]   ;;  %v1756_v8 = vld [vmem:[%s2609_s1 + $0x74] ss:$28 sps:$4 sm:$0xff]   ;;  %v1758_v9 = vld [vmem:[%s2609_s1 + $0x7c] ss:$28 sps:$4 sm:$0xff]  }
   0x4   :  { %1142 = vmatprep.subr.bf16.mxu0 %v1750_v4  ;;  %v1755_v7 = vld [vmem:[%s2609_s1 + $0x40] ss:$28 sps:$4 sm:$0xff]   ;;  %1224 = vmatprep.subr.bf16.mxu1 %v1752_v5  ;;  %v1760_v10 = vld [vmem:[%s2609_s1 + $0x70] ss:$28 sps:$4 sm:$0xff]   ;;  %v1761_v11 = vld [vmem:[%s2609_s1 + $0x78] ss:$28 sps:$4 sm:$0xff]  }
   0x5   :  { %v1762_v12 = vld [vmem:[%s2609_s1 + $0xac] ss:$28 sps:$4 sm:$0xff]   ;;  %v1764_v13 = vld [vmem:[%s2609_s1 + $0xb4] ss:$28 sps:$4 sm:$0xff]   ;;  %v1768_v17 = vld [vmem:[%s2609_s1 + $0xe4] ss:$28 sps:$4 sm:$0xff]  }
   0x6   :  { %v1766_v15 = vld [vmem:[%s2609_s1 + $0xa8] ss:$28 sps:$4 sm:$0xff]   ;;  %v1767_v16 = vld [vmem:[%s2609_s1 + $0xb0] ss:$28 sps:$4 sm:$0xff]   ;;  %v1772_v19 = vld [vmem:[%s2609_s1 + $0xe0] ss:$28 sps:$4 sm:$0xff]  }
   0x7   :  { %1143 = vmatpush1.bf16.msra.mxu0 %v1754_v6  ;;  %1225 = vmatpush1.bf16.msra.mxu1 %v1755_v7  ;;  %v1770_v18 = vld [vmem:[%s2609_s1 + $0xec] ss:$28 sps:$4 sm:$0xff]   ;;  %v1774_v21 = vld [vmem:[%s2609_s1 + $0x11c] ss:$28 sps:$4 sm:$0xff]   ;;  %v1776_v22 = vld [vmem:[%s2609_s1 + $0x124] ss:$28 sps:$4 sm:$0xff]  }
   0x8   :  { %1144 = vmatprep.subr.bf16.mxu0 %v1756_v8  ;;  %1226 = vmatprep.subr.bf16.mxu1 %v1758_v9  ;;  %v1773_v20 = vld [vmem:[%s2609_s1 + $0xe8] ss:$28 sps:$4 sm:$0xff]   ;;  %v1778_v23 = vld [vmem:[%s2609_s1 + $0x118] ss:$28 sps:$4 sm:$0xff]   ;;  %v1779_v24 = vld [vmem:[%s2609_s1 + $0x120] ss:$28 sps:$4 sm:$0xff]  }
   0x9   :  { %v1780_v25 = vld [vmem:[%s2609_s1 + $0x154] ss:$28 sps:$4 sm:$0xff]   ;;  %v1782_v26 = vld [vmem:[%s2609_s1 + $0x15c] ss:$28 sps:$4 sm:$0xff]   ;;  %v1786_v29 = vld [vmem:[%s2609_s1 + $0x18c] ss:$28 sps:$4 sm:$0xff]  }
   0xa   :  { %v1784_v27 = vld [vmem:[%s2609_s1 + $0x150] ss:$28 sps:$4 sm:$0xff]   ;;  %v1785_v28 = vld [vmem:[%s2609_s1 + $0x158] ss:$28 sps:$4 sm:$0xff]   ;;  %v1790_v31 = vld [vmem:[%s2609_s1 + $0x188] ss:$28 sps:$4 sm:$0xff]  }
   0xb   :  { %1145 = vmatpush1.bf16.msra.mxu0 %v1760_v10  ;;  %1227 = vmatpush1.bf16.msra.mxu1 %v1761_v11  ;;  %v1788_v30 = vld [vmem:[%s2609_s1 + $0x194] ss:$28 sps:$4 sm:$0xff]   ;;  %v1792_v33 = vld [vmem:[%s2609_s1 + $0x1c4] ss:$28 sps:$4 sm:$0xff]   ;;  %v1794_v34 = vld [vmem:[%s2609_s1 + $0x1cc] ss:$28 sps:$4 sm:$0xff]  }
   0xc   :  { %1146 = vmatprep.subr.bf16.mxu0 %v1762_v12  ;;  %1228 = vmatprep.subr.bf16.mxu1 %v1764_v13  ;;  %v1791_v32 = vld [vmem:[%s2609_s1 + $0x190] ss:$28 sps:$4 sm:$0xff]   ;;  %v1796_v35 = vld [vmem:[%s2609_s1 + $0x1c0] ss:$28 sps:$4 sm:$0xff]   ;;  %v1797_v36 = vld [vmem:[%s2609_s1 + $0x1c8] ss:$28 sps:$4 sm:$0xff]  }
   0xd   :  { %v1798_v37 = vld [vmem:[%s2609_s1 + $0x1fc] ss:$28 sps:$4 sm:$0xff]   ;;  %v1800_v38 = vld [vmem:[%s2609_s1 + $0x204] ss:$28 sps:$4 sm:$0xff]   ;;  %v1804_v41 = vld [vmem:[%s2609_s1 + $0x234] ss:$28 sps:$4 sm:$0xff]  }
   0xe   :  { %v1802_v39 = vld [vmem:[%s2609_s1 + $0x1f8] ss:$28 sps:$4 sm:$0xff]   ;;  %v1803_v40 = vld [vmem:[%s2609_s1 + $0x200] ss:$28 sps:$4 sm:$0xff]   ;;  %v1808_v43 = vld [vmem:[%s2609_s1 + $0x230] ss:$28 sps:$4 sm:$0xff]  }
   0xf   :  { %1147 = vmatpush1.bf16.msra.mxu0 %v1766_v15  ;;  %1229 = vmatpush1.bf16.msra.mxu1 %v1767_v16  ;;  %v1806_v42 = vld [vmem:[%s2609_s1 + $0x23c] ss:$28 sps:$4 sm:$0xff]   ;;  %v1810_v45 = vld [vmem:[%s2609_s1 + $0x26c] ss:$28 sps:$4 sm:$0xff]   ;;  %v1812_v46 = vld [vmem:[%s2609_s1 + $0x274] ss:$28 sps:$4 sm:$0xff]  }
  0x10   :  { %1148 = vmatprep.subr.bf16.mxu0 %v1768_v17  ;;  %1230 = vmatprep.subr.bf16.mxu1 %v1770_v18  ;;  %v1809_v44 = vld [vmem:[%s2609_s1 + $0x238] ss:$28 sps:$4 sm:$0xff]   ;;  %v15_v47 = vld [vmem:[%s2610_s0] sm:$0xff]  ;;  %v1815_v50 = vld [vmem:[%s2609_s1 + $0x270] ss:$28 sps:$4 sm:$0xff]  }
  0x11   :  { %v1814_v48 = vld [vmem:[%s2609_s1 + $0x268] ss:$28 sps:$4 sm:$0xff]   ;;  %v2164_v49 = vcombine.high %v15_v47, %v15_v47  ;;  %v1820_v53 = vld [vmem:[%s2609_s1 + $0x2a0] ss:$28 sps:$4 sm:$0xff]   ;;  %v1826_v57 = vld [vmem:[%s2609_s1 + $0x2d8] ss:$28 sps:$4 sm:$0xff]   ;;  %v2228_v6 = vcombine.low %v15_v47, %v15_v47 }
  0x12   :  { %v1816_v51 = vld [vmem:[%s2609_s1 + $0x2a4] ss:$28 sps:$4 sm:$0xff]   ;;  %v1818_v52 = vld [vmem:[%s2609_s1 + $0x2ac] ss:$28 sps:$4 sm:$0xff]   ;;  %v1822_v55 = vld [vmem:[%s2609_s1 + $0x2dc] ss:$28 sps:$4 sm:$0xff]  }
  0x13   :  { %1149 = vmatpush1.bf16.msra.mxu0 %v1772_v19  ;;  %1231 = vmatpush1.bf16.msra.mxu1 %v1773_v20  ;;  %v1821_v54 = vld [vmem:[%s2609_s1 + $0x2a8] ss:$28 sps:$4 sm:$0xff]   ;;  %v1827_v58 = vld [vmem:[%s2609_s1 + $0x2e0] ss:$28 sps:$4 sm:$0xff]   ;;  %v1828_v59 = vld [vmem:[%s2609_s1 + $0x314] ss:$28 sps:$4 sm:$0xff]  }
  0x14   :  { %1150 = vmatprep.subr.bf16.mxu0 %v1774_v21  ;;  %1232 = vmatprep.subr.bf16.mxu1 %v1776_v22  ;;  %v1824_v56 = vld [vmem:[%s2609_s1 + $0x2e4] ss:$28 sps:$4 sm:$0xff]   ;;  %v1830_v60 = vld [vmem:[%s2609_s1 + $0x31c] ss:$28 sps:$4 sm:$0xff]   ;;  %v1832_v61 = vld [vmem:[%s2609_s1 + $0x310] ss:$28 sps:$4 sm:$0xff]  }
  0x15   :  { %1172 = vmatprep.mubr.bf16.mxu0 %v2164_v49  ;;  %1254 = vmatprep.mubr.bf16.mxu1 %v2164_v49  ;;  %v1833_v62 = vld [vmem:[%s2609_s1 + $0x318] ss:$28 sps:$4 sm:$0xff]   ;;  %v1834_v63 = vld [vmem:[%s2609_s1 + $0x34c] ss:$28 sps:$4 sm:$0xff]   ;;  %v1843_v3 = vld [vmem:[%s2609_s1 + $0x384] ss:$28 sps:$4 sm:$0xff]  }
  0x16   :  { %v1836_v0 = vld [vmem:[%s2609_s1 + $0x354] ss:$28 sps:$4 sm:$0xff]   ;;  %v1838_v1 = vld [vmem:[%s2609_s1 + $0x348] ss:$28 sps:$4 sm:$0xff]   ;;  %v1841_v5 = vld [vmem:[%s2609_s1 + $0x380] ss:$28 sps:$4 sm:$0xff]  }
  0x17   :  { %1151 = vmatpush1.bf16.msra.mxu0 %v1778_v23  ;;  %1233 = vmatpush1.bf16.msra.mxu1 %v1779_v24  ;;  %v1839_v2 = vld [vmem:[%s2609_s1 + $0x350] ss:$28 sps:$4 sm:$0xff]   ;;  %v1844_v7 = vld [vmem:[%s2609_s1 + $0x388] ss:$28 sps:$4 sm:$0xff]   ;;  %v1850_v8 = vld [vmem:[%s2609_s1 + $0x3bc] ss:$28 sps:$4 sm:$0xff]  }
  0x18   :  { %1152 = vmatprep.subr.bf16.mxu0 %v1780_v25  ;;  %1234 = vmatprep.subr.bf16.mxu1 %v1782_v26  ;;  %v1846_v4 = vld [vmem:[%s2609_s1 + $0x38c] ss:$28 sps:$4 sm:$0xff]   ;;  %v1853_v9 = vld [vmem:[%s2609_s1 + $0x3c4] ss:$28 sps:$4 sm:$0xff]   ;;  %v1848_v10 = vld [vmem:[%s2609_s1 + $0x3b8] ss:$28 sps:$4 sm:$0xff]  }
  0x19   :  { %v2247_v11 = vld [vmem:[%s2610_s0 + $0x8] sm:$0xff]  ;;  %v1851_v12 = vld [vmem:[%s2609_s1 + $0x3c0] ss:$28 sps:$4 sm:$0xff]   ;;  %v1856_v13 = vld [vmem:[%s2609_s1 + $0x3f4] ss:$28 sps:$4 sm:$0xff]  }
  0x1a   :  { %v2257_v15 = vcombine.high %v2247_v11, %v2247_v11  ;;  %v1859_v16 = vld [vmem:[%s2609_s1 + $0x3fc] ss:$28 sps:$4 sm:$0xff]   ;;  %v1854_v17 = vld [vmem:[%s2609_s1 + $0x3f0] ss:$28 sps:$4 sm:$0xff]   ;;  %v1860_v21 = vld [vmem:[%s2609_s1 + $0x428] ss:$28 sps:$4 sm:$0xff]  }
  0x1b   :  { %1153 = vmatpush1.bf16.msra.mxu0 %v1784_v27  ;;  %1235 = vmatpush1.bf16.msra.mxu1 %v1785_v28  ;;  %v1857_v18 = vld [vmem:[%s2609_s1 + $0x3f8] ss:$28 sps:$4 sm:$0xff]   ;;  %v1862_v19 = vld [vmem:[%s2609_s1 + $0x42c] ss:$28 sps:$4 sm:$0xff]   ;;  %v1868_v23 = vld [vmem:[%s2609_s1 + $0x464] ss:$28 sps:$4 sm:$0xff]  }
  0x1c   :  { %1154 = vmatprep.subr.bf16.mxu0 %v1786_v29  ;;  %1236 = vmatprep.subr.bf16.mxu1 %v1788_v30  ;;  %v1865_v20 = vld [vmem:[%s2609_s1 + $0x434] ss:$28 sps:$4 sm:$0xff]   ;;  %v1871_v24 = vld [vmem:[%s2609_s1 + $0x46c] ss:$28 sps:$4 sm:$0xff]   ;;  %v1866_v25 = vld [vmem:[%s2609_s1 + $0x460] ss:$28 sps:$4 sm:$0xff]  }
  0x1d   :  { %v1863_v22 = vld [vmem:[%s2609_s1 + $0x430] ss:$28 sps:$4 sm:$0xff]   ;;  %v1869_v26 = vld [vmem:[%s2609_s1 + $0x468] ss:$28 sps:$4 sm:$0xff]   ;;  %v1874_v27 = vld [vmem:[%s2609_s1 + $0x49c] ss:$28 sps:$4 sm:$0xff]  }
  0x1e   :  { %v1877_v28 = vld [vmem:[%s2609_s1 + $0x4a4] ss:$28 sps:$4 sm:$0xff]   ;;  %v1872_v29 = vld [vmem:[%s2609_s1 + $0x498] ss:$28 sps:$4 sm:$0xff]  }
  0x1f   :  { %1155 = vmatpush1.bf16.msra.mxu0 %v1790_v31  ;;  %1237 = vmatpush1.bf16.msra.mxu1 %v1791_v32  ;;  %v1875_v30 = vld [vmem:[%s2609_s1 + $0x4a0] ss:$28 sps:$4 sm:$0xff]   ;;  %v1880_v31 = vld [vmem:[%s2609_s1 + $0x4d4] ss:$28 sps:$4 sm:$0xff]  }
  0x20   :  { %1156 = vmatprep.subr.bf16.mxu0 %v1792_v33  ;;  %1238 = vmatprep.subr.bf16.mxu1 %v1794_v34  ;;  %v1883_v32 = vld [vmem:[%s2609_s1 + $0x4dc] ss:$28 sps:$4 sm:$0xff]   ;;  %v1878_v33 = vld [vmem:[%s2609_s1 + $0x4d0] ss:$28 sps:$4 sm:$0xff]  }
  0x21   :  { %v1881_v34 = vld [vmem:[%s2609_s1 + $0x4d8] ss:$28 sps:$4 sm:$0xff]  }
  0x22   :  { %v1902_v47 = vld [vmem:[%s2609_s1 + $0x18] ss:$28 sps:$4 sm:$0xff]  }
  0x23   :  { %1157 = vmatpush1.bf16.msra.mxu0 %v1796_v35  ;;  %1239 = vmatpush1.bf16.msra.mxu1 %v1797_v36  ;;  %v1886_v35 = vld [vmem:[%s2609_s1 + $0x50c] ss:$28 sps:$4 sm:$0xff]   ;;  %v1889_v36 = vld [vmem:[%s2609_s1 + $0x514] ss:$28 sps:$4 sm:$0xff]  }
  0x24   :  { %1158 = vmatprep.subr.bf16.mxu0 %v1798_v37  ;;  %1240 = vmatprep.subr.bf16.mxu1 %v1800_v38  ;;  %v1884_v37 = vld [vmem:[%s2609_s1 + $0x508] ss:$28 sps:$4 sm:$0xff]   ;;  %v1887_v38 = vld [vmem:[%s2609_s1 + $0x510] ss:$28 sps:$4 sm:$0xff]  }
  0x27   :  { %1159 = vmatpush1.bf16.msra.mxu0 %v1802_v39  ;;  %1241 = vmatpush1.bf16.msra.mxu1 %v1803_v40  ;;  %v1892_v39 = vld [vmem:[%s2609_s1 + $0x544] ss:$28 sps:$4 sm:$0xff]   ;;  %v1895_v40 = vld [vmem:[%s2609_s1 + $0x54c] ss:$28 sps:$4 sm:$0xff]  }
  0x28   :  { %1160 = vmatprep.subr.bf16.mxu0 %v1804_v41  ;;  %1242 = vmatprep.subr.bf16.mxu1 %v1806_v42  ;;  %v1890_v41 = vld [vmem:[%s2609_s1 + $0x540] ss:$28 sps:$4 sm:$0xff]   ;;  %v1893_v42 = vld [vmem:[%s2609_s1 + $0x548] ss:$28 sps:$4 sm:$0xff]  }
  0x2b   :  { %1161 = vmatpush1.bf16.msra.mxu0 %v1808_v43  ;;  %1243 = vmatpush1.bf16.msra.mxu1 %v1809_v44  ;;  %v1900_v43 = vld [vmem:[%s2609_s1 + $0x14] ss:$28 sps:$4 sm:$0xff]  }
  0x2c   :  { %1162 = vmatprep.subr.bf16.mxu0 %v1810_v45  ;;  %1244 = vmatprep.subr.bf16.mxu1 %v1812_v46  ;;  %v1901_v44 = vld [vmem:[%s2609_s1 + $0x1d8] ss:$28 sps:$4 sm:$0xff]   ;;  %v2352_v45 = vcombine.low %v2247_v11, %v2247_v11  ;;  %v1898_v46 = vld [vmem:[%s2609_s1 + $0x10] ss:$28 sps:$4 sm:$0xff]   ;;  %v1936_v11 = vld [vmem:[%s2609_s1 + $0x360] ss:$28 sps:$4 sm:$0xff]  }
  0x2f   :  { %1163 = vmatpush1.bf16.msra.mxu0 %v1814_v48  ;;  %1245 = vmatpush1.bf16.msra.mxu1 %v1815_v50  ;;  %v1905_v48 = vld [vmem:[%s2609_s1 + $0x4c] ss:$28 sps:$4 sm:$0xff]  }
  0x30   :  { %1164 = vmatprep.subr.bf16.mxu0 %v1816_v51  ;;  %1246 = vmatprep.subr.bf16.mxu1 %v1818_v52  ;;  %v1906_v50 = vld [vmem:[%s2609_s1 + $0x210] ss:$28 sps:$4 sm:$0xff]   ;;  %v1903_v51 = vld [vmem:[%s2609_s1 + $0x48] ss:$28 sps:$4 sm:$0xff]  }
  0x31   :  { %v1907_v52 = vld [vmem:[%s2609_s1 + $0x50] ss:$28 sps:$4 sm:$0xff]  }
  0x33   :  { %1165 = vmatpush1.bf16.msra.mxu0 %v1820_v53  ;;  %1247 = vmatpush1.bf16.msra.mxu1 %v1821_v54  ;;  %v1910_v53 = vld [vmem:[%s2609_s1 + $0x84] ss:$28 sps:$4 sm:$0xff]  }
  0x34   :  { %1166 = vmatprep.subr.bf16.mxu0 %v1822_v55  ;;  %1248 = vmatprep.subr.bf16.mxu1 %v1824_v56  ;;  %v1911_v54 = vld [vmem:[%s2609_s1 + $0x248] ss:$28 sps:$4 sm:$0xff]   ;;  %v1908_v55 = vld [vmem:[%s2609_s1 + $0x80] ss:$28 sps:$4 sm:$0xff]  }
  0x35   :  { %v1912_v56 = vld [vmem:[%s2609_s1 + $0x88] ss:$28 sps:$4 sm:$0xff]  }
  0x37   :  { %1167 = vmatpush1.bf16.msra.mxu0 %v1826_v57  ;;  %1249 = vmatpush1.bf16.msra.mxu1 %v1827_v58  ;;  %v1915_v57 = vld [vmem:[%s2609_s1 + $0xbc] ss:$28 sps:$4 sm:$0xff]  }
  0x38   :  { %1168 = vmatprep.subr.bf16.mxu0 %v1828_v59  ;;  %1250 = vmatprep.subr.bf16.mxu1 %v1830_v60  ;;  %v1916_v58 = vld [vmem:[%s2609_s1 + $0x280] ss:$28 sps:$4 sm:$0xff]   ;;  %v1920_v60 = vld [vmem:[%s2609_s1 + $0xf4] ss:$28 sps:$4 sm:$0xff]  }
  0x39   :  { %v1917_v59 = vld [vmem:[%s2609_s1 + $0xc0] ss:$28 sps:$4 sm:$0xff]  }
  0x3b   :  { %1169 = vmatpush1.bf16.msra.mxu0 %v1832_v61  ;;  %1251 = vmatpush1.bf16.msra.mxu1 %v1833_v62  ;;  %v1921_v61 = vld [vmem:[%s2609_s1 + $0x2b8] ss:$28 sps:$4 sm:$0xff]   ;;  %v1918_v62 = vld [vmem:[%s2609_s1 + $0xf0] ss:$28 sps:$4 sm:$0xff]  }
  0x3c   :  { %1170 = vmatprep.subr.bf16.mxu0 %v1834_v63  ;;  %1252 = vmatprep.subr.bf16.mxu1 %v1836_v0  ;;  %v1922_v63 = vld [vmem:[%s2609_s1 + $0xf8] ss:$28 sps:$4 sm:$0xff]   ;;  %v1925_v0 = vld [vmem:[%s2609_s1 + $0x12c] ss:$28 sps:$4 sm:$0xff]  }
  0x3f   :  { %1171 = vmatpush1.bf16.msra.mxu0 %v1838_v1  ;;  %1253 = vmatpush1.bf16.msra.mxu1 %v1839_v2  ;;  %v1926_v1 = vld [vmem:[%s2609_s1 + $0x2f0] ss:$28 sps:$4 sm:$0xff]   ;;  %v1923_v2 = vld [vmem:[%s2609_s1 + $0x128] ss:$28 sps:$4 sm:$0xff]  }
  0x40   :  { %1181 = vmatprep.subr.bf16.mxu0 %v1843_v3  ;;  %1263 = vmatprep.subr.bf16.mxu1 %v1846_v4  ;;  %v1927_v3 = vld [vmem:[%s2609_s1 + $0x130] ss:$28 sps:$4 sm:$0xff]   ;;  %v217_v4 = vld [vmem:[%s2611_s2] sm:$0xff] }
  0x41   :  { %220 = vperm.xlu0 %1743, %v217_v4  }
  0x42   :  { %1173 = vmatmul.mubr.bf16.vlgmr.msra.gmra.mrb[0].mxu0 %v2228_v6  ;;  %1255 = vmatmul.mubr.bf16.vlgmr.msra.gmra.mrb[0].mxu1 %v2228_v6 }
  0x43   :  { %1182 = vmatpush1.bf16.msra.mxu0 %v1841_v5  ;;  %1264 = vmatpush1.bf16.msra.mxu1 %v1844_v7  ;;  %v1930_v5 = vld [vmem:[%s2609_s1 + $0x164] ss:$28 sps:$4 sm:$0xff]  }
  0x44   :  { %1183 = vmatprep.subr.bf16.mxu0 %v1850_v8  ;;  %1265 = vmatprep.subr.bf16.mxu1 %v1853_v9  ;;  %v1931_v7 = vld [vmem:[%s2609_s1 + $0x328] ss:$28 sps:$4 sm:$0xff]   ;;  %v1928_v8 = vld [vmem:[%s2609_s1 + $0x160] ss:$28 sps:$4 sm:$0xff]  }
  0x45   :  { %1690 = vmatprep.mubr.msk.bf16.mxu0 %vm1136_vm0, %v2257_v15  ;;  %1691 = vmatprep.mubr.msk.bf16.mxu1 %vm1136_vm0, %v2257_v15  ;;  %v1932_v9 = vld [vmem:[%s2609_s1 + $0x168] ss:$28 sps:$4 sm:$0xff]  }
  0x47   :  { %1184 = vmatpush1.bf16.msra.mxu0 %v1848_v10  ;;  %1266 = vmatpush1.bf16.msra.mxu1 %v1851_v12  ;;  %v1935_v10 = vld [vmem:[%s2609_s1 + $0x19c] ss:$28 sps:$4 sm:$0xff]  }
  0x48   :  { %1185 = vmatprep.subr.bf16.mxu0 %v1856_v13  ;;  %1267 = vmatprep.subr.bf16.mxu1 %v1859_v16  ;;  %v1933_v12 = vld [vmem:[%s2609_s1 + $0x198] ss:$28 sps:$4 sm:$0xff]   ;;  %v1937_v13 = vld [vmem:[%s2609_s1 + $0x1a0] ss:$28 sps:$4 sm:$0xff]  }
  0x49   :  { %v1940_v16 = vld [vmem:[%s2609_s1 + $0x1d4] ss:$28 sps:$4 sm:$0xff]  }
  0x4b   :  { %1186 = vmatpush1.bf16.msra.mxu0 %v1854_v17  ;;  %1268 = vmatpush1.bf16.msra.mxu1 %v1857_v18  ;;  %v1938_v17 = vld [vmem:[%s2609_s1 + $0x1d0] ss:$28 sps:$4 sm:$0xff]   ;;  %v1941_v18 = vld [vmem:[%s2609_s1 + $0x398] ss:$28 sps:$4 sm:$0xff]  }
  0x4c   :  { %1187 = vmatprep.subr.bf16.mxu0 %v1862_v19  ;;  %1269 = vmatprep.subr.bf16.mxu1 %v1865_v20  ;;  %v1944_v19 = vld [vmem:[%s2609_s1 + $0x20c] ss:$28 sps:$4 sm:$0xff]  }
  0x4d   :  { %v1942_v20 = vld [vmem:[%s2609_s1 + $0x208] ss:$28 sps:$4 sm:$0xff]  }
  0x4f   :  { %1188 = vmatpush1.bf16.msra.mxu0 %v1860_v21  ;;  %1270 = vmatpush1.bf16.msra.mxu1 %v1863_v22  ;;  %v1945_v21 = vld [vmem:[%s2609_s1 + $0x3d0] ss:$28 sps:$4 sm:$0xff]   ;;  %v1948_v22 = vld [vmem:[%s2609_s1 + $0x244] ss:$28 sps:$4 sm:$0xff]  }
  0x50   :  { %1189 = vmatprep.subr.bf16.mxu0 %v1868_v23  ;;  %1271 = vmatprep.subr.bf16.mxu1 %v1871_v24  ;;  %v1946_v23 = vld [vmem:[%s2609_s1 + $0x240] ss:$28 sps:$4 sm:$0xff]   ;;  %v1949_v24 = vld [vmem:[%s2609_s1 + $0x408] ss:$28 sps:$4 sm:$0xff]  }
  0x53   :  { %1190 = vmatpush1.bf16.msra.mxu0 %v1866_v25  ;;  %1272 = vmatpush1.bf16.msra.mxu1 %v1869_v26  ;;  %v1952_v25 = vld [vmem:[%s2609_s1 + $0x27c] ss:$28 sps:$4 sm:$0xff]  }
  0x54   :  { %1191 = vmatprep.subr.bf16.mxu0 %v1874_v27  ;;  %1273 = vmatprep.subr.bf16.mxu1 %v1877_v28  ;;  %v1950_v26 = vld [vmem:[%s2609_s1 + $0x278] ss:$28 sps:$4 sm:$0xff]   ;;  %v1953_v27 = vld [vmem:[%s2609_s1 + $0x440] ss:$28 sps:$4 sm:$0xff]  }
  0x55   :  { %v1956_v28 = vld [vmem:[%s2609_s1 + $0x2b4] ss:$28 sps:$4 sm:$0xff]  }
  0x57   :  { %1192 = vmatpush1.bf16.msra.mxu0 %v1872_v29  ;;  %1274 = vmatpush1.bf16.msra.mxu1 %v1875_v30  ;;  %v1954_v29 = vld [vmem:[%s2609_s1 + $0x2b0] ss:$28 sps:$4 sm:$0xff]   ;;  %v1957_v30 = vld [vmem:[%s2609_s1 + $0x478] ss:$28 sps:$4 sm:$0xff]  }
  0x58   :  { %1193 = vmatprep.subr.bf16.mxu0 %v1880_v31  ;;  %1275 = vmatprep.subr.bf16.mxu1 %v1883_v32  ;;  %v1960_v31 = vld [vmem:[%s2609_s1 + $0x2ec] ss:$28 sps:$4 sm:$0xff]  }
  0x59   :  { %v1958_v32 = vld [vmem:[%s2609_s1 + $0x2e8] ss:$28 sps:$4 sm:$0xff]  }
  0x5b   :  { %1194 = vmatpush1.bf16.msra.mxu0 %v1878_v33  ;;  %1276 = vmatpush1.bf16.msra.mxu1 %v1881_v34  ;;  %v1961_v33 = vld [vmem:[%s2609_s1 + $0x4b0] ss:$28 sps:$4 sm:$0xff]   ;;  %v1964_v34 = vld [vmem:[%s2609_s1 + $0x324] ss:$28 sps:$4 sm:$0xff]  }
  0x5c   :  { %1195 = vmatprep.subr.bf16.mxu0 %v1886_v35  ;;  %1277 = vmatprep.subr.bf16.mxu1 %v1889_v36  ;;  %v1962_v35 = vld [vmem:[%s2609_s1 + $0x320] ss:$28 sps:$4 sm:$0xff]   ;;  %v1965_v36 = vld [vmem:[%s2609_s1 + $0x4e8] ss:$28 sps:$4 sm:$0xff]  }
  0x5f   :  { %1196 = vmatpush1.bf16.msra.mxu0 %v1884_v37  ;;  %1278 = vmatpush1.bf16.msra.mxu1 %v1887_v38  ;;  %v1968_v37 = vld [vmem:[%s2609_s1 + $0x35c] ss:$28 sps:$4 sm:$0xff]  }
  0x60   :  { %1197 = vmatprep.subr.bf16.mxu0 %v1892_v39  ;;  %1279 = vmatprep.subr.bf16.mxu1 %v1895_v40  ;;  %v1966_v38 = vld [vmem:[%s2609_s1 + $0x358] ss:$28 sps:$4 sm:$0xff]   ;;  %v1969_v39 = vld [vmem:[%s2609_s1 + $0x520] ss:$28 sps:$4 sm:$0xff]  }
  0x61   :  { %v1972_v40 = vld [vmem:[%s2609_s1 + $0x394] ss:$28 sps:$4 sm:$0xff]  }
  0x63   :  { %1198 = vmatpush1.bf16.msra.mxu0 %v1890_v41  ;;  %1280 = vmatpush1.bf16.msra.mxu1 %v1893_v42  ;;  %v1970_v41 = vld [vmem:[%s2609_s1 + $0x390] ss:$28 sps:$4 sm:$0xff]   ;;  %v1973_v42 = vld [vmem:[%s2609_s1 + $0x558] ss:$28 sps:$4 sm:$0xff]  }
  0x64   :  { %1304 = vmatprep.subr.bf16.mxu0 %v1900_v43  ;;  %1702 = vmatprep.subr.bf16.mxu1 %v1901_v44  ;;  %v1976_v43 = vld [vmem:[%s2609_s1 + $0x3cc] ss:$28 sps:$4 sm:$0xff]  }
  0x65   :  { %v1974_v44 = vld [vmem:[%s2609_s1 + $0x3c8] ss:$28 sps:$4 sm:$0xff]  }
  0x66   :  { %1214 = vmatmul.mubr.bf16.vlgmr.msra.gmra.mrb[0].mxu0 %v2352_v45  ;;  %1296 = vmatmul.mubr.bf16.vlgmr.msra.gmra.mrb[0].mxu1 %v2352_v45 }
  0x67   :  { %1305 = vmatpush1.bf16.msra.mxu0 %v1898_v46  ;;  %1703 = vmatpush3.bf16.msra.mxu1 %v1902_v47  ;;  %v1979_v46 = vld [vmem:[%s2609_s1 + $0x404] ss:$28 sps:$4 sm:$0xff]   ;;  %v1980_v47 = vld [vmem:[%s2609_s1 + $0x438] ss:$28 sps:$4 sm:$0xff]  }
  0x68   :  { %1306 = vmatprep.subr.bf16.mxu0 %v1905_v48  ;;  %1704 = vmatprep.subr.bf16.mxu1 %v1906_v50  ;;  %v1983_v48 = vld [vmem:[%s2609_s1 + $0x470] ss:$28 sps:$4 sm:$0xff]  }
  0x69   :  { %1418 = vmatprep.mubr.bf16.mxu1 %v2164_v49  ;;  %1336 = vmatprep.mubr.bf16.mxu0 %v2164_v49  ;;  %v1913_v49 = vld [vmem:[%s2609_s1 + $0xb8] ss:$28 sps:$4 sm:$0xff]   ;;  %v1988_v50 = vld [vmem:[%s2609_s1 + $0x4ac] ss:$28 sps:$4 sm:$0xff]  }
  0x6b   :  { %1307 = vmatpush1.bf16.msra.mxu0 %v1903_v51  ;;  %1705 = vmatpush3.bf16.msra.mxu1 %v1907_v52  ;;  %v1986_v51 = vld [vmem:[%s2609_s1 + $0x4a8] ss:$28 sps:$4 sm:$0xff]  }
  0x6c   :  { %1308 = vmatprep.subr.bf16.mxu0 %v1910_v53  ;;  %1706 = vmatprep.subr.bf16.mxu1 %v1911_v54  ;;  %v1991_v52 = vld [vmem:[%s2609_s1 + $0x4e4] ss:$28 sps:$4 sm:$0xff]   ;;  %v1994_v54 = vld [vmem:[%s2609_s1 + $0x51c] ss:$28 sps:$4 sm:$0xff]  }
  0x6d   :  { %v1989_v53 = vld [vmem:[%s2609_s1 + $0x4e0] ss:$28 sps:$4 sm:$0xff]  }
  0x6f   :  { %1309 = vmatpush1.bf16.msra.mxu0 %v1908_v55  ;;  %1707 = vmatpush3.bf16.msra.mxu1 %v1912_v56  ;;  %v1992_v55 = vld [vmem:[%s2609_s1 + $0x518] ss:$28 sps:$4 sm:$0xff]  }
  0x70   :  { %1310 = vmatprep.subr.bf16.mxu0 %v1915_v57  ;;  %1708 = vmatprep.subr.bf16.mxu1 %v1916_v58  ;;  %v1997_v56 = vld [vmem:[%s2609_s1 + $0x554] ss:$28 sps:$4 sm:$0xff]  }
  0x71   :  { %v1995_v57 = vld [vmem:[%s2609_s1 + $0x550] ss:$28 sps:$4 sm:$0xff]  }
  0x73   :  { %1311 = vmatpush1.bf16.msra.mxu0 %v1913_v49  ;;  %1709 = vmatpush3.bf16.msra.mxu1 %v1917_v59 }
  0x74   :  { %1312 = vmatprep.subr.bf16.mxu0 %v1920_v60  ;;  %1710 = vmatprep.subr.bf16.mxu1 %v1921_v61 }
  0x77   :  { %1313 = vmatpush1.bf16.msra.mxu0 %v1918_v62  ;;  %1711 = vmatpush3.bf16.msra.mxu1 %v1922_v63 }
  0x78   :  { %1314 = vmatprep.subr.bf16.mxu0 %v1925_v0  ;;  %1712 = vmatprep.subr.bf16.mxu1 %v1926_v1 }
  0x7b   :  { %1315 = vmatpush1.bf16.msra.mxu0 %v1923_v2  ;;  %1713 = vmatpush3.bf16.msra.mxu1 %v1927_v3 }
  0x7c   :  { %1316 = vmatprep.subr.bf16.mxu0 %v1930_v5  ;;  %1714 = vmatprep.subr.bf16.mxu1 %v1931_v7 }
  0x7f   :  { %1317 = vmatpush1.bf16.msra.mxu0 %v1928_v8  ;;  %1715 = vmatpush3.bf16.msra.mxu1 %v1932_v9 }
  0x80   :  { %1318 = vmatprep.subr.bf16.mxu0 %v1935_v10  ;;  %1716 = vmatprep.subr.bf16.mxu1 %v1936_v11 }
  0x83   :  { %1319 = vmatpush1.bf16.msra.mxu0 %v1933_v12  ;;  %1717 = vmatpush3.bf16.msra.mxu1 %v1937_v13 }
  0x84   :  { %1320 = vmatprep.subr.bf16.mxu0 %v1940_v16  ;;  %1426 = vmatprep.subr.bf16.mxu1 %v1998_v14 }
  0x86   :  { %1419 = vmatmul.mubr.bf16.vlgmr.msra.gmra.mrb[4].mxu1 %v2228_v6 }
  0x87   :  { %1321 = vmatpush1.bf16.msra.mxu0 %v1938_v17  ;;  %1427 = vmatpush1.bf16.msra.mxu1 %v1941_v18 }
  0x88   :  { %1322 = vmatprep.subr.bf16.mxu0 %v1944_v19  ;;  %1428 = vmatprep.subr.bf16.mxu1 %v1998_v14 }
  0x89   :  { %1693 = vmatprep.mubr.msk.bf16.mxu1 %vm1136_vm0, %v2257_v15 }
  0x8b   :  { %1323 = vmatpush1.bf16.msra.mxu0 %v1942_v20  ;;  %1429 = vmatpush1.bf16.msra.mxu1 %v1945_v21 }
  0x8c   :  { %1324 = vmatprep.subr.bf16.mxu0 %v1948_v22  ;;  %1430 = vmatprep.subr.bf16.mxu1 %v1998_v14 }
  0x8f   :  { %1325 = vmatpush1.bf16.msra.mxu0 %v1946_v23  ;;  %1431 = vmatpush1.bf16.msra.mxu1 %v1949_v24 }
  0x90   :  { %1326 = vmatprep.subr.bf16.mxu0 %v1952_v25  ;;  %1432 = vmatprep.subr.bf16.mxu1 %v1998_v14 }
  0x93   :  { %1327 = vmatpush1.bf16.msra.mxu0 %v1950_v26  ;;  %1433 = vmatpush1.bf16.msra.mxu1 %v1953_v27 }
  0x94   :  { %1328 = vmatprep.subr.bf16.mxu0 %v1956_v28  ;;  %1434 = vmatprep.subr.bf16.mxu1 %v1998_v14 }
  0x97   :  { %1329 = vmatpush1.bf16.msra.mxu0 %v1954_v29  ;;  %1435 = vmatpush1.bf16.msra.mxu1 %v1957_v30 }
  0x98   :  { %1330 = vmatprep.subr.bf16.mxu0 %v1960_v31  ;;  %1436 = vmatprep.subr.bf16.mxu1 %v1998_v14 }
  0x9b   :  { %1331 = vmatpush1.bf16.msra.mxu0 %v1958_v32  ;;  %1437 = vmatpush1.bf16.msra.mxu1 %v1961_v33 }
  0x9c   :  { %1332 = vmatprep.subr.bf16.mxu0 %v1964_v34  ;;  %1438 = vmatprep.subr.bf16.mxu1 %v1998_v14 }
  0x9f   :  { %1333 = vmatpush1.bf16.msra.mxu0 %v1962_v35  ;;  %1439 = vmatpush1.bf16.msra.mxu1 %v1965_v36 }
  0xa0   :  { %1334 = vmatprep.subr.bf16.mxu0 %v1968_v37  ;;  %1440 = vmatprep.subr.bf16.mxu1 %v1998_v14 }
  0xa3   :  { %1335 = vmatpush1.bf16.msra.mxu0 %v1966_v38  ;;  %1441 = vmatpush1.bf16.msra.mxu1 %v1969_v39 }
  0xa4   :  { %1345 = vmatprep.subr.bf16.mxu0 %v1972_v40  ;;  %1442 = vmatprep.subr.bf16.mxu1 %v1998_v14  ;;  %v1977_v14 = vld [vmem:[%s2609_s1 + $0x400] ss:$28 sps:$4 sm:$0xff]  }
  0xa6   :  { %1337 = vmatmul.mubr.bf16.vlgmr.msra.gmra.mrb[4].mxu0 %v2228_v6  ;;  %v1982_v6 = vld [vmem:[%s2609_s1 + $0x43c] ss:$28 sps:$4 sm:$0xff]  }
  0xa7   :  { %1346 = vmatpush1.bf16.msra.mxu0 %v1970_v41  ;;  %1443 = vmatpush1.bf16.msra.mxu1 %v1973_v42 }
  0xa8   :  { %1347 = vmatprep.subr.bf16.mxu0 %v1976_v43  ;;  %1692 = vmatprep.mubr.msk.bf16.mxu0 %vm1136_vm0, %v2257_v15  ;;  %v1985_v15 = vld [vmem:[%s2609_s1 + $0x474] ss:$28 sps:$4 sm:$0xff]  }
  0xaa   :  { %1459 = vmatmul.mubr.bf16.vlgmr.msra.gmra.mrb[8].mxu1 %v2352_v45 }
  0xab   :  { %1348 = vmatpush1.bf16.msra.mxu0 %v1974_v44 }
  0xac   :  { %1349 = vmatprep.subr.bf16.mxu0 %v1979_v46 }
  0xaf   :  { %1350 = vmatpush1.bf16.msra.mxu0 %v1977_v14 }
  0xb0   :  { %1351 = vmatprep.subr.bf16.mxu0 %v1982_v6 }
  0xb3   :  { %1352 = vmatpush1.bf16.msra.mxu0 %v1980_v47 }
  0xb4   :  { %1353 = vmatprep.subr.bf16.mxu0 %v1985_v15 }
  0xb7   :  { %1354 = vmatpush1.bf16.msra.mxu0 %v1983_v48 }
  0xb8   :  { %1355 = vmatprep.subr.bf16.mxu0 %v1988_v50 }
  0xbb   :  { %1356 = vmatpush1.bf16.msra.mxu0 %v1986_v51 }
  0xbc   :  { %1357 = vmatprep.subr.bf16.mxu0 %v1991_v52 }
  0xbf   :  { %1358 = vmatpush1.bf16.msra.mxu0 %v1989_v53 }
  0xc0   :  { %1359 = vmatprep.subr.bf16.mxu0 %v1994_v54  ;;  %v221_v58 = vpop.permute.xlu0 %220 }
  0xc3   :  { %1360 = vmatpush1.bf16.msra.mxu0 %v1992_v55 }
  0xc4   :  { %1361 = vmatprep.subr.bf16.mxu0 %v1997_v56 }
  0xc7   :  { %1362 = vmatpush1.bf16.msra.mxu0 %v1995_v57 }
  0xca   :  { %1378 = vmatmul.mubr.bf16.vlgmr.msra.gmra.mrb[4].mxu0 %v2352_v45 }
 0x139   :  { %v1215_v49 = vpop.f32.mrb[0].mxu0  ;;  %v1297_v59 = vpop.f32.mrb[0].mxu1 }
 0x13a   :  { %v1724_v60 = vadd.f32 %v1215_v49, %v221_v58  ;;  %v1726_v61 = vadd.f32 %v1297_v59, %v221_v58  ;;  %v1217_v62 = vpop.f32.mrb[1].mxu0  ;;  %v1299_v63 = vpop.f32.mrb[1].mxu1 }
 0x13b   :  { %v1725_v0 = vadd.f32 %v1217_v62, %v221_v58  ;;  %v1727_v1 = vadd.f32 %v1299_v63, %v221_v58  ;;  %v1219_v2 = vpop.f32.mrb[2].mxu0  ;;  %v1301_v3 = vpop.f32.mrb[2].mxu1 }
 0x13c   :  { %v1466_v4 = vmax.f32 %v1724_v60, 0.0  ;;  %v1468_v5 = vmax.f32 %v1726_v61, 0.0  ;;  %v1220_v7 = vpop.f32.mrb[3].mxu0  ;;  %v1302_v8 = vpop.f32.mrb[3].mxu1 }
 0x13d   :  { %v1467_v9 = vmax.f32 %v1725_v0, 0.0  ;;  %v1469_v10 = vmax.f32 %v1727_v1, 0.0 }
 0x13f   :  { %v1698_v11 = vpack.c.bf16 %v1467_v9, %v1466_v4  ;;  %v1699_v12 = vpack.c.bf16 %v1469_v10, %v1468_v5 }
 0x141   :  { %1502 = vst [vmem:[%s2612_s3] sm:$0xff] %v1698_v11  ;;  %1503 = vst [vmem:[%s2612_s3 + $0x8] sm:$0xff] %v1699_v12 }
 0x159   :  { %v1718_v45 = vpop.f32.mrb[4].mxu1 }
 0x15a   :  { %v1719_v13 = vpop.f32.mrb[5].mxu1 }
 0x15b   :  { %v1720_v16 = vadd.f32 %v1719_v13, %v1718_v45  ;;  %v1721_v17 = vpop.f32.mrb[6].mxu1 }
 0x15c   :  { %v1722_v18 = vpop.f32.mrb[7].mxu1 }
 0x15d   :  { %v1421_v19 = vadd.f32 %v1720_v16, %v221_v58 }
 0x17d   :  { %v1460_v20 = vpop.f32.mrb[8].mxu1 }
 0x17e   :  { %v1461_v21 = vadd.f32 %v1460_v20, %v1421_v19  ;;  %v1462_v22 = vpop.f32.mrb[9].mxu1 }
 0x17f   :  { %v1463_v23 = vpop.f32.mrb[10].mxu1 }
 0x180   :  { %v1472_v24 = vmax.f32 %v1461_v21, 0.0  ;;  %v1464_v25 = vpop.f32.mrb[11].mxu1 }
 0x182   :  { %v1701_v26 = vpack.c.bf16 %v1472_v24, %v1472_v24 }
 0x184   :  { %1506 = vst.msk [vmem:[%s2612_s3 + $0x18] sm:$0xf] %vm1505_vm1, %v1701_v26 }
 0x19d   :  { %v1379_v27 = vpop.f32.mrb[4].mxu0 }
 0x19e   :  { %v1728_v28 = vadd.f32 %v1379_v27, %v221_v58  ;;  %v1381_v29 = vpop.f32.mrb[5].mxu0 }
 0x19f   :  { %v1729_v30 = vadd.f32 %v1381_v29, %v221_v58  ;;  %v1383_v31 = vpop.f32.mrb[6].mxu0 }
 0x1a0   :  { %v1470_v32 = vmax.f32 %v1728_v28, 0.0  ;;  %v1384_v33 = vpop.f32.mrb[7].mxu0 }
 0x1a1   :  { %v1471_v34 = vmax.f32 %v1729_v30, 0.0 }
 0x1a3   :  { %v1700_v35 = vpack.c.bf16 %v1471_v34, %v1470_v32 }
 0x1a5   :  { %1504 = vst [vmem:[%s2612_s3 + $0x10] sm:$0xff] %v1700_v35 }

// kernel: ae_forward.11
= control target key start
LH: loop header
LB: loop body
LE: loop exit
PB: predicated region body
PF: predicated region fallthrough
CT: control target
= control target key end

     0   :  { %v472_v38 = vlaneseq  ;;  %v4605_v39 = vmov 1966171168   ;;  %s5988_s1 = inlined_call_operand.vmem [shape: bf16[512,1568], index: 1, kind: input, shape index: {}]   ;;  %s5989_s0 = inlined_call_operand.vmem [shape: bf16[1,512], index: 0, kind: input, shape index: {}]   ;;  %s5990_s2 = inlined_call_operand.<no memory space> [shape: f32[1,1], index: 2, kind: input, shape index: {}]   ;;  %s5991_s3 = inlined_call_operand.vmem [shape: f32[1,1568], index: 3, kind: output, shape index: {}]  }
   0x1   :  { %v3945_v0 = vld [vmem:[%s5988_s1 + $0x4] ss:$52 sps:$4 sm:$0xff]   ;;  %v3947_v1 = vld [vmem:[%s5988_s1 + $0xc] ss:$52 sps:$4 sm:$0xff]   ;;  %v3950_v3 = vld [vmem:[%s5988_s1 + $0x8] ss:$52 sps:$4 sm:$0xff]   ;;  %v486_v40 = vunpack.c.l.s4 %v4605_v39 }
   0x2   :  { %2617 = vmatprep.subr.bf16.mxu0 %v3945_v0  ;;  %v3949_v2 = vld [vmem:[%s5988_s1] ss:$52 sps:$4 sm:$0xff]   ;;  %2699 = vmatprep.subr.bf16.mxu1 %v3947_v1  ;;  %v3955_v6 = vld [vmem:[%s5988_s1 + $0x68] ss:$52 sps:$4 sm:$0xff]   ;;  %v3956_v7 = vld [vmem:[%s5988_s1 + $0x70] ss:$52 sps:$4 sm:$0xff]  }
   0x3   :  { %v3951_v4 = vld [vmem:[%s5988_s1 + $0x6c] ss:$52 sps:$4 sm:$0xff]   ;;  %2618 = vmatpush1.bf16.msra.mxu0 %v3949_v2  ;;  %2700 = vmatpush1.bf16.msra.mxu1 %v3950_v3  ;;  %v3953_v5 = vld [vmem:[%s5988_s1 + $0x74] ss:$52 sps:$4 sm:$0xff]   ;;  %v3959_v9 = vld [vmem:[%s5988_s1 + $0xdc] ss:$52 sps:$4 sm:$0xff]   ;;  %v487_v46 = vunpack.c.0.s8 %v486_v40 }
   0x4   :  { %2619 = vmatprep.subr.bf16.mxu0 %v3951_v4  ;;  %2701 = vmatprep.subr.bf16.mxu1 %v3953_v5  ;;  %v3957_v8 = vld [vmem:[%s5988_s1 + $0xd4] ss:$52 sps:$4 sm:$0xff]   ;;  %v3961_v10 = vld [vmem:[%s5988_s1 + $0xd0] ss:$52 sps:$4 sm:$0xff]   ;;  %v3962_v11 = vld [vmem:[%s5988_s1 + $0xd8] ss:$52 sps:$4 sm:$0xff]  }
   0x5   :  { %v3963_v12 = vld [vmem:[%s5988_s1 + $0x13c] ss:$52 sps:$4 sm:$0xff]   ;;  %v3965_v13 = vld [vmem:[%s5988_s1 + $0x144] ss:$52 sps:$4 sm:$0xff]   ;;  %v3968_v15 = vld [vmem:[%s5988_s1 + $0x140] ss:$52 sps:$4 sm:$0xff]  }
   0x6   :  { %v3967_v14 = vld [vmem:[%s5988_s1 + $0x138] ss:$52 sps:$4 sm:$0xff]   ;;  %v3973_v18 = vld [vmem:[%s5988_s1 + $0x1a0] ss:$52 sps:$4 sm:$0xff]   ;;  %v3974_v19 = vld [vmem:[%s5988_s1 + $0x1a8] ss:$52 sps:$4 sm:$0xff]  }
   0x7   :  { %2620 = vmatpush1.bf16.msra.mxu0 %v3955_v6  ;;  %2702 = vmatpush1.bf16.msra.mxu1 %v3956_v7  ;;  %v3969_v16 = vld [vmem:[%s5988_s1 + $0x1a4] ss:$52 sps:$4 sm:$0xff]   ;;  %v3971_v17 = vld [vmem:[%s5988_s1 + $0x1ac] ss:$52 sps:$4 sm:$0xff]   ;;  %v3977_v21 = vld [vmem:[%s5988_s1 + $0x214] ss:$52 sps:$4 sm:$0xff]  }
   0x8   :  { %2621 = vmatprep.subr.bf16.mxu0 %v3957_v8  ;;  %2703 = vmatprep.subr.bf16.mxu1 %v3959_v9  ;;  %v3975_v20 = vld [vmem:[%s5988_s1 + $0x20c] ss:$52 sps:$4 sm:$0xff]   ;;  %v3979_v22 = vld [vmem:[%s5988_s1 + $0x208] ss:$52 sps:$4 sm:$0xff]   ;;  %v3980_v23 = vld [vmem:[%s5988_s1 + $0x210] ss:$52 sps:$4 sm:$0xff]  }
   0x9   :  { %v3981_v24 = vld [vmem:[%s5988_s1 + $0x274] ss:$52 sps:$4 sm:$0xff]   ;;  %v3983_v25 = vld [vmem:[%s5988_s1 + $0x27c] ss:$52 sps:$4 sm:$0xff]   ;;  %v3986_v27 = vld [vmem:[%s5988_s1 + $0x278] ss:$52 sps:$4 sm:$0xff]  }
   0xa   :  { %v3985_v26 = vld [vmem:[%s5988_s1 + $0x270] ss:$52 sps:$4 sm:$0xff]   ;;  %v3991_v30 = vld [vmem:[%s5988_s1 + $0x2d8] ss:$52 sps:$4 sm:$0xff]   ;;  %v3992_v31 = vld [vmem:[%s5988_s1 + $0x2e0] ss:$52 sps:$4 sm:$0xff]  }
   0xb   :  { %2622 = vmatpush1.bf16.msra.mxu0 %v3961_v10  ;;  %2704 = vmatpush1.bf16.msra.mxu1 %v3962_v11  ;;  %v3987_v28 = vld [vmem:[%s5988_s1 + $0x2dc] ss:$52 sps:$4 sm:$0xff]   ;;  %v3989_v29 = vld [vmem:[%s5988_s1 + $0x2e4] ss:$52 sps:$4 sm:$0xff]   ;;  %v3995_v33 = vld [vmem:[%s5988_s1 + $0x34c] ss:$52 sps:$4 sm:$0xff]  }
   0xc   :  { %2623 = vmatprep.subr.bf16.mxu0 %v3963_v12  ;;  %2705 = vmatprep.subr.bf16.mxu1 %v3965_v13  ;;  %v3993_v32 = vld [vmem:[%s5988_s1 + $0x344] ss:$52 sps:$4 sm:$0xff]   ;;  %v3997_v34 = vld [vmem:[%s5988_s1 + $0x340] ss:$52 sps:$4 sm:$0xff]   ;;  %v3998_v35 = vld [vmem:[%s5988_s1 + $0x348] ss:$52 sps:$4 sm:$0xff]  }
   0xd   :  { %v3999_v36 = vld [vmem:[%s5988_s1 + $0x3ac] ss:$52 sps:$4 sm:$0xff]   ;;  %v4001_v37 = vld [vmem:[%s5988_s1 + $0x3b4] ss:$52 sps:$4 sm:$0xff]   ;;  %v4004_v42 = vld [vmem:[%s5988_s1 + $0x3b0] ss:$52 sps:$4 sm:$0xff]  }
   0xe   :  { %v4003_v41 = vld [vmem:[%s5988_s1 + $0x3a8] ss:$52 sps:$4 sm:$0xff]   ;;  %v4754_v45 = vshrl.u32 %v472_v38, 7  ;;  %v4009_v47 = vld [vmem:[%s5988_s1 + $0x410] ss:$52 sps:$4 sm:$0xff]   ;;  %vm3438_vm13 = vcmp.lt.s32.totalorder %v472_v38, 544 }
   0xf   :  { %2624 = vmatpush1.bf16.msra.mxu0 %v3967_v14  ;;  %2706 = vmatpush1.bf16.msra.mxu1 %v3968_v15  ;;  %v4005_v43 = vld [vmem:[%s5988_s1 + $0x414] ss:$52 sps:$4 sm:$0xff]   ;;  %v4007_v44 = vld [vmem:[%s5988_s1 + $0x41c] ss:$52 sps:$4 sm:$0xff]   ;;  %v4010_v48 = vld [vmem:[%s5988_s1 + $0x418] ss:$52 sps:$4 sm:$0xff]  }
  0x10   :  { %2625 = vmatprep.subr.bf16.mxu0 %v3969_v16  ;;  %2707 = vmatprep.subr.bf16.mxu1 %v3971_v17  ;;  %v4011_v49 = vld [vmem:[%s5988_s1 + $0x47c] ss:$52 sps:$4 sm:$0xff]   ;;  %v4013_v50 = vld [vmem:[%s5988_s1 + $0x484] ss:$52 sps:$4 sm:$0xff]   ;;  %v4769_v51 = vsub.s32 %v487_v46, %v4754_v45  ;;  %v4016_v54 = vld [vmem:[%s5988_s1 + $0x480] ss:$52 sps:$4 sm:$0xff]  }
  0x11   :  { %v3445_v52 = vld.sshfl [vmem:[%s5989_s0] sm:$0x33 pattern:$0x75316420]  ;;  %v4015_v53 = vld [vmem:[%s5988_s1 + $0x478] ss:$52 sps:$4 sm:$0xff]  }
  0x12   :  { %v484_v55 = vcombine.high %v3445_v52, %v3445_v52  ;;  %v4017_v56 = vld [vmem:[%s5988_s1 + $0x4e4] ss:$52 sps:$4 sm:$0xff]   ;;  %v4019_v57 = vld [vmem:[%s5988_s1 + $0x4ec] ss:$52 sps:$4 sm:$0xff]   ;;  %v4022_v60 = vld [vmem:[%s5988_s1 + $0x4e8] ss:$52 sps:$4 sm:$0xff]   ;;  %v4843_v12 = vrot.slane %v3445_v52, %v4769_v51 }
  0x13   :  { %2626 = vmatpush1.bf16.msra.mxu0 %v3973_v18  ;;  %2708 = vmatpush1.bf16.msra.mxu1 %v3974_v19  ;;  %v4021_v59 = vld [vmem:[%s5988_s1 + $0x4e0] ss:$52 sps:$4 sm:$0xff]   ;;  %v4027_v63 = vld [vmem:[%s5988_s1 + $0x548] ss:$52 sps:$4 sm:$0xff]   ;;  %v4028_v0 = vld [vmem:[%s5988_s1 + $0x550] ss:$52 sps:$4 sm:$0xff]  }
  0x14   :  { %2627 = vmatprep.subr.bf16.mxu0 %v3975_v20  ;;  %2709 = vmatprep.subr.bf16.mxu1 %v3977_v21  ;;  %v4787_v58 = vrot.slane %v484_v55, %v4769_v51  ;;  %v4023_v61 = vld [vmem:[%s5988_s1 + $0x54c] ss:$52 sps:$4 sm:$0xff]   ;;  %v4025_v62 = vld [vmem:[%s5988_s1 + $0x554] ss:$52 sps:$4 sm:$0xff]   ;;  %v4031_v2 = vld [vmem:[%s5988_s1 + $0x5bc] ss:$52 sps:$4 sm:$0xff]  }
  0x15   :  { %v4029_v1 = vld [vmem:[%s5988_s1 + $0x5b4] ss:$52 sps:$4 sm:$0xff]   ;;  %v4033_v3 = vld [vmem:[%s5988_s1 + $0x5b0] ss:$52 sps:$4 sm:$0xff]   ;;  %v4034_v4 = vld [vmem:[%s5988_s1 + $0x5b8] ss:$52 sps:$4 sm:$0xff]  }
  0x16   :  { %2649 = vmatprep.mubr.bf16.mxu0 %v4787_v58  ;;  %2731 = vmatprep.mubr.bf16.mxu1 %v4787_v58  ;;  %v4035_v5 = vld [vmem:[%s5988_s1 + $0x61c] ss:$52 sps:$4 sm:$0xff]   ;;  %v4037_v6 = vld [vmem:[%s5988_s1 + $0x624] ss:$52 sps:$4 sm:$0xff]   ;;  %v4040_v8 = vld [vmem:[%s5988_s1 + $0x620] ss:$52 sps:$4 sm:$0xff]   ;;  %v4856_v16 = vcombine.high %v4787_v58, %v4787_v58 }
  0x17   :  { %2628 = vmatpush1.bf16.msra.mxu0 %v3979_v22  ;;  %2710 = vmatpush1.bf16.msra.mxu1 %v3980_v23  ;;  %v4039_v7 = vld [vmem:[%s5988_s1 + $0x618] ss:$52 sps:$4 sm:$0xff]   ;;  %v4041_v11 = vld [vmem:[%s5988_s1 + $0x680] ss:$52 sps:$4 sm:$0xff]   ;;  %v4044_v13 = vld [vmem:[%s5988_s1 + $0x688] ss:$52 sps:$4 sm:$0xff]  }
  0x18   :  { %2629 = vmatprep.subr.bf16.mxu0 %v3981_v24  ;;  %2711 = vmatprep.subr.bf16.mxu1 %v3983_v25  ;;  %v4043_v9 = vld [vmem:[%s5988_s1 + $0x684] ss:$52 sps:$4 sm:$0xff]   ;;  %v4046_v10 = vld [vmem:[%s5988_s1 + $0x68c] ss:$52 sps:$4 sm:$0xff]   ;;  %v4052_v15 = vld [vmem:[%s5988_s1 + $0x6f4] ss:$52 sps:$4 sm:$0xff]  }
  0x19   :  { %v4049_v14 = vld [vmem:[%s5988_s1 + $0x6ec] ss:$52 sps:$4 sm:$0xff]   ;;  %v4047_v17 = vld [vmem:[%s5988_s1 + $0x6e8] ss:$52 sps:$4 sm:$0xff]   ;;  %v4050_v18 = vld [vmem:[%s5988_s1 + $0x6f0] ss:$52 sps:$4 sm:$0xff]  }
  0x1a   :  { %v4055_v19 = vld [vmem:[%s5988_s1 + $0x754] ss:$52 sps:$4 sm:$0xff]   ;;  %v4058_v20 = vld [vmem:[%s5988_s1 + $0x75c] ss:$52 sps:$4 sm:$0xff]   ;;  %v4056_v22 = vld [vmem:[%s5988_s1 + $0x758] ss:$52 sps:$4 sm:$0xff]  }
  0x1b   :  { %2630 = vmatpush1.bf16.msra.mxu0 %v3985_v26  ;;  %2712 = vmatpush1.bf16.msra.mxu1 %v3986_v27  ;;  %v4053_v21 = vld [vmem:[%s5988_s1 + $0x750] ss:$52 sps:$4 sm:$0xff]   ;;  %v4059_v25 = vld [vmem:[%s5988_s1 + $0x7b8] ss:$52 sps:$4 sm:$0xff]   ;;  %v4062_v26 = vld [vmem:[%s5988_s1 + $0x7c0] ss:$52 sps:$4 sm:$0xff]   ;;  %v8_v27 = vstv %s5990_s2 }
  0x1c   :  { %2631 = vmatprep.subr.bf16.mxu0 %v3987_v28  ;;  %2713 = vmatprep.subr.bf16.mxu1 %v3989_v29  ;;  %v4061_v23 = vld [vmem:[%s5988_s1 + $0x7bc] ss:$52 sps:$4 sm:$0xff]   ;;  %v4064_v24 = vld [vmem:[%s5988_s1 + $0x7c4] ss:$52 sps:$4 sm:$0xff]   ;;  %v4070_v29 = vld [vmem:[%s5988_s1 + $0x82c] ss:$52 sps:$4 sm:$0xff]  }
  0x1d   :  { %v4067_v28 = vld [vmem:[%s5988_s1 + $0x824] ss:$52 sps:$4 sm:$0xff]   ;;  %9 = vst [vmem:[#allocation2] sm:$0x1] %v8_v27  ;;  %v4082_v39 = vld [vmem:[%s5988_s1 + $0x8fc] ss:$52 sps:$4 sm:$0xff]  }
  0x1e   :  { %v4077_v40 = vld [vmem:[%s5988_s1 + $0x8f0] ss:$52 sps:$4 sm:$0xff]   ;;  %v4086_v46 = vld [vmem:[%s5988_s1 + $0x960] ss:$52 sps:$4 sm:$0xff]  }
  0x1f   :  { %2632 = vmatpush1.bf16.msra.mxu0 %v3991_v30  ;;  %2714 = vmatpush1.bf16.msra.mxu1 %v3992_v31  ;;  %v4065_v30 = vld [vmem:[%s5988_s1 + $0x820] ss:$52 sps:$4 sm:$0xff]   ;;  %v4068_v31 = vld [vmem:[%s5988_s1 + $0x828] ss:$52 sps:$4 sm:$0xff]   ;;  %v4098_v55 = vld [vmem:[%s5988_s1 + $0xa30] ss:$52 sps:$4 sm:$0xff]  }
  0x20   :  { %2633 = vmatprep.subr.bf16.mxu0 %v3993_v32  ;;  %2715 = vmatprep.subr.bf16.mxu1 %v3995_v33  ;;  %v4073_v32 = vld [vmem:[%s5988_s1 + $0x88c] ss:$52 sps:$4 sm:$0xff]   ;;  %v4076_v33 = vld [vmem:[%s5988_s1 + $0x894] ss:$52 sps:$4 sm:$0xff]  }
  0x21   :  { %v4097_v52 = vld [vmem:[%s5988_s1 + $0xa2c] ss:$52 sps:$4 sm:$0xff]  }
  0x22   :  { %v4146_v27 = vld [vmem:[%s5988_s1 + $0x80] ss:$52 sps:$4 sm:$0xff]  }
  0x23   :  { %2634 = vmatpush1.bf16.msra.mxu0 %v3997_v34  ;;  %2716 = vmatpush1.bf16.msra.mxu1 %v3998_v35  ;;  %v4606_v34 = vmov 0   ;;  %v4071_v35 = vld [vmem:[%s5988_s1 + $0x888] ss:$52 sps:$4 sm:$0xff]  }
  0x24   :  { %2635 = vmatprep.subr.bf16.mxu0 %v3999_v36  ;;  %2717 = vmatprep.subr.bf16.mxu1 %v4001_v37  ;;  %v4074_v36 = vld [vmem:[%s5988_s1 + $0x890] ss:$52 sps:$4 sm:$0xff]   ;;  %v4079_v37 = vld [vmem:[%s5988_s1 + $0x8f4] ss:$52 sps:$4 sm:$0xff]  }
  0x25   :  { %3944 = vset.pattern.permute.xlu0 %v4606_v34  ;;  %v4155_v34 = vld [vmem:[%s5988_s1 + $0x148] ss:$52 sps:$4 sm:$0xff]  }
  0x27   :  { %2636 = vmatpush1.bf16.msra.mxu0 %v4003_v41  ;;  %2718 = vmatpush1.bf16.msra.mxu1 %v4004_v42  ;;  %v4080_v41 = vld [vmem:[%s5988_s1 + $0x8f8] ss:$52 sps:$4 sm:$0xff]   ;;  %v4085_v42 = vld [vmem:[%s5988_s1 + $0x95c] ss:$52 sps:$4 sm:$0xff]  }
  0x28   :  { %2637 = vmatprep.subr.bf16.mxu0 %v4005_v43  ;;  %2719 = vmatprep.subr.bf16.mxu1 %v4007_v44  ;;  %v4088_v43 = vld [vmem:[%s5988_s1 + $0x964] ss:$52 sps:$4 sm:$0xff]  }
  0x29   :  { %v4083_v44 = vld [vmem:[%s5988_s1 + $0x958] ss:$52 sps:$4 sm:$0xff]  }
  0x2b   :  { %2638 = vmatpush1.bf16.msra.mxu0 %v4009_v47  ;;  %2720 = vmatpush1.bf16.msra.mxu1 %v4010_v48  ;;  %v4091_v47 = vld [vmem:[%s5988_s1 + $0x9c4] ss:$52 sps:$4 sm:$0xff]   ;;  %v4094_v48 = vld [vmem:[%s5988_s1 + $0x9cc] ss:$52 sps:$4 sm:$0xff]  }
  0x2c   :  { %2639 = vmatprep.subr.bf16.mxu0 %v4011_v49  ;;  %2721 = vmatprep.subr.bf16.mxu1 %v4013_v50  ;;  %v4089_v49 = vld [vmem:[%s5988_s1 + $0x9c0] ss:$52 sps:$4 sm:$0xff]   ;;  %v4092_v50 = vld [vmem:[%s5988_s1 + $0x9c8] ss:$52 sps:$4 sm:$0xff]  }
  0x2f   :  { %2640 = vmatpush1.bf16.msra.mxu0 %v4015_v53  ;;  %2722 = vmatpush1.bf16.msra.mxu1 %v4016_v54  ;;  %v4100_v53 = vld [vmem:[%s5988_s1 + $0xa34] ss:$52 sps:$4 sm:$0xff]  }
  0x30   :  { %2641 = vmatprep.subr.bf16.mxu0 %v4017_v56  ;;  %2723 = vmatprep.subr.bf16.mxu1 %v4019_v57  ;;  %v4095_v54 = vld [vmem:[%s5988_s1 + $0xa28] ss:$52 sps:$4 sm:$0xff]  }
  0x31   :  { %v4103_v56 = vld [vmem:[%s5988_s1 + $0xa94] ss:$52 sps:$4 sm:$0xff]   ;;  %v4106_v57 = vld [vmem:[%s5988_s1 + $0xa9c] ss:$52 sps:$4 sm:$0xff]  }
  0x33   :  { %2642 = vmatpush1.bf16.msra.mxu0 %v4021_v59  ;;  %2724 = vmatpush1.bf16.msra.mxu1 %v4022_v60  ;;  %v4101_v59 = vld [vmem:[%s5988_s1 + $0xa90] ss:$52 sps:$4 sm:$0xff]   ;;  %v4104_v60 = vld [vmem:[%s5988_s1 + $0xa98] ss:$52 sps:$4 sm:$0xff]  }
  0x34   :  { %2643 = vmatprep.subr.bf16.mxu0 %v4023_v61  ;;  %2725 = vmatprep.subr.bf16.mxu1 %v4025_v62  ;;  %v4109_v61 = vld [vmem:[%s5988_s1 + $0xafc] ss:$52 sps:$4 sm:$0xff]   ;;  %v4112_v62 = vld [vmem:[%s5988_s1 + $0xb04] ss:$52 sps:$4 sm:$0xff]  }
  0x37   :  { %2644 = vmatpush1.bf16.msra.mxu0 %v4027_v63  ;;  %2726 = vmatpush1.bf16.msra.mxu1 %v4028_v0  ;;  %v4107_v63 = vld [vmem:[%s5988_s1 + $0xaf8] ss:$52 sps:$4 sm:$0xff]   ;;  %v4110_v0 = vld [vmem:[%s5988_s1 + $0xb00] ss:$52 sps:$4 sm:$0xff]  }
  0x38   :  { %2645 = vmatprep.subr.bf16.mxu0 %v4029_v1  ;;  %2727 = vmatprep.subr.bf16.mxu1 %v4031_v2  ;;  %v4115_v1 = vld [vmem:[%s5988_s1 + $0xb64] ss:$52 sps:$4 sm:$0xff]   ;;  %v4118_v2 = vld [vmem:[%s5988_s1 + $0xb6c] ss:$52 sps:$4 sm:$0xff]  }
  0x3b   :  { %2646 = vmatpush1.bf16.msra.mxu0 %v4033_v3  ;;  %2728 = vmatpush1.bf16.msra.mxu1 %v4034_v4  ;;  %v4113_v3 = vld [vmem:[%s5988_s1 + $0xb60] ss:$52 sps:$4 sm:$0xff]   ;;  %v4116_v4 = vld [vmem:[%s5988_s1 + $0xb68] ss:$52 sps:$4 sm:$0xff]  }
  0x3c   :  { %2647 = vmatprep.subr.bf16.mxu0 %v4035_v5  ;;  %2729 = vmatprep.subr.bf16.mxu1 %v4037_v6  ;;  %v4121_v5 = vld [vmem:[%s5988_s1 + $0xbcc] ss:$52 sps:$4 sm:$0xff]   ;;  %v4124_v6 = vld [vmem:[%s5988_s1 + $0xbd4] ss:$52 sps:$4 sm:$0xff]  }
  0x3f   :  { %2648 = vmatpush1.bf16.msra.mxu0 %v4039_v7  ;;  %2730 = vmatpush1.bf16.msra.mxu1 %v4040_v8  ;;  %v4119_v7 = vld [vmem:[%s5988_s1 + $0xbc8] ss:$52 sps:$4 sm:$0xff]   ;;  %v4122_v8 = vld [vmem:[%s5988_s1 + $0xbd0] ss:$52 sps:$4 sm:$0xff]  }
  0x40   :  { %2658 = vmatprep.subr.bf16.mxu0 %v4043_v9  ;;  %2740 = vmatprep.subr.bf16.mxu1 %v4046_v10  ;;  %v4127_v9 = vld [vmem:[%s5988_s1 + $0xc34] ss:$52 sps:$4 sm:$0xff]   ;;  %v4130_v10 = vld [vmem:[%s5988_s1 + $0xc3c] ss:$52 sps:$4 sm:$0xff]  }
  0x42   :  { %2650 = vmatmul.mubr.bf16.vlgmr.msra.gmra.mrb[0].mxu0 %v4843_v12  ;;  %2732 = vmatmul.mubr.bf16.vlgmr.msra.gmra.mrb[0].mxu1 %v4843_v12 }
  0x43   :  { %2659 = vmatpush1.bf16.msra.mxu0 %v4041_v11  ;;  %2741 = vmatpush1.bf16.msra.mxu1 %v4044_v13  ;;  %v4125_v11 = vld [vmem:[%s5988_s1 + $0xc30] ss:$52 sps:$4 sm:$0xff]   ;;  %v4128_v13 = vld [vmem:[%s5988_s1 + $0xc38] ss:$52 sps:$4 sm:$0xff]  }
  0x44   :  { %2660 = vmatprep.subr.bf16.mxu0 %v4049_v14  ;;  %2742 = vmatprep.subr.bf16.mxu1 %v4052_v15  ;;  %v4133_v14 = vld [vmem:[%s5988_s1 + $0xc9c] ss:$52 sps:$4 sm:$0xff]   ;;  %v4136_v15 = vld [vmem:[%s5988_s1 + $0xca4] ss:$52 sps:$4 sm:$0xff]  }
  0x45   :  { %2690 = vmatprep.mubr.bf16.mxu0 %v4856_v16  ;;  %2772 = vmatprep.mubr.bf16.mxu1 %v4856_v16 }
  0x47   :  { %2661 = vmatpush1.bf16.msra.mxu0 %v4047_v17  ;;  %2743 = vmatpush1.bf16.msra.mxu1 %v4050_v18  ;;  %v4131_v17 = vld [vmem:[%s5988_s1 + $0xc98] ss:$52 sps:$4 sm:$0xff]   ;;  %v4134_v18 = vld [vmem:[%s5988_s1 + $0xca0] ss:$52 sps:$4 sm:$0xff]  }
  0x48   :  { %2662 = vmatprep.subr.bf16.mxu0 %v4055_v19  ;;  %2744 = vmatprep.subr.bf16.mxu1 %v4058_v20  ;;  %v4139_v19 = vld [vmem:[%s5988_s1 + $0x14] ss:$52 sps:$4 sm:$0xff]   ;;  %v4142_v20 = vld [vmem:[%s5988_s1 + $0x1c] ss:$52 sps:$4 sm:$0xff]  }
  0x4b   :  { %2663 = vmatpush1.bf16.msra.mxu0 %v4053_v21  ;;  %2745 = vmatpush1.bf16.msra.mxu1 %v4056_v22  ;;  %v5047_v21 = vcombine.high %v4843_v12, %v4843_v12  ;;  %v4137_v22 = vld [vmem:[%s5988_s1 + $0x10] ss:$52 sps:$4 sm:$0xff]  }
  0x4c   :  { %2664 = vmatprep.subr.bf16.mxu0 %v4061_v23  ;;  %2746 = vmatprep.subr.bf16.mxu1 %v4064_v24  ;;  %v4140_v23 = vld [vmem:[%s5988_s1 + $0x18] ss:$52 sps:$4 sm:$0xff]   ;;  %v4145_v24 = vld [vmem:[%s5988_s1 + $0x7c] ss:$52 sps:$4 sm:$0xff]  }
  0x4f   :  { %2665 = vmatpush1.bf16.msra.mxu0 %v4059_v25  ;;  %2747 = vmatpush1.bf16.msra.mxu1 %v4062_v26  ;;  %v4148_v25 = vld [vmem:[%s5988_s1 + $0x84] ss:$52 sps:$4 sm:$0xff]  }
  0x50   :  { %2666 = vmatprep.subr.bf16.mxu0 %v4067_v28  ;;  %2748 = vmatprep.subr.bf16.mxu1 %v4070_v29  ;;  %v4143_v26 = vld [vmem:[%s5988_s1 + $0x78] ss:$52 sps:$4 sm:$0xff]  }
  0x51   :  { %v4151_v28 = vld [vmem:[%s5988_s1 + $0xe4] ss:$52 sps:$4 sm:$0xff]   ;;  %v4154_v29 = vld [vmem:[%s5988_s1 + $0xec] ss:$52 sps:$4 sm:$0xff]  }
  0x53   :  { %2667 = vmatpush1.bf16.msra.mxu0 %v4065_v30  ;;  %2749 = vmatpush1.bf16.msra.mxu1 %v4068_v31  ;;  %v4149_v30 = vld [vmem:[%s5988_s1 + $0xe0] ss:$52 sps:$4 sm:$0xff]   ;;  %v4152_v31 = vld [vmem:[%s5988_s1 + $0xe8] ss:$52 sps:$4 sm:$0xff]  }
  0x54   :  { %2668 = vmatprep.subr.bf16.mxu0 %v4073_v32  ;;  %2750 = vmatprep.subr.bf16.mxu1 %v4076_v33  ;;  %v4157_v32 = vld [vmem:[%s5988_s1 + $0x14c] ss:$52 sps:$4 sm:$0xff]   ;;  %v4160_v33 = vld [vmem:[%s5988_s1 + $0x154] ss:$52 sps:$4 sm:$0xff]  }
  0x57   :  { %2669 = vmatpush1.bf16.msra.mxu0 %v4071_v35  ;;  %2751 = vmatpush1.bf16.msra.mxu1 %v4074_v36  ;;  %v4158_v35 = vld [vmem:[%s5988_s1 + $0x150] ss:$52 sps:$4 sm:$0xff]   ;;  %v4163_v36 = vld [vmem:[%s5988_s1 + $0x1b4] ss:$52 sps:$4 sm:$0xff]  }
  0x58   :  { %2670 = vmatprep.subr.bf16.mxu0 %v4079_v37  ;;  %2752 = vmatprep.subr.bf16.mxu1 %v4082_v39  ;;  %v4166_v37 = vld [vmem:[%s5988_s1 + $0x1bc] ss:$52 sps:$4 sm:$0xff]   ;;  %v466_v39 = vld [vmem:[#allocation2] sm:$0x1] }
  0x59   :  { %469 = vperm.xlu0 %3944, %v466_v39   ;;  %v4245_v39 = vld [vmem:[%s5988_s1 + $0x760] ss:$52 sps:$4 sm:$0xff]  }
  0x5b   :  { %2671 = vmatpush1.bf16.msra.mxu0 %v4077_v40  ;;  %2753 = vmatpush1.bf16.msra.mxu1 %v4080_v41  ;;  %v4161_v40 = vld [vmem:[%s5988_s1 + $0x1b0] ss:$52 sps:$4 sm:$0xff]   ;;  %v4164_v41 = vld [vmem:[%s5988_s1 + $0x1b8] ss:$52 sps:$4 sm:$0xff]  }
  0x5c   :  { %2672 = vmatprep.subr.bf16.mxu0 %v4085_v42  ;;  %2754 = vmatprep.subr.bf16.mxu1 %v4088_v43  ;;  %v4169_v42 = vld [vmem:[%s5988_s1 + $0x21c] ss:$52 sps:$4 sm:$0xff]   ;;  %v4172_v43 = vld [vmem:[%s5988_s1 + $0x224] ss:$52 sps:$4 sm:$0xff]  }
  0x5f   :  { %2673 = vmatpush1.bf16.msra.mxu0 %v4083_v44  ;;  %2755 = vmatpush1.bf16.msra.mxu1 %v4086_v46  ;;  %v4167_v44 = vld [vmem:[%s5988_s1 + $0x218] ss:$52 sps:$4 sm:$0xff]   ;;  %v4170_v46 = vld [vmem:[%s5988_s1 + $0x220] ss:$52 sps:$4 sm:$0xff]  }
  0x60   :  { %2674 = vmatprep.subr.bf16.mxu0 %v4091_v47  ;;  %2756 = vmatprep.subr.bf16.mxu1 %v4094_v48  ;;  %v4175_v47 = vld [vmem:[%s5988_s1 + $0x284] ss:$52 sps:$4 sm:$0xff]   ;;  %v4178_v48 = vld [vmem:[%s5988_s1 + $0x28c] ss:$52 sps:$4 sm:$0xff]  }
  0x63   :  { %2675 = vmatpush1.bf16.msra.mxu0 %v4089_v49  ;;  %2757 = vmatpush1.bf16.msra.mxu1 %v4092_v50  ;;  %v4173_v49 = vld [vmem:[%s5988_s1 + $0x280] ss:$52 sps:$4 sm:$0xff]   ;;  %v4176_v50 = vld [vmem:[%s5988_s1 + $0x288] ss:$52 sps:$4 sm:$0xff]  }
  0x64   :  { %2676 = vmatprep.subr.bf16.mxu0 %v4097_v52  ;;  %2758 = vmatprep.subr.bf16.mxu1 %v4100_v53  ;;  %v4181_v52 = vld [vmem:[%s5988_s1 + $0x2ec] ss:$52 sps:$4 sm:$0xff]   ;;  %v4184_v53 = vld [vmem:[%s5988_s1 + $0x2f4] ss:$52 sps:$4 sm:$0xff]  }
  0x67   :  { %2677 = vmatpush1.bf16.msra.mxu0 %v4095_v54  ;;  %2759 = vmatpush1.bf16.msra.mxu1 %v4098_v55  ;;  %v4179_v54 = vld [vmem:[%s5988_s1 + $0x2e8] ss:$52 sps:$4 sm:$0xff]   ;;  %v4182_v55 = vld [vmem:[%s5988_s1 + $0x2f0] ss:$52 sps:$4 sm:$0xff]  }
  0x68   :  { %2678 = vmatprep.subr.bf16.mxu0 %v4103_v56  ;;  %2760 = vmatprep.subr.bf16.mxu1 %v4106_v57  ;;  %v4187_v56 = vld [vmem:[%s5988_s1 + $0x354] ss:$52 sps:$4 sm:$0xff]   ;;  %v4190_v57 = vld [vmem:[%s5988_s1 + $0x35c] ss:$52 sps:$4 sm:$0xff]  }
  0x6b   :  { %2679 = vmatpush1.bf16.msra.mxu0 %v4101_v59  ;;  %2761 = vmatpush1.bf16.msra.mxu1 %v4104_v60  ;;  %v4185_v59 = vld [vmem:[%s5988_s1 + $0x350] ss:$52 sps:$4 sm:$0xff]   ;;  %v4188_v60 = vld [vmem:[%s5988_s1 + $0x358] ss:$52 sps:$4 sm:$0xff]  }
  0x6c   :  { %2680 = vmatprep.subr.bf16.mxu0 %v4109_v61  ;;  %2762 = vmatprep.subr.bf16.mxu1 %v4112_v62  ;;  %v4193_v61 = vld [vmem:[%s5988_s1 + $0x3bc] ss:$52 sps:$4 sm:$0xff]   ;;  %v4196_v62 = vld [vmem:[%s5988_s1 + $0x3c4] ss:$52 sps:$4 sm:$0xff]  }
  0x6f   :  { %2681 = vmatpush1.bf16.msra.mxu0 %v4107_v63  ;;  %2763 = vmatpush1.bf16.msra.mxu1 %v4110_v0  ;;  %v4191_v63 = vld [vmem:[%s5988_s1 + $0x3b8] ss:$52 sps:$4 sm:$0xff]   ;;  %v4194_v0 = vld [vmem:[%s5988_s1 + $0x3c0] ss:$52 sps:$4 sm:$0xff]  }
  0x70   :  { %2682 = vmatprep.subr.bf16.mxu0 %v4115_v1  ;;  %2764 = vmatprep.subr.bf16.mxu1 %v4118_v2  ;;  %v4199_v1 = vld [vmem:[%s5988_s1 + $0x424] ss:$52 sps:$4 sm:$0xff]   ;;  %v4202_v2 = vld [vmem:[%s5988_s1 + $0x42c] ss:$52 sps:$4 sm:$0xff]  }
  0x73   :  { %2683 = vmatpush1.bf16.msra.mxu0 %v4113_v3  ;;  %2765 = vmatpush1.bf16.msra.mxu1 %v4116_v4  ;;  %v4197_v3 = vld [vmem:[%s5988_s1 + $0x420] ss:$52 sps:$4 sm:$0xff]   ;;  %v4200_v4 = vld [vmem:[%s5988_s1 + $0x428] ss:$52 sps:$4 sm:$0xff]  }
  0x74   :  { %2684 = vmatprep.subr.bf16.mxu0 %v4121_v5  ;;  %2766 = vmatprep.subr.bf16.mxu1 %v4124_v6  ;;  %v4205_v5 = vld [vmem:[%s5988_s1 + $0x48c] ss:$52 sps:$4 sm:$0xff]   ;;  %v4208_v6 = vld [vmem:[%s5988_s1 + $0x494] ss:$52 sps:$4 sm:$0xff]  }
  0x77   :  { %2685 = vmatpush1.bf16.msra.mxu0 %v4119_v7  ;;  %2767 = vmatpush1.bf16.msra.mxu1 %v4122_v8  ;;  %v4203_v7 = vld [vmem:[%s5988_s1 + $0x488] ss:$52 sps:$4 sm:$0xff]   ;;  %v4206_v8 = vld [vmem:[%s5988_s1 + $0x490] ss:$52 sps:$4 sm:$0xff]  }
  0x78   :  { %2686 = vmatprep.subr.bf16.mxu0 %v4127_v9  ;;  %2768 = vmatprep.subr.bf16.mxu1 %v4130_v10  ;;  %v4211_v9 = vld [vmem:[%s5988_s1 + $0x4f4] ss:$52 sps:$4 sm:$0xff]   ;;  %v4214_v10 = vld [vmem:[%s5988_s1 + $0x4fc] ss:$52 sps:$4 sm:$0xff]  }
  0x7b   :  { %2687 = vmatpush1.bf16.msra.mxu0 %v4125_v11  ;;  %2769 = vmatpush1.bf16.msra.mxu1 %v4128_v13  ;;  %v4209_v11 = vld [vmem:[%s5988_s1 + $0x4f0] ss:$52 sps:$4 sm:$0xff]   ;;  %v4212_v13 = vld [vmem:[%s5988_s1 + $0x4f8] ss:$52 sps:$4 sm:$0xff]  }
  0x7c   :  { %2688 = vmatprep.subr.bf16.mxu0 %v4133_v14  ;;  %2770 = vmatprep.subr.bf16.mxu1 %v4136_v15  ;;  %v4217_v14 = vld [vmem:[%s5988_s1 + $0x55c] ss:$52 sps:$4 sm:$0xff]   ;;  %v4220_v15 = vld [vmem:[%s5988_s1 + $0x564] ss:$52 sps:$4 sm:$0xff]  }
  0x7f   :  { %2689 = vmatpush1.bf16.msra.mxu0 %v4131_v17  ;;  %2771 = vmatpush1.bf16.msra.mxu1 %v4134_v18  ;;  %v4215_v17 = vld [vmem:[%s5988_s1 + $0x558] ss:$52 sps:$4 sm:$0xff]   ;;  %v4218_v18 = vld [vmem:[%s5988_s1 + $0x560] ss:$52 sps:$4 sm:$0xff]  }
  0x80   :  { %2781 = vmatprep.subr.bf16.mxu0 %v4139_v19  ;;  %2863 = vmatprep.subr.bf16.mxu1 %v4142_v20  ;;  %v4223_v19 = vld [vmem:[%s5988_s1 + $0x5c4] ss:$52 sps:$4 sm:$0xff]   ;;  %v4226_v20 = vld [vmem:[%s5988_s1 + $0x5cc] ss:$52 sps:$4 sm:$0xff]  }
  0x82   :  { %2691 = vmatmul.mubr.bf16.vlgmr.msra.gmra.mrb[0].mxu0 %v5047_v21  ;;  %2773 = vmatmul.mubr.bf16.vlgmr.msra.gmra.mrb[0].mxu1 %v5047_v21 }
  0x83   :  { %2782 = vmatpush1.bf16.msra.mxu0 %v4137_v22  ;;  %2864 = vmatpush1.bf16.msra.mxu1 %v4140_v23  ;;  %v4221_v22 = vld [vmem:[%s5988_s1 + $0x5c0] ss:$52 sps:$4 sm:$0xff]   ;;  %v4224_v23 = vld [vmem:[%s5988_s1 + $0x5c8] ss:$52 sps:$4 sm:$0xff]  }
  0x84   :  { %2783 = vmatprep.subr.bf16.mxu0 %v4145_v24  ;;  %2865 = vmatprep.subr.bf16.mxu1 %v4148_v25  ;;  %v4229_v24 = vld [vmem:[%s5988_s1 + $0x62c] ss:$52 sps:$4 sm:$0xff]   ;;  %v4232_v25 = vld [vmem:[%s5988_s1 + $0x634] ss:$52 sps:$4 sm:$0xff]  }
  0x85   :  { %2813 = vmatprep.mubr.bf16.mxu0 %v4787_v58  ;;  %2895 = vmatprep.mubr.bf16.mxu1 %v4787_v58 }
  0x87   :  { %2784 = vmatpush1.bf16.msra.mxu0 %v4143_v26  ;;  %2866 = vmatpush1.bf16.msra.mxu1 %v4146_v27  ;;  %v4227_v26 = vld [vmem:[%s5988_s1 + $0x628] ss:$52 sps:$4 sm:$0xff]   ;;  %v4230_v27 = vld [vmem:[%s5988_s1 + $0x630] ss:$52 sps:$4 sm:$0xff]  }
  0x88   :  { %2785 = vmatprep.subr.bf16.mxu0 %v4151_v28  ;;  %2867 = vmatprep.subr.bf16.mxu1 %v4154_v29  ;;  %v4235_v28 = vld [vmem:[%s5988_s1 + $0x694] ss:$52 sps:$4 sm:$0xff]   ;;  %v4238_v29 = vld [vmem:[%s5988_s1 + $0x69c] ss:$52 sps:$4 sm:$0xff]  }
  0x8b   :  { %2786 = vmatpush1.bf16.msra.mxu0 %v4149_v30  ;;  %2868 = vmatpush1.bf16.msra.mxu1 %v4152_v31  ;;  %v4233_v30 = vld [vmem:[%s5988_s1 + $0x690] ss:$52 sps:$4 sm:$0xff]   ;;  %v4236_v31 = vld [vmem:[%s5988_s1 + $0x698] ss:$52 sps:$4 sm:$0xff]  }
  0x8c   :  { %2787 = vmatprep.subr.bf16.mxu0 %v4157_v32  ;;  %2869 = vmatprep.subr.bf16.mxu1 %v4160_v33  ;;  %v4241_v32 = vld [vmem:[%s5988_s1 + $0x6fc] ss:$52 sps:$4 sm:$0xff]   ;;  %v4244_v33 = vld [vmem:[%s5988_s1 + $0x704] ss:$52 sps:$4 sm:$0xff]  }
  0x8f   :  { %2788 = vmatpush1.bf16.msra.mxu0 %v4155_v34  ;;  %2870 = vmatpush1.bf16.msra.mxu1 %v4158_v35  ;;  %v4239_v34 = vld [vmem:[%s5988_s1 + $0x6f8] ss:$52 sps:$4 sm:$0xff]   ;;  %v4242_v35 = vld [vmem:[%s5988_s1 + $0x700] ss:$52 sps:$4 sm:$0xff]  }
  0x90   :  { %2789 = vmatprep.subr.bf16.mxu0 %v4163_v36  ;;  %2871 = vmatprep.subr.bf16.mxu1 %v4166_v37  ;;  %v4247_v36 = vld [vmem:[%s5988_s1 + $0x764] ss:$52 sps:$4 sm:$0xff]   ;;  %v4250_v37 = vld [vmem:[%s5988_s1 + $0x76c] ss:$52 sps:$4 sm:$0xff]  }
  0x93   :  { %2790 = vmatpush1.bf16.msra.mxu0 %v4161_v40  ;;  %2872 = vmatpush1.bf16.msra.mxu1 %v4164_v41  ;;  %v4248_v40 = vld [vmem:[%s5988_s1 + $0x768] ss:$52 sps:$4 sm:$0xff]   ;;  %v4253_v41 = vld [vmem:[%s5988_s1 + $0x7cc] ss:$52 sps:$4 sm:$0xff]  }
  0x94   :  { %2791 = vmatprep.subr.bf16.mxu0 %v4169_v42  ;;  %2873 = vmatprep.subr.bf16.mxu1 %v4172_v43  ;;  %v4256_v42 = vld [vmem:[%s5988_s1 + $0x7d4] ss:$52 sps:$4 sm:$0xff]  }
  0x95   :  { %v4251_v43 = vld [vmem:[%s5988_s1 + $0x7c8] ss:$52 sps:$4 sm:$0xff]  }
  0x97   :  { %2792 = vmatpush1.bf16.msra.mxu0 %v4167_v44  ;;  %2874 = vmatpush1.bf16.msra.mxu1 %v4170_v46  ;;  %v4254_v44 = vld [vmem:[%s5988_s1 + $0x7d0] ss:$52 sps:$4 sm:$0xff]   ;;  %v4259_v46 = vld [vmem:[%s5988_s1 + $0x834] ss:$52 sps:$4 sm:$0xff]  }
  0x98   :  { %2793 = vmatprep.subr.bf16.mxu0 %v4175_v47  ;;  %2875 = vmatprep.subr.bf16.mxu1 %v4178_v48  ;;  %v4262_v47 = vld [vmem:[%s5988_s1 + $0x83c] ss:$52 sps:$4 sm:$0xff]  }
  0x99   :  { %v4257_v48 = vld [vmem:[%s5988_s1 + $0x830] ss:$52 sps:$4 sm:$0xff]  }
  0x9b   :  { %2794 = vmatpush1.bf16.msra.mxu0 %v4173_v49  ;;  %2876 = vmatpush1.bf16.msra.mxu1 %v4176_v50  ;;  %v4260_v49 = vld [vmem:[%s5988_s1 + $0x838] ss:$52 sps:$4 sm:$0xff]   ;;  %v4265_v50 = vld [vmem:[%s5988_s1 + $0x89c] ss:$52 sps:$4 sm:$0xff]  }
  0x9c   :  { %2795 = vmatprep.subr.bf16.mxu0 %v4181_v52  ;;  %2877 = vmatprep.subr.bf16.mxu1 %v4184_v53  ;;  %v4268_v52 = vld [vmem:[%s5988_s1 + $0x8a4] ss:$52 sps:$4 sm:$0xff]  }
  0x9d   :  { %v4263_v53 = vld [vmem:[%s5988_s1 + $0x898] ss:$52 sps:$4 sm:$0xff]  }
  0x9f   :  { %2796 = vmatpush1.bf16.msra.mxu0 %v4179_v54  ;;  %2878 = vmatpush1.bf16.msra.mxu1 %v4182_v55  ;;  %v4266_v54 = vld [vmem:[%s5988_s1 + $0x8a0] ss:$52 sps:$4 sm:$0xff]   ;;  %v4271_v55 = vld [vmem:[%s5988_s1 + $0x904] ss:$52 sps:$4 sm:$0xff]  }
  0xa0   :  { %2797 = vmatprep.subr.bf16.mxu0 %v4187_v56  ;;  %2879 = vmatprep.subr.bf16.mxu1 %v4190_v57  ;;  %v4274_v56 = vld [vmem:[%s5988_s1 + $0x90c] ss:$52 sps:$4 sm:$0xff]  }
  0xa1   :  { %v4269_v57 = vld [vmem:[%s5988_s1 + $0x900] ss:$52 sps:$4 sm:$0xff]  }
  0xa3   :  { %2798 = vmatpush1.bf16.msra.mxu0 %v4185_v59  ;;  %2880 = vmatpush1.bf16.msra.mxu1 %v4188_v60  ;;  %v4272_v59 = vld [vmem:[%s5988_s1 + $0x908] ss:$52 sps:$4 sm:$0xff]   ;;  %v4277_v60 = vld [vmem:[%s5988_s1 + $0x96c] ss:$52 sps:$4 sm:$0xff]  }
  0xa4   :  { %2799 = vmatprep.subr.bf16.mxu0 %v4193_v61  ;;  %2881 = vmatprep.subr.bf16.mxu1 %v4196_v62  ;;  %v4280_v61 = vld [vmem:[%s5988_s1 + $0x974] ss:$52 sps:$4 sm:$0xff]  }
  0xa5   :  { %v4275_v62 = vld [vmem:[%s5988_s1 + $0x968] ss:$52 sps:$4 sm:$0xff]  }
  0xa7   :  { %2800 = vmatpush1.bf16.msra.mxu0 %v4191_v63  ;;  %2882 = vmatpush1.bf16.msra.mxu1 %v4194_v0  ;;  %v4278_v63 = vld [vmem:[%s5988_s1 + $0x970] ss:$52 sps:$4 sm:$0xff]   ;;  %v4283_v0 = vld [vmem:[%s5988_s1 + $0x9d4] ss:$52 sps:$4 sm:$0xff]  }
  0xa8   :  { %2801 = vmatprep.subr.bf16.mxu0 %v4199_v1  ;;  %2883 = vmatprep.subr.bf16.mxu1 %v4202_v2  ;;  %v4286_v1 = vld [vmem:[%s5988_s1 + $0x9dc] ss:$52 sps:$4 sm:$0xff]  }
  0xa9   :  { %v4281_v2 = vld [vmem:[%s5988_s1 + $0x9d0] ss:$52 sps:$4 sm:$0xff]  }
  0xab   :  { %2802 = vmatpush1.bf16.msra.mxu0 %v4197_v3  ;;  %2884 = vmatpush1.bf16.msra.mxu1 %v4200_v4  ;;  %v4284_v3 = vld [vmem:[%s5988_s1 + $0x9d8] ss:$52 sps:$4 sm:$0xff]   ;;  %v4289_v4 = vld [vmem:[%s5988_s1 + $0xa3c] ss:$52 sps:$4 sm:$0xff]  }
  0xac   :  { %2803 = vmatprep.subr.bf16.mxu0 %v4205_v5  ;;  %2885 = vmatprep.subr.bf16.mxu1 %v4208_v6  ;;  %v4292_v5 = vld [vmem:[%s5988_s1 + $0xa44] ss:$52 sps:$4 sm:$0xff]  }
  0xad   :  { %v4287_v6 = vld [vmem:[%s5988_s1 + $0xa38] ss:$52 sps:$4 sm:$0xff]  }
  0xaf   :  { %2804 = vmatpush1.bf16.msra.mxu0 %v4203_v7  ;;  %2886 = vmatpush1.bf16.msra.mxu1 %v4206_v8  ;;  %v4290_v7 = vld [vmem:[%s5988_s1 + $0xa40] ss:$52 sps:$4 sm:$0xff]   ;;  %v4295_v8 = vld [vmem:[%s5988_s1 + $0xaa4] ss:$52 sps:$4 sm:$0xff]  }
  0xb0   :  { %2805 = vmatprep.subr.bf16.mxu0 %v4211_v9  ;;  %2887 = vmatprep.subr.bf16.mxu1 %v4214_v10  ;;  %v4298_v9 = vld [vmem:[%s5988_s1 + $0xaac] ss:$52 sps:$4 sm:$0xff]  }
  0xb1   :  { %v4293_v10 = vld [vmem:[%s5988_s1 + $0xaa0] ss:$52 sps:$4 sm:$0xff]  }
  0xb3   :  { %2806 = vmatpush1.bf16.msra.mxu0 %v4209_v11  ;;  %2888 = vmatpush1.bf16.msra.mxu1 %v4212_v13  ;;  %v4296_v11 = vld [vmem:[%s5988_s1 + $0xaa8] ss:$52 sps:$4 sm:$0xff]   ;;  %v4301_v13 = vld [vmem:[%s5988_s1 + $0xb0c] ss:$52 sps:$4 sm:$0xff]  }
  0xb4   :  { %2807 = vmatprep.subr.bf16.mxu0 %v4217_v14  ;;  %2889 = vmatprep.subr.bf16.mxu1 %v4220_v15  ;;  %v4304_v14 = vld [vmem:[%s5988_s1 + $0xb14] ss:$52 sps:$4 sm:$0xff]  }
  0xb5   :  { %v4299_v15 = vld [vmem:[%s5988_s1 + $0xb08] ss:$52 sps:$4 sm:$0xff]  }
  0xb7   :  { %2808 = vmatpush1.bf16.msra.mxu0 %v4215_v17  ;;  %2890 = vmatpush1.bf16.msra.mxu1 %v4218_v18  ;;  %v4302_v17 = vld [vmem:[%s5988_s1 + $0xb10] ss:$52 sps:$4 sm:$0xff]   ;;  %v4307_v18 = vld [vmem:[%s5988_s1 + $0xb74] ss:$52 sps:$4 sm:$0xff]  }
  0xb8   :  { %2809 = vmatprep.subr.bf16.mxu0 %v4223_v19  ;;  %2891 = vmatprep.subr.bf16.mxu1 %v4226_v20  ;;  %v4310_v19 = vld [vmem:[%s5988_s1 + $0xb7c] ss:$52 sps:$4 sm:$0xff]  }
  0xb9   :  { %v4305_v20 = vld [vmem:[%s5988_s1 + $0xb70] ss:$52 sps:$4 sm:$0xff]  }
  0xbb   :  { %2810 = vmatpush1.bf16.msra.mxu0 %v4221_v22  ;;  %2892 = vmatpush1.bf16.msra.mxu1 %v4224_v23  ;;  %v4308_v22 = vld [vmem:[%s5988_s1 + $0xb78] ss:$52 sps:$4 sm:$0xff]   ;;  %v4313_v23 = vld [vmem:[%s5988_s1 + $0xbdc] ss:$52 sps:$4 sm:$0xff]  }
  0xbc   :  { %2811 = vmatprep.subr.bf16.mxu0 %v4229_v24  ;;  %2893 = vmatprep.subr.bf16.mxu1 %v4232_v25  ;;  %v4316_v24 = vld [vmem:[%s5988_s1 + $0xbe4] ss:$52 sps:$4 sm:$0xff]  }
  0xbd   :  { %v4311_v25 = vld [vmem:[%s5988_s1 + $0xbd8] ss:$52 sps:$4 sm:$0xff]  }
  0xbf   :  { %2812 = vmatpush1.bf16.msra.mxu0 %v4227_v26  ;;  %2894 = vmatpush1.bf16.msra.mxu1 %v4230_v27  ;;  %v4314_v26 = vld [vmem:[%s5988_s1 + $0xbe0] ss:$52 sps:$4 sm:$0xff]   ;;  %v4319_v27 = vld [vmem:[%s5988_s1 + $0xc44] ss:$52 sps:$4 sm:$0xff]  }
  0xc0   :  { %2822 = vmatprep.subr.bf16.mxu0 %v4235_v28  ;;  %2904 = vmatprep.subr.bf16.mxu1 %v4238_v29  ;;  %v4322_v28 = vld [vmem:[%s5988_s1 + $0xc4c] ss:$52 sps:$4 sm:$0xff]  }
  0xc1   :  { %v4317_v29 = vld [vmem:[%s5988_s1 + $0xc40] ss:$52 sps:$4 sm:$0xff]  }
  0xc2   :  { %2814 = vmatmul.mubr.bf16.vlgmr.msra.gmra.mrb[4].mxu0 %v4843_v12  ;;  %2896 = vmatmul.mubr.bf16.vlgmr.msra.gmra.mrb[4].mxu1 %v4843_v12 }
  0xc3   :  { %2823 = vmatpush1.bf16.msra.mxu0 %v4233_v30  ;;  %2905 = vmatpush1.bf16.msra.mxu1 %v4236_v31  ;;  %v4320_v30 = vld [vmem:[%s5988_s1 + $0xc48] ss:$52 sps:$4 sm:$0xff]   ;;  %v4325_v31 = vld [vmem:[%s5988_s1 + $0xcac] ss:$52 sps:$4 sm:$0xff]  }
  0xc4   :  { %2824 = vmatprep.subr.bf16.mxu0 %v4241_v32  ;;  %2906 = vmatprep.subr.bf16.mxu1 %v4244_v33  ;;  %v4328_v32 = vld [vmem:[%s5988_s1 + $0xcb4] ss:$52 sps:$4 sm:$0xff]  }
  0xc5   :  { %2854 = vmatprep.mubr.bf16.mxu0 %v4856_v16  ;;  %2936 = vmatprep.mubr.bf16.mxu1 %v4856_v16  ;;  %v4323_v33 = vld [vmem:[%s5988_s1 + $0xca8] ss:$52 sps:$4 sm:$0xff]  }
  0xc7   :  { %2825 = vmatpush1.bf16.msra.mxu0 %v4239_v34  ;;  %2907 = vmatpush1.bf16.msra.mxu1 %v4242_v35  ;;  %v4326_v34 = vld [vmem:[%s5988_s1 + $0xcb0] ss:$52 sps:$4 sm:$0xff]  }
  0xc8   :  { %2826 = vmatprep.subr.bf16.mxu0 %v4247_v36  ;;  %2908 = vmatprep.subr.bf16.mxu1 %v4250_v37  ;;  %v4331_v35 = vld [vmem:[%s5988_s1 + $0x24] ss:$52 sps:$4 sm:$0xff]   ;;  %v4334_v36 = vld [vmem:[%s5988_s1 + $0x2c] ss:$52 sps:$4 sm:$0xff]  }
  0xc9   :  { %v4329_v37 = vld [vmem:[%s5988_s1 + $0x20] ss:$52 sps:$4 sm:$0xff]  }
  0xcb   :  { %2827 = vmatpush1.bf16.msra.mxu0 %v4245_v39  ;;  %2909 = vmatpush1.bf16.msra.mxu1 %v4248_v40  ;;  %v4332_v39 = vld [vmem:[%s5988_s1 + $0x28] ss:$52 sps:$4 sm:$0xff]   ;;  %v4337_v40 = vld [vmem:[%s5988_s1 + $0x8c] ss:$52 sps:$4 sm:$0xff]  }
  0xcc   :  { %2828 = vmatprep.subr.bf16.mxu0 %v4253_v41  ;;  %2910 = vmatprep.subr.bf16.mxu1 %v4256_v42  ;;  %v4340_v41 = vld [vmem:[%s5988_s1 + $0x94] ss:$52 sps:$4 sm:$0xff]  }
  0xcd   :  { %v4335_v42 = vld [vmem:[%s5988_s1 + $0x88] ss:$52 sps:$4 sm:$0xff]  }
  0xcf   :  { %2829 = vmatpush1.bf16.msra.mxu0 %v4251_v43  ;;  %2911 = vmatpush1.bf16.msra.mxu1 %v4254_v44  ;;  %v4338_v43 = vld [vmem:[%s5988_s1 + $0x90] ss:$52 sps:$4 sm:$0xff]   ;;  %v4343_v44 = vld [vmem:[%s5988_s1 + $0xf4] ss:$52 sps:$4 sm:$0xff]  }
  0xd0   :  { %2830 = vmatprep.subr.bf16.mxu0 %v4259_v46  ;;  %2912 = vmatprep.subr.bf16.mxu1 %v4262_v47  ;;  %v4346_v46 = vld [vmem:[%s5988_s1 + $0xfc] ss:$52 sps:$4 sm:$0xff]  }
  0xd1   :  { %v4341_v47 = vld [vmem:[%s5988_s1 + $0xf0] ss:$52 sps:$4 sm:$0xff]  }
  0xd3   :  { %2831 = vmatpush1.bf16.msra.mxu0 %v4257_v48  ;;  %2913 = vmatpush1.bf16.msra.mxu1 %v4260_v49  ;;  %v4344_v48 = vld [vmem:[%s5988_s1 + $0xf8] ss:$52 sps:$4 sm:$0xff]   ;;  %v4349_v49 = vld [vmem:[%s5988_s1 + $0x15c] ss:$52 sps:$4 sm:$0xff]  }
  0xd4   :  { %2832 = vmatprep.subr.bf16.mxu0 %v4265_v50  ;;  %2914 = vmatprep.subr.bf16.mxu1 %v4268_v52  ;;  %v4352_v50 = vld [vmem:[%s5988_s1 + $0x164] ss:$52 sps:$4 sm:$0xff]  }
  0xd5   :  { %v4347_v52 = vld [vmem:[%s5988_s1 + $0x158] ss:$52 sps:$4 sm:$0xff]  }
  0xd7   :  { %2833 = vmatpush1.bf16.msra.mxu0 %v4263_v53  ;;  %2915 = vmatpush1.bf16.msra.mxu1 %v4266_v54  ;;  %v4350_v53 = vld [vmem:[%s5988_s1 + $0x160] ss:$52 sps:$4 sm:$0xff]   ;;  %v4355_v54 = vld [vmem:[%s5988_s1 + $0x1c4] ss:$52 sps:$4 sm:$0xff]  }
  0xd8   :  { %2834 = vmatprep.subr.bf16.mxu0 %v4271_v55  ;;  %2916 = vmatprep.subr.bf16.mxu1 %v4274_v56  ;;  %v4358_v55 = vld [vmem:[%s5988_s1 + $0x1cc] ss:$52 sps:$4 sm:$0xff]  }
  0xd9   :  { %v4353_v56 = vld [vmem:[%s5988_s1 + $0x1c0] ss:$52 sps:$4 sm:$0xff]  }
  0xdb   :  { %2835 = vmatpush1.bf16.msra.mxu0 %v4269_v57  ;;  %2917 = vmatpush1.bf16.msra.mxu1 %v4272_v59  ;;  %v4356_v57 = vld [vmem:[%s5988_s1 + $0x1c8] ss:$52 sps:$4 sm:$0xff]   ;;  %v4361_v59 = vld [vmem:[%s5988_s1 + $0x22c] ss:$52 sps:$4 sm:$0xff]  }
  0xdc   :  { %2836 = vmatprep.subr.bf16.mxu0 %v4277_v60  ;;  %2918 = vmatprep.subr.bf16.mxu1 %v4280_v61  ;;  %v4364_v60 = vld [vmem:[%s5988_s1 + $0x234] ss:$52 sps:$4 sm:$0xff]  }
  0xdd   :  { %v4359_v61 = vld [vmem:[%s5988_s1 + $0x228] ss:$52 sps:$4 sm:$0xff]  }
  0xdf   :  { %2837 = vmatpush1.bf16.msra.mxu0 %v4275_v62  ;;  %2919 = vmatpush1.bf16.msra.mxu1 %v4278_v63  ;;  %v4362_v62 = vld [vmem:[%s5988_s1 + $0x230] ss:$52 sps:$4 sm:$0xff]   ;;  %v4367_v63 = vld [vmem:[%s5988_s1 + $0x294] ss:$52 sps:$4 sm:$0xff]  }
  0xe0   :  { %2838 = vmatprep.subr.bf16.mxu0 %v4283_v0  ;;  %2920 = vmatprep.subr.bf16.mxu1 %v4286_v1  ;;  %v4370_v0 = vld [vmem:[%s5988_s1 + $0x29c] ss:$52 sps:$4 sm:$0xff]  }
  0xe1   :  { %v4365_v1 = vld [vmem:[%s5988_s1 + $0x290] ss:$52 sps:$4 sm:$0xff]  }
  0xe3   :  { %2839 = vmatpush1.bf16.msra.mxu0 %v4281_v2  ;;  %2921 = vmatpush1.bf16.msra.mxu1 %v4284_v3  ;;  %v4368_v2 = vld [vmem:[%s5988_s1 + $0x298] ss:$52 sps:$4 sm:$0xff]   ;;  %v4373_v3 = vld [vmem:[%s5988_s1 + $0x2fc] ss:$52 sps:$4 sm:$0xff]  }
  0xe4   :  { %2840 = vmatprep.subr.bf16.mxu0 %v4289_v4  ;;  %2922 = vmatprep.subr.bf16.mxu1 %v4292_v5  ;;  %v4376_v4 = vld [vmem:[%s5988_s1 + $0x304] ss:$52 sps:$4 sm:$0xff]  }
  0xe5   :  { %v4371_v5 = vld [vmem:[%s5988_s1 + $0x2f8] ss:$52 sps:$4 sm:$0xff]  }
  0xe7   :  { %2841 = vmatpush1.bf16.msra.mxu0 %v4287_v6  ;;  %2923 = vmatpush1.bf16.msra.mxu1 %v4290_v7  ;;  %v4374_v6 = vld [vmem:[%s5988_s1 + $0x300] ss:$52 sps:$4 sm:$0xff]   ;;  %v4379_v7 = vld [vmem:[%s5988_s1 + $0x364] ss:$52 sps:$4 sm:$0xff]  }
  0xe8   :  { %2842 = vmatprep.subr.bf16.mxu0 %v4295_v8  ;;  %2924 = vmatprep.subr.bf16.mxu1 %v4298_v9  ;;  %v4382_v8 = vld [vmem:[%s5988_s1 + $0x36c] ss:$52 sps:$4 sm:$0xff]  }
  0xe9   :  { %v4377_v9 = vld [vmem:[%s5988_s1 + $0x360] ss:$52 sps:$4 sm:$0xff]  }
  0xeb   :  { %2843 = vmatpush1.bf16.msra.mxu0 %v4293_v10  ;;  %2925 = vmatpush1.bf16.msra.mxu1 %v4296_v11  ;;  %v4380_v10 = vld [vmem:[%s5988_s1 + $0x368] ss:$52 sps:$4 sm:$0xff]   ;;  %v4385_v11 = vld [vmem:[%s5988_s1 + $0x3cc] ss:$52 sps:$4 sm:$0xff]  }
  0xec   :  { %2844 = vmatprep.subr.bf16.mxu0 %v4301_v13  ;;  %2926 = vmatprep.subr.bf16.mxu1 %v4304_v14  ;;  %v4388_v13 = vld [vmem:[%s5988_s1 + $0x3d4] ss:$52 sps:$4 sm:$0xff]  }
  0xed   :  { %v4383_v14 = vld [vmem:[%s5988_s1 + $0x3c8] ss:$52 sps:$4 sm:$0xff]  }
  0xef   :  { %2845 = vmatpush1.bf16.msra.mxu0 %v4299_v15  ;;  %2927 = vmatpush1.bf16.msra.mxu1 %v4302_v17  ;;  %v4386_v15 = vld [vmem:[%s5988_s1 + $0x3d0] ss:$52 sps:$4 sm:$0xff]   ;;  %v4391_v17 = vld [vmem:[%s5988_s1 + $0x434] ss:$52 sps:$4 sm:$0xff]  }
  0xf0   :  { %2846 = vmatprep.subr.bf16.mxu0 %v4307_v18  ;;  %2928 = vmatprep.subr.bf16.mxu1 %v4310_v19  ;;  %v4394_v18 = vld [vmem:[%s5988_s1 + $0x43c] ss:$52 sps:$4 sm:$0xff]  }
  0xf1   :  { %v4389_v19 = vld [vmem:[%s5988_s1 + $0x430] ss:$52 sps:$4 sm:$0xff]  }
  0xf3   :  { %2847 = vmatpush1.bf16.msra.mxu0 %v4305_v20  ;;  %2929 = vmatpush1.bf16.msra.mxu1 %v4308_v22  ;;  %v4392_v20 = vld [vmem:[%s5988_s1 + $0x438] ss:$52 sps:$4 sm:$0xff]   ;;  %v4397_v22 = vld [vmem:[%s5988_s1 + $0x49c] ss:$52 sps:$4 sm:$0xff]  }
  0xf4   :  { %2848 = vmatprep.subr.bf16.mxu0 %v4313_v23  ;;  %2930 = vmatprep.subr.bf16.mxu1 %v4316_v24  ;;  %v4400_v23 = vld [vmem:[%s5988_s1 + $0x4a4] ss:$52 sps:$4 sm:$0xff]  }
  0xf5   :  { %v4395_v24 = vld [vmem:[%s5988_s1 + $0x498] ss:$52 sps:$4 sm:$0xff]  }
  0xf7   :  { %2849 = vmatpush1.bf16.msra.mxu0 %v4311_v25  ;;  %2931 = vmatpush1.bf16.msra.mxu1 %v4314_v26  ;;  %v4398_v25 = vld [vmem:[%s5988_s1 + $0x4a0] ss:$52 sps:$4 sm:$0xff]   ;;  %v4403_v26 = vld [vmem:[%s5988_s1 + $0x504] ss:$52 sps:$4 sm:$0xff]  }
  0xf8   :  { %2850 = vmatprep.subr.bf16.mxu0 %v4319_v27  ;;  %2932 = vmatprep.subr.bf16.mxu1 %v4322_v28  ;;  %v4406_v27 = vld [vmem:[%s5988_s1 + $0x50c] ss:$52 sps:$4 sm:$0xff]  }
  0xf9   :  { %v4401_v28 = vld [vmem:[%s5988_s1 + $0x500] ss:$52 sps:$4 sm:$0xff]  }
  0xfb   :  { %2851 = vmatpush1.bf16.msra.mxu0 %v4317_v29  ;;  %2933 = vmatpush1.bf16.msra.mxu1 %v4320_v30  ;;  %v4404_v29 = vld [vmem:[%s5988_s1 + $0x508] ss:$52 sps:$4 sm:$0xff]   ;;  %v4409_v30 = vld [vmem:[%s5988_s1 + $0x56c] ss:$52 sps:$4 sm:$0xff]  }
  0xfc   :  { %2852 = vmatprep.subr.bf16.mxu0 %v4325_v31  ;;  %2934 = vmatprep.subr.bf16.mxu1 %v4328_v32  ;;  %v4412_v31 = vld [vmem:[%s5988_s1 + $0x574] ss:$52 sps:$4 sm:$0xff]  }
  0xfd   :  { %v4407_v32 = vld [vmem:[%s5988_s1 + $0x568] ss:$52 sps:$4 sm:$0xff]  }
  0xff   :  { %2853 = vmatpush1.bf16.msra.mxu0 %v4323_v33  ;;  %2935 = vmatpush1.bf16.msra.mxu1 %v4326_v34  ;;  %v4410_v33 = vld [vmem:[%s5988_s1 + $0x570] ss:$52 sps:$4 sm:$0xff]   ;;  %v4415_v34 = vld [vmem:[%s5988_s1 + $0x5d4] ss:$52 sps:$4 sm:$0xff]  }
 0x100   :  { %2945 = vmatprep.subr.bf16.mxu0 %v4331_v35  ;;  %3027 = vmatprep.subr.bf16.mxu1 %v4334_v36  ;;  %v4418_v35 = vld [vmem:[%s5988_s1 + $0x5dc] ss:$52 sps:$4 sm:$0xff]  }
 0x101   :  { %v4413_v36 = vld [vmem:[%s5988_s1 + $0x5d0] ss:$52 sps:$4 sm:$0xff]  }
 0x102   :  { %2855 = vmatmul.mubr.bf16.vlgmr.msra.gmra.mrb[4].mxu0 %v5047_v21  ;;  %2937 = vmatmul.mubr.bf16.vlgmr.msra.gmra.mrb[4].mxu1 %v5047_v21 }
 0x103   :  { %2946 = vmatpush1.bf16.msra.mxu0 %v4329_v37  ;;  %3028 = vmatpush1.bf16.msra.mxu1 %v4332_v39  ;;  %v4416_v37 = vld [vmem:[%s5988_s1 + $0x5d8] ss:$52 sps:$4 sm:$0xff]   ;;  %v4421_v39 = vld [vmem:[%s5988_s1 + $0x63c] ss:$52 sps:$4 sm:$0xff]  }
 0x104   :  { %2947 = vmatprep.subr.bf16.mxu0 %v4337_v40  ;;  %3029 = vmatprep.subr.bf16.mxu1 %v4340_v41  ;;  %v4424_v40 = vld [vmem:[%s5988_s1 + $0x644] ss:$52 sps:$4 sm:$0xff]  }
 0x105   :  { %2977 = vmatprep.mubr.bf16.mxu0 %v4787_v58  ;;  %3059 = vmatprep.mubr.bf16.mxu1 %v4787_v58  ;;  %v4419_v41 = vld [vmem:[%s5988_s1 + $0x638] ss:$52 sps:$4 sm:$0xff]  }
 0x107   :  { %2948 = vmatpush1.bf16.msra.mxu0 %v4335_v42  ;;  %3030 = vmatpush1.bf16.msra.mxu1 %v4338_v43  ;;  %v4422_v42 = vld [vmem:[%s5988_s1 + $0x640] ss:$52 sps:$4 sm:$0xff]   ;;  %v4427_v43 = vld [vmem:[%s5988_s1 + $0x6a4] ss:$52 sps:$4 sm:$0xff]  }
 0x108   :  { %2949 = vmatprep.subr.bf16.mxu0 %v4343_v44  ;;  %3031 = vmatprep.subr.bf16.mxu1 %v4346_v46  ;;  %v4430_v44 = vld [vmem:[%s5988_s1 + $0x6ac] ss:$52 sps:$4 sm:$0xff]  }
 0x109   :  { %v4425_v46 = vld [vmem:[%s5988_s1 + $0x6a0] ss:$52 sps:$4 sm:$0xff]  }
 0x10b   :  { %2950 = vmatpush1.bf16.msra.mxu0 %v4341_v47  ;;  %3032 = vmatpush1.bf16.msra.mxu1 %v4344_v48  ;;  %v4428_v47 = vld [vmem:[%s5988_s1 + $0x6a8] ss:$52 sps:$4 sm:$0xff]   ;;  %v4433_v48 = vld [vmem:[%s5988_s1 + $0x70c] ss:$52 sps:$4 sm:$0xff]  }
 0x10c   :  { %2951 = vmatprep.subr.bf16.mxu0 %v4349_v49  ;;  %3033 = vmatprep.subr.bf16.mxu1 %v4352_v50  ;;  %v4436_v49 = vld [vmem:[%s5988_s1 + $0x714] ss:$52 sps:$4 sm:$0xff]  }
 0x10d   :  { %v4431_v50 = vld [vmem:[%s5988_s1 + $0x708] ss:$52 sps:$4 sm:$0xff]  }
 0x10f   :  { %2952 = vmatpush1.bf16.msra.mxu0 %v4347_v52  ;;  %3034 = vmatpush1.bf16.msra.mxu1 %v4350_v53  ;;  %v4434_v52 = vld [vmem:[%s5988_s1 + $0x710] ss:$52 sps:$4 sm:$0xff]   ;;  %v4439_v53 = vld [vmem:[%s5988_s1 + $0x774] ss:$52 sps:$4 sm:$0xff]  }
 0x110   :  { %2953 = vmatprep.subr.bf16.mxu0 %v4355_v54  ;;  %3035 = vmatprep.subr.bf16.mxu1 %v4358_v55  ;;  %v4442_v54 = vld [vmem:[%s5988_s1 + $0x77c] ss:$52 sps:$4 sm:$0xff]  }
 0x111   :  { %v4437_v55 = vld [vmem:[%s5988_s1 + $0x770] ss:$52 sps:$4 sm:$0xff]  }
 0x113   :  { %2954 = vmatpush1.bf16.msra.mxu0 %v4353_v56  ;;  %3036 = vmatpush1.bf16.msra.mxu1 %v4356_v57  ;;  %v4440_v56 = vld [vmem:[%s5988_s1 + $0x778] ss:$52 sps:$4 sm:$0xff]   ;;  %v4445_v57 = vld [vmem:[%s5988_s1 + $0x7dc] ss:$52 sps:$4 sm:$0xff]  }
 0x114   :  { %2955 = vmatprep.subr.bf16.mxu0 %v4361_v59  ;;  %3037 = vmatprep.subr.bf16.mxu1 %v4364_v60  ;;  %v4448_v59 = vld [vmem:[%s5988_s1 + $0x7e4] ss:$52 sps:$4 sm:$0xff]  }
 0x115   :  { %v4443_v60 = vld [vmem:[%s5988_s1 + $0x7d8] ss:$52 sps:$4 sm:$0xff]  }
 0x117   :  { %2956 = vmatpush1.bf16.msra.mxu0 %v4359_v61  ;;  %3038 = vmatpush1.bf16.msra.mxu1 %v4362_v62  ;;  %v4446_v61 = vld [vmem:[%s5988_s1 + $0x7e0] ss:$52 sps:$4 sm:$0xff]   ;;  %v4451_v62 = vld [vmem:[%s5988_s1 + $0x844] ss:$52 sps:$4 sm:$0xff]  }
 0x118   :  { %2957 = vmatprep.subr.bf16.mxu0 %v4367_v63  ;;  %3039 = vmatprep.subr.bf16.mxu1 %v4370_v0  ;;  %v4454_v63 = vld [vmem:[%s5988_s1 + $0x84c] ss:$52 sps:$4 sm:$0xff]   ;;  %v474_v0 = vsub.s32 0, %v4754_v45  ;;  %v4460_v45 = vld [vmem:[%s5988_s1 + $0x8b4] ss:$52 sps:$4 sm:$0xff]  }
 0x11b   :  { %2958 = vmatpush1.bf16.msra.mxu0 %v4365_v1  ;;  %3040 = vmatpush1.bf16.msra.mxu1 %v4368_v2  ;;  %v4449_v1 = vld [vmem:[%s5988_s1 + $0x840] ss:$52 sps:$4 sm:$0xff]   ;;  %v4452_v2 = vld [vmem:[%s5988_s1 + $0x848] ss:$52 sps:$4 sm:$0xff]  }
 0x11c   :  { %2959 = vmatprep.subr.bf16.mxu0 %v4373_v3  ;;  %3041 = vmatprep.subr.bf16.mxu1 %v4376_v4  ;;  %v470_v3 = vpop.permute.xlu0 %469  ;;  %v4457_v4 = vld [vmem:[%s5988_s1 + $0x8ac] ss:$52 sps:$4 sm:$0xff]  }
 0x11f   :  { %2960 = vmatpush1.bf16.msra.mxu0 %v4371_v5  ;;  %3042 = vmatpush1.bf16.msra.mxu1 %v4374_v6  ;;  %v5702_v5 = vrot.slane %v470_v3, %v474_v0  ;;  %v4455_v6 = vld [vmem:[%s5988_s1 + $0x8a8] ss:$52 sps:$4 sm:$0xff]  }
 0x120   :  { %2961 = vmatprep.subr.bf16.mxu0 %v4379_v7  ;;  %3043 = vmatprep.subr.bf16.mxu1 %v4382_v8  ;;  %v4458_v7 = vld [vmem:[%s5988_s1 + $0x8b0] ss:$52 sps:$4 sm:$0xff]   ;;  %v4463_v8 = vld [vmem:[%s5988_s1 + $0x914] ss:$52 sps:$4 sm:$0xff]  }
 0x123   :  { %2962 = vmatpush1.bf16.msra.mxu0 %v4377_v9  ;;  %3044 = vmatpush1.bf16.msra.mxu1 %v4380_v10  ;;  %v4466_v9 = vld [vmem:[%s5988_s1 + $0x91c] ss:$52 sps:$4 sm:$0xff]  }
 0x124   :  { %2963 = vmatprep.subr.bf16.mxu0 %v4385_v11  ;;  %3045 = vmatprep.subr.bf16.mxu1 %v4388_v13 }
 0x127   :  { %2964 = vmatpush1.bf16.msra.mxu0 %v4383_v14  ;;  %3046 = vmatpush1.bf16.msra.mxu1 %v4386_v15 }
 0x128   :  { %2965 = vmatprep.subr.bf16.mxu0 %v4391_v17  ;;  %3047 = vmatprep.subr.bf16.mxu1 %v4394_v18  ;;  %v4461_v18 = vld [vmem:[%s5988_s1 + $0x910] ss:$52 sps:$4 sm:$0xff]  }
 0x12b   :  { %2966 = vmatpush1.bf16.msra.mxu0 %v4389_v19  ;;  %3048 = vmatpush1.bf16.msra.mxu1 %v4392_v20 }
 0x12c   :  { %2967 = vmatprep.subr.bf16.mxu0 %v4397_v22  ;;  %3049 = vmatprep.subr.bf16.mxu1 %v4400_v23 }
 0x12f   :  { %2968 = vmatpush1.bf16.msra.mxu0 %v4395_v24  ;;  %3050 = vmatpush1.bf16.msra.mxu1 %v4398_v25  ;;  %v4464_v24 = vld [vmem:[%s5988_s1 + $0x918] ss:$52 sps:$4 sm:$0xff]   ;;  %v4469_v25 = vld [vmem:[%s5988_s1 + $0x97c] ss:$52 sps:$4 sm:$0xff]  }
 0x130   :  { %2969 = vmatprep.subr.bf16.mxu0 %v4403_v26  ;;  %3051 = vmatprep.subr.bf16.mxu1 %v4406_v27 }
 0x133   :  { %2970 = vmatpush1.bf16.msra.mxu0 %v4401_v28  ;;  %3052 = vmatpush1.bf16.msra.mxu1 %v4404_v29  ;;  %v4472_v28 = vld [vmem:[%s5988_s1 + $0x984] ss:$52 sps:$4 sm:$0xff]  }
 0x134   :  { %2971 = vmatprep.subr.bf16.mxu0 %v4409_v30  ;;  %3053 = vmatprep.subr.bf16.mxu1 %v4412_v31 }
 0x137   :  { %2972 = vmatpush1.bf16.msra.mxu0 %v4407_v32  ;;  %3054 = vmatpush1.bf16.msra.mxu1 %v4410_v33 }
 0x138   :  { %2973 = vmatprep.subr.bf16.mxu0 %v4415_v34  ;;  %3055 = vmatprep.subr.bf16.mxu1 %v4418_v35  ;;  %v4467_v35 = vld [vmem:[%s5988_s1 + $0x978] ss:$52 sps:$4 sm:$0xff]  }
 0x13b   :  { %2974 = vmatpush1.bf16.msra.mxu0 %v4413_v36  ;;  %3056 = vmatpush1.bf16.msra.mxu1 %v4416_v37 }
 0x13c   :  { %2975 = vmatprep.subr.bf16.mxu0 %v4421_v39  ;;  %3057 = vmatprep.subr.bf16.mxu1 %v4424_v40  ;;  %v4470_v39 = vld [vmem:[%s5988_s1 + $0x980] ss:$52 sps:$4 sm:$0xff]   ;;  %v4475_v40 = vld [vmem:[%s5988_s1 + $0x9e4] ss:$52 sps:$4 sm:$0xff]  }
 0x13f   :  { %2976 = vmatpush1.bf16.msra.mxu0 %v4419_v41  ;;  %3058 = vmatpush1.bf16.msra.mxu1 %v4422_v42 }
 0x140   :  { %2986 = vmatprep.subr.bf16.mxu0 %v4427_v43  ;;  %3068 = vmatprep.subr.bf16.mxu1 %v4430_v44  ;;  %v4478_v43 = vld [vmem:[%s5988_s1 + $0x9ec] ss:$52 sps:$4 sm:$0xff]  }
 0x142   :  { %2978 = vmatmul.mubr.bf16.vlgmr.msra.gmra.mrb[8].mxu0 %v4843_v12  ;;  %3060 = vmatmul.mubr.bf16.vlgmr.msra.gmra.mrb[8].mxu1 %v4843_v12 }
 0x143   :  { %2987 = vmatpush1.bf16.msra.mxu0 %v4425_v46  ;;  %3069 = vmatpush1.bf16.msra.mxu1 %v4428_v47  ;;  %v4473_v47 = vld [vmem:[%s5988_s1 + $0x9e0] ss:$52 sps:$4 sm:$0xff]  }
 0x144   :  { %2988 = vmatprep.subr.bf16.mxu0 %v4433_v48  ;;  %3070 = vmatprep.subr.bf16.mxu1 %v4436_v49  ;;  %v4476_v48 = vld [vmem:[%s5988_s1 + $0x9e8] ss:$52 sps:$4 sm:$0xff]   ;;  %v4481_v49 = vld [vmem:[%s5988_s1 + $0xa4c] ss:$52 sps:$4 sm:$0xff]  }
 0x145   :  { %3018 = vmatprep.mubr.bf16.mxu0 %v4856_v16  ;;  %3100 = vmatprep.mubr.bf16.mxu1 %v4856_v16 }
 0x147   :  { %2989 = vmatpush1.bf16.msra.mxu0 %v4431_v50  ;;  %3071 = vmatpush1.bf16.msra.mxu1 %v4434_v52  ;;  %v4484_v50 = vld [vmem:[%s5988_s1 + $0xa54] ss:$52 sps:$4 sm:$0xff]  }
 0x148   :  { %2990 = vmatprep.subr.bf16.mxu0 %v4439_v53  ;;  %3072 = vmatprep.subr.bf16.mxu1 %v4442_v54  ;;  %v4479_v52 = vld [vmem:[%s5988_s1 + $0xa48] ss:$52 sps:$4 sm:$0xff]   ;;  %v4482_v53 = vld [vmem:[%s5988_s1 + $0xa50] ss:$52 sps:$4 sm:$0xff]  }
 0x149   :  { %v4487_v54 = vld [vmem:[%s5988_s1 + $0xab4] ss:$52 sps:$4 sm:$0xff]  }
 0x14b   :  { %2991 = vmatpush1.bf16.msra.mxu0 %v4437_v55  ;;  %3073 = vmatpush1.bf16.msra.mxu1 %v4440_v56  ;;  %v4490_v55 = vld [vmem:[%s5988_s1 + $0xabc] ss:$52 sps:$4 sm:$0xff]  }
 0x14c   :  { %2992 = vmatprep.subr.bf16.mxu0 %v4445_v57  ;;  %3074 = vmatprep.subr.bf16.mxu1 %v4448_v59  ;;  %v4485_v56 = vld [vmem:[%s5988_s1 + $0xab0] ss:$52 sps:$4 sm:$0xff]   ;;  %v4488_v57 = vld [vmem:[%s5988_s1 + $0xab8] ss:$52 sps:$4 sm:$0xff]  }
 0x14f   :  { %2993 = vmatpush1.bf16.msra.mxu0 %v4443_v60  ;;  %3075 = vmatpush1.bf16.msra.mxu1 %v4446_v61  ;;  %v4493_v60 = vld [vmem:[%s5988_s1 + $0xb1c] ss:$52 sps:$4 sm:$0xff]   ;;  %v4496_v61 = vld [vmem:[%s5988_s1 + $0xb24] ss:$52 sps:$4 sm:$0xff]  }
 0x150   :  { %2994 = vmatprep.subr.bf16.mxu0 %v4451_v62  ;;  %3076 = vmatprep.subr.bf16.mxu1 %v4454_v63 }
 0x153   :  { %2995 = vmatpush1.bf16.msra.mxu0 %v4449_v1  ;;  %3077 = vmatpush1.bf16.msra.mxu1 %v4452_v2 }
 0x154   :  { %2996 = vmatprep.subr.bf16.mxu0 %v4457_v4  ;;  %3078 = vmatprep.subr.bf16.mxu1 %v4460_v45  ;;  %v4491_v4 = vld [vmem:[%s5988_s1 + $0xb18] ss:$52 sps:$4 sm:$0xff]   ;;  %v4494_v45 = vld [vmem:[%s5988_s1 + $0xb20] ss:$52 sps:$4 sm:$0xff]  }
 0x155   :  { %v2692_v10 = vpop.f32.mrb[0].mxu0  ;;  %v2774_v11 = vpop.f32.mrb[0].mxu1 }
 0x156   :  { %v5717_v13 = vadd.f32 %v2692_v10, %v5702_v5  ;;  %v5720_v14 = vadd.f32 %v2774_v11, %v5702_v5  ;;  %v2694_v15 = vpop.f32.mrb[1].mxu0  ;;  %v2776_v17 = vpop.f32.mrb[1].mxu1  ;;  %v4500_v10 = vld [vmem:[%s5988_s1 + $0xb88] ss:$52 sps:$4 sm:$0xff]   ;;  %v4505_v11 = vld [vmem:[%s5988_s1 + $0xbec] ss:$52 sps:$4 sm:$0xff]  }
 0x157   :  { %v5726_v19 = vadd.f32 %v2694_v15, %v5702_v5  ;;  %v5729_v20 = vadd.f32 %v2776_v17, %v5702_v5  ;;  %v2696_v22 = vpop.f32.mrb[2].mxu0  ;;  %v2778_v23 = vpop.f32.mrb[2].mxu1  ;;  %2997 = vmatpush1.bf16.msra.mxu0 %v4455_v6  ;;  %3079 = vmatpush1.bf16.msra.mxu1 %v4458_v7  ;;  %v4499_v7 = vld [vmem:[%s5988_s1 + $0xb84] ss:$52 sps:$4 sm:$0xff]   ;;  %v4508_v15 = vld [vmem:[%s5988_s1 + $0xbf4] ss:$52 sps:$4 sm:$0xff]  }
 0x158   :  { %v3189_v26 = vand.u32 2147483647, %v5717_v13  ;;  %v3191_v27 = vand.u32 2147483647, %v5720_v14  ;;  %2998 = vmatprep.subr.bf16.mxu0 %v4463_v8  ;;  %3080 = vmatprep.subr.bf16.mxu1 %v4466_v9  ;;  %v2697_v33 = vpop.f32.mrb[3].mxu0  ;;  %v2779_v34 = vpop.f32.mrb[3].mxu1 }
 0x159   :  { %v3190_v29 = vand.u32 2147483647, %v5726_v19  ;;  %v3192_v30 = vand.u32 2147483647, %v5729_v20  ;;  %v4502_v8 = vld [vmem:[%s5988_s1 + $0xb8c] ss:$52 sps:$4 sm:$0xff]  }
 0x15a   :  { %v3202_v31 = vsub.f32 0.0, %v3189_v26  ;;  %v3204_v32 = vsub.f32 0.0, %v3191_v27  ;;  %v4497_v9 = vld [vmem:[%s5988_s1 + $0xb80] ss:$52 sps:$4 sm:$0xff]   ;;  %v4503_v17 = vld [vmem:[%s5988_s1 + $0xbe8] ss:$52 sps:$4 sm:$0xff]  }
 0x15b   :  { %v3203_v36 = vsub.f32 0.0, %v3190_v29  ;;  %v3205_v37 = vsub.f32 0.0, %v3192_v30  ;;  %2999 = vmatpush1.bf16.msra.mxu0 %v4461_v18  ;;  %3081 = vmatpush1.bf16.msra.mxu1 %v4464_v24  ;;  %v4506_v18 = vld [vmem:[%s5988_s1 + $0xbf0] ss:$52 sps:$4 sm:$0xff]   ;;  %vm3241_vm0 = vcmp.ge.f32.partialorder %v5717_v13, 0.0  ;;  %vm3243_vm1 = vcmp.ge.f32.partialorder %v5720_v14, 0.0 }
 0x15c   :  { %v3215_v41 = vmul.f32 1.442695, %v3202_v31  ;;  %v3219_v42 = vmul.f32 1.442695, %v3204_v32  ;;  %3000 = vmatprep.subr.bf16.mxu0 %v4469_v25  ;;  %3082 = vmatprep.subr.bf16.mxu1 %v4472_v28  ;;  %v4511_v22 = vld [vmem:[%s5988_s1 + $0xc54] ss:$52 sps:$4 sm:$0xff]  }
 0x15d   :  { %v3217_v44 = vmul.f32 1.442695, %v3203_v36  ;;  %v3221_v46 = vmul.f32 1.442695, %v3205_v37  ;;  %v4514_v23 = vld [vmem:[%s5988_s1 + $0xc5c] ss:$52 sps:$4 sm:$0xff]  }
 0x15e   :  { %4553 = vpow2.f32 %v3215_v41  ;;  %vm3242_vm2 = vcmp.ge.f32.partialorder %v5726_v19, 0.0  ;;  %vm3244_vm3 = vcmp.ge.f32.partialorder %v5729_v20, 0.0  ;;  %v4509_v31 = vld [vmem:[%s5988_s1 + $0xc50] ss:$52 sps:$4 sm:$0xff]   ;;  %v4512_v14 = vld [vmem:[%s5988_s1 + $0xc58] ss:$52 sps:$4 sm:$0xff]  }
 0x15f   :  { %4555 = vpow2.f32 %v3219_v42  ;;  %3001 = vmatpush1.bf16.msra.mxu0 %v4467_v35  ;;  %3083 = vmatpush1.bf16.msra.mxu1 %v4470_v39  ;;  %v4517_v19 = vld [vmem:[%s5988_s1 + $0xcbc] ss:$52 sps:$4 sm:$0xff]   ;;  %v4520_v20 = vld [vmem:[%s5988_s1 + $0xcc4] ss:$52 sps:$4 sm:$0xff]  }
 0x160   :  { %4557 = vpow2.f32 %v3217_v44  ;;  %3002 = vmatprep.subr.bf16.mxu0 %v4475_v40  ;;  %3084 = vmatprep.subr.bf16.mxu1 %v4478_v43  ;;  %v4515_v43 = vld [vmem:[%s5988_s1 + $0xcb8] ss:$52 sps:$4 sm:$0xff]   ;;  %v4518_v44 = vld [vmem:[%s5988_s1 + $0xcc0] ss:$52 sps:$4 sm:$0xff]  }
 0x161   :  { %4559 = vpow2.f32 %v3221_v46 }
 0x163   :  { %3003 = vmatpush1.bf16.msra.mxu0 %v4473_v47  ;;  %3085 = vmatpush1.bf16.msra.mxu1 %v4476_v48  ;;  %v4521_v47 = vld [vmem:[%s5988_s1 + $0x370] ss:$52 sps:$4 sm:$0xff]  }
 0x164   :  { %3004 = vmatprep.subr.bf16.mxu0 %v4481_v49  ;;  %3086 = vmatprep.subr.bf16.mxu1 %v4484_v50  ;;  %v4522_v48 = vld [vmem:[%s5988_s1 + $0x9f0] ss:$52 sps:$4 sm:$0xff]  }
 0x167   :  { %3005 = vmatpush1.bf16.msra.mxu0 %v4479_v52  ;;  %3087 = vmatpush1.bf16.msra.mxu1 %v4482_v53  ;;  %v4523_v53 = vld [vmem:[%s5988_s1 + $0x30] ss:$52 sps:$4 sm:$0xff]  }
 0x168   :  { %v4554_v59 = vpop.eup %4553  ;;  %3006 = vmatprep.subr.bf16.mxu0 %v4487_v54  ;;  %3088 = vmatprep.subr.bf16.mxu1 %v4490_v55  ;;  %v4524_v54 = vld [vmem:[%s5988_s1 + $0x6b0] ss:$52 sps:$4 sm:$0xff]  }
 0x169   :  { %v4556_v62 = vpop.eup %4555  ;;  %v3267_v63 = vadd.f32 1.0, %v4554_v59  ;;  %v3254_v25 = vsel %vm3241_vm0, 1.0, %v4554_v59 }
 0x16a   :  { %v4558_v0 = vpop.eup %4557  ;;  %v3269_v1 = vadd.f32 1.0, %v4556_v62  ;;  %v3256_v28 = vsel %vm3243_vm1, 1.0, %v4556_v62  ;;  %v4528_v62 = vld [vmem:[%s5988_s1 + $0x718] ss:$52 sps:$4 sm:$0xff]  }
 0x16b   :  { %v4560_v2 = vpop.eup %4559  ;;  %4561 = vrcp.f32 %v3267_v63  ;;  %v3268_v3 = vadd.f32 1.0, %v4558_v0  ;;  %3007 = vmatpush1.bf16.msra.mxu0 %v4485_v56  ;;  %3089 = vmatpush1.bf16.msra.mxu1 %v4488_v57  ;;  %v3255_v30 = vsel %vm3242_vm2, 1.0, %v4558_v0  ;;  %v4525_v56 = vld [vmem:[%s5988_s1 + $0x3d8] ss:$52 sps:$4 sm:$0xff]   ;;  %v4529_v63 = vld [vmem:[%s5988_s1 + $0x440] ss:$52 sps:$4 sm:$0xff]  }
 0x16c   :  { %4563 = vrcp.f32 %v3269_v1  ;;  %v3270_v6 = vadd.f32 1.0, %v4560_v2  ;;  %3008 = vmatprep.subr.bf16.mxu0 %v4493_v60  ;;  %3090 = vmatprep.subr.bf16.mxu1 %v4496_v61  ;;  %v3257_v35 = vsel %vm3244_vm3, 1.0, %v4560_v2  ;;  %v4526_v57 = vld [vmem:[%s5988_s1 + $0xa58] ss:$52 sps:$4 sm:$0xff]   ;;  %v4530_v0 = vld [vmem:[%s5988_s1 + $0xac0] ss:$52 sps:$4 sm:$0xff]  }
 0x16d   :  { %4565 = vrcp.f32 %v3268_v3  ;;  %v4527_v61 = vld [vmem:[%s5988_s1 + $0x98] ss:$52 sps:$4 sm:$0xff]   ;;  %v4531_v1 = vld [vmem:[%s5988_s1 + $0x100] ss:$52 sps:$4 sm:$0xff]   ;;  %v4533_v3 = vld [vmem:[%s5988_s1 + $0x4a8] ss:$52 sps:$4 sm:$0xff]  }
 0x16e   :  { %4567 = vrcp.f32 %v3270_v6  ;;  %v4532_v2 = vld [vmem:[%s5988_s1 + $0x780] ss:$52 sps:$4 sm:$0xff]   ;;  %v4538_v6 = vld [vmem:[%s5988_s1 + $0xb90] ss:$52 sps:$4 sm:$0xff]  }
 0x16f   :  { %3009 = vmatpush1.bf16.msra.mxu0 %v4491_v4  ;;  %3091 = vmatpush1.bf16.msra.mxu1 %v4494_v45  ;;  %v4536_v4 = vld [vmem:[%s5988_s1 + $0x7e8] ss:$52 sps:$4 sm:$0xff]   ;;  %v4537_v45 = vld [vmem:[%s5988_s1 + $0x510] ss:$52 sps:$4 sm:$0xff]  }
 0x170   :  { %3010 = vmatprep.subr.bf16.mxu0 %v4499_v7  ;;  %3092 = vmatprep.subr.bf16.mxu1 %v4502_v8  ;;  %v4539_v7 = vld [vmem:[%s5988_s1 + $0x1d0] ss:$52 sps:$4 sm:$0xff]  }
 0x171   :  { %v4540_v8 = vld [vmem:[%s5988_s1 + $0x850] ss:$52 sps:$4 sm:$0xff]  }
 0x173   :  { %3011 = vmatpush1.bf16.msra.mxu0 %v4497_v9  ;;  %3093 = vmatpush1.bf16.msra.mxu1 %v4500_v10  ;;  %v4541_v9 = vld [vmem:[%s5988_s1 + $0x578] ss:$52 sps:$4 sm:$0xff]  }
 0x174   :  { %3012 = vmatprep.subr.bf16.mxu0 %v4505_v11  ;;  %3094 = vmatprep.subr.bf16.mxu1 %v4508_v15  ;;  %v4542_v10 = vld [vmem:[%s5988_s1 + $0xbf8] ss:$52 sps:$4 sm:$0xff]  }
 0x175   :  { %v4562_v24 = vpop.eup %4561  ;;  %v4543_v11 = vld [vmem:[%s5988_s1 + $0x238] ss:$52 sps:$4 sm:$0xff]  }
 0x176   :  { %v4564_v26 = vpop.eup %4563  ;;  %v3293_v27 = vmul.f32 %v4562_v24, %v3254_v25  ;;  %v4544_v15 = vld [vmem:[%s5988_s1 + $0x8b8] ss:$52 sps:$4 sm:$0xff]   ;;  %v4549_v24 = vld [vmem:[%s5988_s1 + $0x648] ss:$52 sps:$4 sm:$0xff]  }
 0x177   :  { %v4566_v13 = vpop.eup %4565  ;;  %v3295_v29 = vmul.f32 %v4564_v26, %v3256_v28  ;;  %3013 = vmatpush1.bf16.msra.mxu0 %v4503_v17  ;;  %3095 = vmatpush1.bf16.msra.mxu1 %v4506_v18  ;;  %v4545_v17 = vld [vmem:[%s5988_s1 + $0x5e0] ss:$52 sps:$4 sm:$0xff]   ;;  %v4550_v25 = vld [vmem:[%s5988_s1 + $0xcc8] ss:$52 sps:$4 sm:$0xff]  }
 0x178   :  { %v4568_v32 = vpop.eup %4567  ;;  %v3306_v33 = vmax.f32 %v3293_v27, 0.0  ;;  %v3294_v34 = vmul.f32 %v4566_v13, %v3255_v30  ;;  %3014 = vmatprep.subr.bf16.mxu0 %v4511_v22  ;;  %3096 = vmatprep.subr.bf16.mxu1 %v4514_v23  ;;  %v4546_v18 = vld [vmem:[%s5988_s1 + $0xc60] ss:$52 sps:$4 sm:$0xff]   ;;  %v4551_v26 = vld [vmem:[%s5988_s1 + $0x308] ss:$52 sps:$4 sm:$0xff]  }
 0x179   :  { %v3308_v36 = vmax.f32 %v3295_v29, 0.0  ;;  %v3296_v37 = vmul.f32 %v4568_v32, %v3257_v35  ;;  %v4547_v22 = vld [vmem:[%s5988_s1 + $0x2a0] ss:$52 sps:$4 sm:$0xff]   ;;  %v4552_v27 = vld [vmem:[%s5988_s1 + $0x988] ss:$52 sps:$4 sm:$0xff]  }
 0x17a   :  { %v3319_v39 = vmin.f32 %v3306_v33, 1.0  ;;  %v3307_v40 = vmax.f32 %v3294_v34, 0.0  ;;  %v4548_v23 = vld [vmem:[%s5988_s1 + $0x920] ss:$52 sps:$4 sm:$0xff]  }
 0x17b   :  { %v3321_v41 = vmin.f32 %v3308_v36, 1.0  ;;  %v3309_v42 = vmax.f32 %v3296_v37, 0.0  ;;  %3015 = vmatpush1.bf16.msra.mxu0 %v4509_v31  ;;  %3097 = vmatpush1.bf16.msra.mxu1 %v4512_v14 }
 0x17c   :  { %v3320_v46 = vmin.f32 %v3307_v40, 1.0  ;;  %3016 = vmatprep.subr.bf16.mxu0 %v4517_v19  ;;  %3098 = vmatprep.subr.bf16.mxu1 %v4520_v20 }
 0x17d   :  { %v3322_v49 = vmin.f32 %v3309_v42, 1.0 }
 0x17e   :  { %v3345_v50 = vcombine.low %v3319_v39, %v3320_v46 }
 0x17f   :  { %v3346_v52 = vcombine.low %v3321_v41, %v3322_v49  ;;  %3017 = vmatpush1.bf16.msra.mxu0 %v4515_v43  ;;  %3099 = vmatpush1.bf16.msra.mxu1 %v4518_v44 }
 0x180   :  { %v5863_v55 = vrot.slane %v3345_v50, %v4769_v51  ;;  %3862 = vmatprep.subr.bf16.mxu0 %v4521_v47  ;;  %3884 = vmatprep.subr.bf16.mxu1 %v4522_v48 }
 0x181   :  { %v5872_v59 = vrot.slane %v3346_v52, %v4769_v51 }
 0x182   :  { %3019 = vmatmul.mubr.bf16.vlgmr.msra.gmra.mrb[8].mxu0 %v5047_v21  ;;  %3101 = vmatmul.mubr.bf16.vlgmr.msra.gmra.mrb[8].mxu1 %v5047_v21 }
 0x183   :  { %v3377_v60 = vcombine.low %v5863_v55, %v5872_v59  ;;  %3863 = vmatpush3.bf16.msra.mxu0 %v4523_v53  ;;  %3885 = vmatpush3.bf16.msra.mxu1 %v4524_v54 }
 0x184   :  { %3864 = vmatprep.subr.bf16.mxu0 %v4525_v56  ;;  %3886 = vmatprep.subr.bf16.mxu1 %v4526_v57 }
 0x185   :  { %3141 = vmatprep.mubr.bf16.mxu0 %v4787_v58  ;;  %3181 = vmatprep.mubr.bf16.mxu1 %v4856_v16  ;;  %v4534_v58 = vld [vmem:[%s5988_s1 + $0xb28] ss:$52 sps:$4 sm:$0xff]  }
 0x186   :  { %v4535_v16 = vld [vmem:[%s5988_s1 + $0x168] ss:$52 sps:$4 sm:$0xff]  }
 0x187   :  { %3865 = vmatpush3.bf16.msra.mxu0 %v4527_v61  ;;  %3887 = vmatpush3.bf16.msra.mxu1 %v4528_v62 }
 0x188   :  { %3866 = vmatprep.subr.bf16.mxu0 %v4529_v63  ;;  %3888 = vmatprep.subr.bf16.mxu1 %v4530_v0 }
 0x18b   :  { %3867 = vmatpush3.bf16.msra.mxu0 %v4531_v1  ;;  %3889 = vmatpush3.bf16.msra.mxu1 %v4532_v2 }
 0x18c   :  { %3868 = vmatprep.subr.bf16.mxu0 %v4533_v3  ;;  %3890 = vmatprep.subr.bf16.mxu1 %v4534_v58 }
 0x18f   :  { %3869 = vmatpush3.bf16.msra.mxu0 %v4535_v16  ;;  %3891 = vmatpush3.bf16.msra.mxu1 %v4536_v4 }
 0x190   :  { %3870 = vmatprep.subr.bf16.mxu0 %v4537_v45  ;;  %3892 = vmatprep.subr.bf16.mxu1 %v4538_v6 }
 0x193   :  { %3871 = vmatpush3.bf16.msra.mxu0 %v4539_v7  ;;  %3893 = vmatpush3.bf16.msra.mxu1 %v4540_v8 }
 0x194   :  { %3872 = vmatprep.subr.bf16.mxu0 %v4541_v9  ;;  %3894 = vmatprep.subr.bf16.mxu1 %v4542_v10 }
 0x197   :  { %3873 = vmatpush3.bf16.msra.mxu0 %v4543_v11  ;;  %3895 = vmatpush3.bf16.msra.mxu1 %v4544_v15 }
 0x198   :  { %3874 = vmatprep.subr.bf16.mxu0 %v4545_v17  ;;  %3896 = vmatprep.subr.bf16.mxu1 %v4546_v18 }
 0x19b   :  { %3875 = vmatpush3.bf16.msra.mxu0 %v4547_v22  ;;  %3897 = vmatpush3.bf16.msra.mxu1 %v4548_v23 }
 0x19c   :  { %3876 = vmatprep.subr.bf16.mxu0 %v4549_v24  ;;  %3898 = vmatprep.subr.bf16.mxu1 %v4550_v25 }
 0x19f   :  { %3877 = vmatpush3.bf16.msra.mxu0 %v4551_v26  ;;  %3899 = vmatpush3.bf16.msra.mxu1 %v4552_v27  ;;  %v3385_v27 = vrot.slane %v3377_v60, %v4769_v51 }
 0x1a2   :  { %3142 = vmatmul.mubr.bf16.vlgmr.msra.gmra.mrb[12].mxu0 %v4843_v12  ;;  %3182 = vmatmul.mubr.bf16.vlgmr.msra.gmra.mrb[12].mxu1 %v5047_v21 }
 0x1d5   :  { %v2856_v28 = vpop.f32.mrb[4].mxu0  ;;  %v2938_v13 = vpop.f32.mrb[4].mxu1 }
 0x1d6   :  { %v3910_v29 = vadd.f32 %v2856_v28, %v5702_v5  ;;  %v3912_v30 = vadd.f32 %v2938_v13, %v5702_v5  ;;  %v2858_v31 = vpop.f32.mrb[5].mxu0  ;;  %v2940_v14 = vpop.f32.mrb[5].mxu1 }
 0x1d7   :  { %v3911_v32 = vadd.f32 %v2858_v31, %v5702_v5  ;;  %v3913_v33 = vadd.f32 %v2940_v14, %v5702_v5  ;;  %v2860_v34 = vpop.f32.mrb[6].mxu0  ;;  %v2942_v35 = vpop.f32.mrb[6].mxu1 }
 0x1d8   :  { %v3193_v19 = vand.u32 2147483647, %v3910_v29  ;;  %v3195_v20 = vand.u32 2147483647, %v3912_v30  ;;  %v2861_v39 = vpop.f32.mrb[7].mxu0  ;;  %v2943_v40 = vpop.f32.mrb[7].mxu1 }
 0x1d9   :  { %v3194_v36 = vand.u32 2147483647, %v3911_v32  ;;  %v3196_v12 = vand.u32 2147483647, %v3913_v33  ;;  %vm3245_vm4 = vcmp.ge.f32.partialorder %v3910_v29, 0.0  ;;  %vm3247_vm5 = vcmp.ge.f32.partialorder %v3912_v30, 0.0 }
 0x1da   :  { %v3206_v37 = vsub.f32 0.0, %v3193_v19  ;;  %v3208_v21 = vsub.f32 0.0, %v3195_v20  ;;  %vm3246_vm6 = vcmp.ge.f32.partialorder %v3911_v32, 0.0  ;;  %vm3248_vm7 = vcmp.ge.f32.partialorder %v3913_v33, 0.0 }
 0x1db   :  { %v3207_v41 = vsub.f32 0.0, %v3194_v36  ;;  %v3209_v42 = vsub.f32 0.0, %v3196_v12 }
 0x1dc   :  { %v3223_v43 = vmul.f32 1.442695, %v3206_v37  ;;  %v3227_v44 = vmul.f32 1.442695, %v3208_v21 }
 0x1dd   :  { %v3225_v46 = vmul.f32 1.442695, %v3207_v41  ;;  %v3229_v47 = vmul.f32 1.442695, %v3209_v42 }
 0x1de   :  { %4569 = vpow2.f32 %v3223_v43 }
 0x1df   :  { %4571 = vpow2.f32 %v3227_v44 }
 0x1e0   :  { %4573 = vpow2.f32 %v3225_v46 }
 0x1e1   :  { %4575 = vpow2.f32 %v3229_v47 }
 0x1e8   :  { %v4570_v48 = vpop.eup %4569 }
 0x1e9   :  { %v4572_v49 = vpop.eup %4571  ;;  %v3271_v50 = vadd.f32 1.0, %v4570_v48  ;;  %v3258_v62 = vsel %vm3245_vm4, 1.0, %v4570_v48 }
 0x1ea   :  { %v4574_v52 = vpop.eup %4573  ;;  %v3273_v53 = vadd.f32 1.0, %v4572_v49  ;;  %v3260_v1 = vsel %vm3247_vm5, 1.0, %v4572_v49 }
 0x1eb   :  { %v4576_v54 = vpop.eup %4575  ;;  %4577 = vrcp.f32 %v3271_v50  ;;  %v3272_v56 = vadd.f32 1.0, %v4574_v52  ;;  %v3259_v58 = vsel %vm3246_vm6, 1.0, %v4574_v52 }
 0x1ec   :  { %4579 = vrcp.f32 %v3273_v53  ;;  %v3274_v57 = vadd.f32 1.0, %v4576_v54  ;;  %v3261_v6 = vsel %vm3248_vm7, 1.0, %v4576_v54 }
 0x1ed   :  { %4581 = vrcp.f32 %v3272_v56 }
 0x1ee   :  { %4583 = vrcp.f32 %v3274_v57 }
 0x1f5   :  { %v4578_v61 = vpop.eup %4577 }
 0x1f6   :  { %v4580_v63 = vpop.eup %4579  ;;  %v3297_v0 = vmul.f32 %v4578_v61, %v3258_v62 }
 0x1f7   :  { %v4582_v2 = vpop.eup %4581  ;;  %v3299_v3 = vmul.f32 %v4580_v63, %v3260_v1 }
 0x1f8   :  { %v4584_v16 = vpop.eup %4583  ;;  %v3310_v4 = vmax.f32 %v3297_v0, 0.0  ;;  %v3298_v45 = vmul.f32 %v4582_v2, %v3259_v58 }
 0x1f9   :  { %v3312_v7 = vmax.f32 %v3299_v3, 0.0  ;;  %v3300_v8 = vmul.f32 %v4584_v16, %v3261_v6 }
 0x1fa   :  { %v3323_v9 = vmin.f32 %v3310_v4, 1.0  ;;  %v3311_v10 = vmax.f32 %v3298_v45, 0.0 }
 0x1fb   :  { %v3325_v11 = vmin.f32 %v3312_v7, 1.0  ;;  %v3313_v15 = vmax.f32 %v3300_v8, 0.0 }
 0x1fc   :  { %v3324_v17 = vmin.f32 %v3311_v10, 1.0 }
 0x1fd   :  { %v3326_v18 = vmin.f32 %v3313_v15, 1.0 }
 0x1fe   :  { %v3347_v22 = vcombine.low %v3323_v9, %v3324_v17 }
 0x1ff   :  { %v3348_v23 = vcombine.low %v3325_v11, %v3326_v18 }
 0x200   :  { %v3369_v24 = vrot.slane %v3347_v22, %v4769_v51 }
 0x201   :  { %v3376_v25 = vrot.slane %v3348_v23, %v4769_v51 }
 0x203   :  { %v3378_v26 = vcombine.low %v3369_v24, %v3376_v25 }
 0x205   :  { %v3392_v28 = vrot.slane %v3378_v26, %v4769_v51 }
 0x207   :  { %v3393_v13 = vcombine.low %v3385_v27, %v3392_v28 }
 0x209   :  { %3435 = vst [vmem:[%s5991_s3] sm:$0xff] %v3393_v13 }
 0x255   :  { %v3020_v29 = vpop.f32.mrb[8].mxu0  ;;  %v3102_v30 = vpop.f32.mrb[8].mxu1 }
 0x256   :  { %v3914_v31 = vadd.f32 %v3020_v29, %v5702_v5  ;;  %v3916_v14 = vadd.f32 %v3102_v30, %v5702_v5  ;;  %v3022_v32 = vpop.f32.mrb[9].mxu0  ;;  %v3104_v33 = vpop.f32.mrb[9].mxu1 }
 0x257   :  { %v3915_v34 = vadd.f32 %v3022_v32, %v5702_v5  ;;  %v3917_v55 = vadd.f32 %v3104_v33, %v5702_v5  ;;  %v3024_v59 = vpop.f32.mrb[10].mxu0  ;;  %v3106_v60 = vpop.f32.mrb[10].mxu1 }
 0x258   :  { %v3197_v35 = vand.u32 2147483647, %v3914_v31  ;;  %v3199_v19 = vand.u32 2147483647, %v3916_v14  ;;  %v3025_v21 = vpop.f32.mrb[11].mxu0  ;;  %v3107_v39 = vpop.f32.mrb[11].mxu1 }
 0x259   :  { %v3198_v20 = vand.u32 2147483647, %v3915_v34  ;;  %v3200_v36 = vand.u32 2147483647, %v3917_v55  ;;  %vm3249_vm8 = vcmp.ge.f32.partialorder %v3914_v31, 0.0  ;;  %vm3251_vm9 = vcmp.ge.f32.partialorder %v3916_v14, 0.0 }
 0x25a   :  { %v3210_v12 = vsub.f32 0.0, %v3197_v35  ;;  %v3212_v37 = vsub.f32 0.0, %v3199_v19  ;;  %vm3250_vm10 = vcmp.ge.f32.partialorder %v3915_v34, 0.0  ;;  %vm3252_vm11 = vcmp.ge.f32.partialorder %v3917_v55, 0.0 }
 0x25b   :  { %v3211_v40 = vsub.f32 0.0, %v3198_v20  ;;  %v3213_v41 = vsub.f32 0.0, %v3200_v36 }
 0x25c   :  { %v3231_v42 = vmul.f32 1.442695, %v3210_v12  ;;  %v3235_v43 = vmul.f32 1.442695, %v3212_v37 }
 0x25d   :  { %v3233_v44 = vmul.f32 1.442695, %v3211_v40  ;;  %v3237_v46 = vmul.f32 1.442695, %v3213_v41 }
 0x25e   :  { %4585 = vpow2.f32 %v3231_v42 }
 0x25f   :  { %4587 = vpow2.f32 %v3235_v43 }
 0x260   :  { %4589 = vpow2.f32 %v3233_v44 }
 0x261   :  { %4591 = vpow2.f32 %v3237_v46 }
 0x268   :  { %v4586_v47 = vpop.eup %4585 }
 0x269   :  { %v4588_v48 = vpop.eup %4587  ;;  %v3275_v49 = vadd.f32 1.0, %v4586_v47  ;;  %v3262_v61 = vsel %vm3249_vm8, 1.0, %v4586_v47 }
 0x26a   :  { %v4590_v50 = vpop.eup %4589  ;;  %v3277_v52 = vadd.f32 1.0, %v4588_v48  ;;  %v3264_v2 = vsel %vm3251_vm9, 1.0, %v4588_v48 }
 0x26b   :  { %v4592_v53 = vpop.eup %4591  ;;  %4593 = vrcp.f32 %v3275_v49  ;;  %v3276_v54 = vadd.f32 1.0, %v4590_v50  ;;  %v3263_v45 = vsel %vm3250_vm10, 1.0, %v4590_v50 }
 0x26c   :  { %4595 = vrcp.f32 %v3277_v52  ;;  %v3278_v56 = vadd.f32 1.0, %v4592_v53  ;;  %v3265_v17 = vsel %vm3252_vm11, 1.0, %v4592_v53 }
 0x26d   :  { %4597 = vrcp.f32 %v3276_v54 }
 0x26e   :  { %4599 = vrcp.f32 %v3278_v56 }
 0x275   :  { %v4594_v57 = vpop.eup %4593  ;;  %v3878_v62 = vpop.f32.mrb[12].mxu0 }
 0x276   :  { %v3900_v63 = vpop.f32.mrb[12].mxu1  ;;  %v4596_v0 = vpop.eup %4595  ;;  %v3301_v1 = vmul.f32 %v4594_v57, %v3262_v61 }
 0x277   :  { %v3879_v3 = vpop.f32.mrb[13].mxu0  ;;  %v3901_v58 = vpop.f32.mrb[13].mxu1  ;;  %v3303_v4 = vmul.f32 %v4596_v0, %v3264_v2 }
 0x278   :  { %v4598_v16 = vpop.eup %4597  ;;  %v3880_v6 = vadd.f32 %v3879_v3, %v3878_v62  ;;  %v3902_v7 = vadd.f32 %v3901_v58, %v3900_v63  ;;  %v3881_v8 = vpop.f32.mrb[14].mxu0  ;;  %v3314_v11 = vmax.f32 %v3301_v1, 0.0 }
 0x279   :  { %v3903_v9 = vpop.f32.mrb[14].mxu1  ;;  %v4600_v10 = vpop.eup %4599  ;;  %v3302_v15 = vmul.f32 %v4598_v16, %v3263_v45  ;;  %v3316_v23 = vmax.f32 %v3303_v4, 0.0 }
 0x27a   :  { %v3882_v18 = vpop.f32.mrb[15].mxu0  ;;  %v3904_v22 = vpop.f32.mrb[15].mxu1  ;;  %v3304_v24 = vmul.f32 %v4600_v10, %v3265_v17  ;;  %v3144_v25 = vadd.f32 %v3880_v6, %v5702_v5  ;;  %v3327_v26 = vmin.f32 %v3314_v11, 1.0 }
 0x27b   :  { %v3315_v27 = vmax.f32 %v3302_v15, 0.0  ;;  %v3329_v28 = vmin.f32 %v3316_v23, 1.0 }
 0x27c   :  { %v3317_v13 = vmax.f32 %v3304_v24, 0.0  ;;  %v3184_v29 = vadd.f32 %v3902_v7, %v3144_v25 }
 0x27d   :  { %v3328_v30 = vmin.f32 %v3315_v27, 1.0 }
 0x27e   :  { %v3330_v31 = vmin.f32 %v3317_v13, 1.0  ;;  %v3201_v14 = vand.u32 2147483647, %v3184_v29  ;;  %vm3253_vm12 = vcmp.ge.f32.partialorder %v3184_v29, 0.0 }
 0x27f   :  { %v3394_v32 = vcombine.low %v3327_v26, %v3328_v30 }
 0x280   :  { %v3395_v33 = vcombine.low %v3329_v28, %v3330_v31  ;;  %v3214_v34 = vsub.f32 0.0, %v3201_v14 }
 0x281   :  { %v3402_v55 = vrot.slane %v3394_v32, %v4769_v51 }
 0x282   :  { %v3409_v59 = vrot.slane %v3395_v33, %v4769_v51  ;;  %v3239_v60 = vmul.f32 1.442695, %v3214_v34 }
 0x284   :  { %v3417_v35 = vcombine.low %v3402_v55, %v3409_v59  ;;  %4601 = vpow2.f32 %v3239_v60 }
 0x286   :  { %v3424_v40 = vrot.slane %v3417_v35, %v4769_v51 }
 0x28e   :  { %v4602_v19 = vpop.eup %4601 }
 0x28f   :  { %v3279_v5 = vadd.f32 1.0, %v4602_v19  ;;  %v3266_v36 = vsel %vm3253_vm12, 1.0, %v4602_v19 }
 0x291   :  { %4603 = vrcp.f32 %v3279_v5 }
 0x29b   :  { %v4604_v20 = vpop.eup %4603 }
 0x29c   :  { %v3305_v12 = vmul.f32 %v4604_v20, %v3266_v36 }
 0x29e   :  { %v3318_v37 = vmax.f32 %v3305_v12, 0.0 }
 0x2a0   :  { %v3331_v21 = vmin.f32 %v3318_v37, 1.0 }
 0x2a2   :  { %v3416_v39 = vrot.slane %v3331_v21, %v4769_v51 }
 0x2a4   :  { %v3431_v41 = vrot.slane %v3416_v39, %v4769_v51 }
 0x2a6   :  { %v3432_v42 = vcombine.low %v3424_v40, %v3431_v41 }
 0x2a8   :  { %3440 = vst.msk [vmem:[%s5991_s3 + $0x8] sm:$0x1f] %vm3438_vm13, %v3432_v42 }

</bundles_post_ra>
